<compile_context>
chip_gen: v5e
topology: v5e:2x2
jax: 0.10.0
libtpu: 0.0.40
codegen_flags: <defaults>
</compile_context>

<pallas_src>
import jax
import jax.numpy as jnp
from jax.experimental import pallas as pl
from jax.experimental.pallas import tpu as pltpu

LANE = 128


def _round_up(x, m):
    return (x + m - 1) // m * m


# ----------------------------- Pallas kernel --------------------------------
def decoder_kernel(x_ref,                 # (B, T, O)     batch-first input
                   w0_ref, b0_ref,        # (O, 4Hp), (1, 4Hp)  fused emb+w_ih[0]
                   w_ih_ref,              # (L, Hp, 4Hp)  (layer-0 slot unused)
                   w_hh_ref,              # (L, Hp, 4Hp)
                   b_ref,                 # (L, 1, 4Hp)   (layer-0 slot unused)
                   h0_ref, c0_ref,        # (L, B, Hp)    zero-padded state
                   fc_w_ref, fc_b_ref,    # (Hp, O), (1, O)
                   pred_ref,              # (B, T, O)     batch-first output
                   hN_ref, cN_ref,        # (L, B, H)     unpadded final state
                   seq_ref,               # (T, B, Hp)    scratch: layer activations
                   gates_ref):            # (T, B, 4Hp)   scratch: hoisted input gates
    B, T, O = x_ref.shape
    L, _, Hp = h0_ref.shape
    H = hN_ref.shape[2]
    G = 4 * Hp

    # ---- layer-0 input-side gates: embedding (+identity dropout) folded into
    #      a single (O, 4Hp) weight; one big MXU matmul for the whole sequence.
    xt = jnp.transpose(x_ref[...], (1, 0, 2))                    # (T, B, O)
    g0 = jnp.dot(xt.reshape(T * B, O), w0_ref[...],
                 preferred_element_type=jnp.float32) + b0_ref[...]
    gates_ref[...] = g0.reshape(T, B, G)

    # ---- stacked LSTM layers (layer loop static; time loop fully unrolled) --
    for layer in range(L):
        if layer > 0:
            # Hoisted input projection for this layer: one (T*B, Hp)x(Hp, 4Hp)
            # matmul.  seq_ref still holds the previous layer's outputs here;
            # after this the time loop may overwrite seq_ref in place.
            gi = jnp.dot(seq_ref[...].reshape(T * B, Hp), w_ih_ref[layer],
                         preferred_element_type=jnp.float32) + b_ref[layer]
            gates_ref[...] = gi.reshape(T, B, G)

        def step(t, carry, layer=layer):
            h, c = carry
            gates = gates_ref[t] + jnp.dot(
                h, w_hh_ref[layer], preferred_element_type=jnp.float32)
            # PyTorch gate order i, f, g, o; each slice is a full 128-lane tile.
            i_g = jax.nn.sigmoid(gates[:, 0 * Hp:1 * Hp])
            f_g = jax.nn.sigmoid(gates[:, 1 * Hp:2 * Hp])
            g_g = jnp.tanh(gates[:, 2 * Hp:3 * Hp])
            o_g = jax.nn.sigmoid(gates[:, 3 * Hp:4 * Hp])
            c_new = f_g * c + i_g * g_g
            h_new = o_g * jnp.tanh(c_new)
            seq_ref[t] = h_new           # in place; input gates already captured
            return (h_new, c_new)

        h_fin, c_fin = jax.lax.fori_loop(
            0, T, step, (h0_ref[layer], c0_ref[layer]), unroll=True)
        hN_ref[layer] = h_fin[:, :H]
        cN_ref[layer] = c_fin[:, :H]

    # ---- output projection, written back batch-first directly ----
    out = jnp.dot(seq_ref[...].reshape(T * B, Hp), fc_w_ref[...],
                  preferred_element_type=jnp.float32) + fc_b_ref[...]
    pred_ref[...] = jnp.transpose(out.reshape(T, B, O), (1, 0, 2))


# --------------------------- weight padding helpers ---------------------------
def _pad_gate_cols(w, H, Hp):
    """Pad a (..., 4H) gate axis to (..., 4Hp), keeping each gate 128-aligned."""
    if H == Hp:
        return w
    pad = jnp.zeros(w.shape[:-1] + (Hp - H,), w.dtype)
    parts = []
    for g in range(4):
        parts.append(w[..., g * H:(g + 1) * H])
        parts.append(pad)
    return jnp.concatenate(parts, axis=-1)


def _pad_rows(w, H, Hp):
    """Pad the second-to-last (contraction) axis from H to Hp with zeros."""
    if H == Hp:
        return w
    pad = jnp.zeros(w.shape[:-2] + (Hp - H,) + w.shape[-1:], w.dtype)
    return jnp.concatenate([w, pad], axis=-2)


def _pad_last(a, H, Hp):
    if H == Hp:
        return a
    pad = jnp.zeros(a.shape[:-1] + (Hp - H,), a.dtype)
    return jnp.concatenate([a, pad], axis=-1)


# ------------------------------- wrapper -------------------------------------
def decoder_forward(x, h0, c0, params):
    # params: emb_w (O,E), emb_b (1,E), w_ih (L,E,4H), w_hh (L,H,4H),
    #         b (L,1,4H) = b_ih + b_hh, fc_w (H,O), fc_b (1,O)
    # Note: the stacked w_ih format requires E == H when L > 1 (as in the demo).
    emb_w, emb_b, w_ih, w_hh, b, fc_w, fc_b = params
    B, T, O = x.shape
    L, _, H = h0.shape
    Hp = _round_up(H, LANE)

    # Fold embedding (+ identity dropout at inference) into layer-0 w_ih/bias.
    w0 = emb_w @ w_ih[0]                    # (O, 4H)
    b0 = emb_b @ w_ih[0] + b[0]             # (1, 4H)

    # Pad every gate block to a full 128-lane tile; pad state/contractions to Hp.
    # (In production these packed weights would be prepared once and cached.)
    w0_p = _pad_gate_cols(w0, H, Hp)                             # (O, 4Hp)
    b0_p = _pad_gate_cols(b0, H, Hp)                             # (1, 4Hp)
    w_ih_p = _pad_rows(_pad_gate_cols(w_ih, H, Hp), H, Hp)       # (L, Hp, 4Hp)
    w_hh_p = _pad_rows(_pad_gate_cols(w_hh, H, Hp), H, Hp)       # (L, Hp, 4Hp)
    b_p = _pad_gate_cols(b, H, Hp)                               # (L, 1, 4Hp)
    h0_p = _pad_last(h0, H, Hp)                                  # (L, B, Hp)
    c0_p = _pad_last(c0, H, Hp)                                  # (L, B, Hp)
    fc_w_p = _pad_rows(fc_w, H, Hp)                              # (Hp, O)

    vmem = pl.BlockSpec(memory_space=pltpu.MemorySpace.VMEM)
    pred, hN, cN = pl.pallas_call(
        decoder_kernel,
        out_shape=(
            jax.ShapeDtypeStruct((B, T, O), jnp.float32),
            jax.ShapeDtypeStruct((L, B, H), jnp.float32),
            jax.ShapeDtypeStruct((L, B, H), jnp.float32),
        ),
        in_specs=[vmem] * 10,
        out_specs=(vmem, vmem, vmem),
        scratch_shapes=[
            pltpu.VMEM((T, B, Hp), jnp.float32),       # layer activations (in place)
            pltpu.VMEM((T, B, 4 * Hp), jnp.float32),   # hoisted input-side gates
        ],
    )(x, w0_p, b0_p, w_ih_p, w_hh_p, b_p, h0_p, c0_p, fc_w_p, fc_b)

    return pred, hN, cN


# --------------------------- pure-JAX reference -------------------------------
def decoder_reference(x, h0, c0, params):
    emb_w, emb_b, w_ih, w_hh, b, fc_w, fc_b = params
    B, T, O = x.shape
    L, _, H = h0.shape

    seq = x @ emb_w + emb_b[0]                         # (B, T, E)
    h_out, c_out = [], []
    for layer in range(L):
        h, c = h0[layer], c0[layer]
        outs = []
        for t in range(T):
            gates = seq[:, t, :] @ w_ih[layer] + h @ w_hh[layer] + b[layer, 0]
            i_g = jax.nn.sigmoid(gates[:, 0 * H:1 * H])
            f_g = jax.nn.sigmoid(gates[:, 1 * H:2 * H])
            g_g = jnp.tanh(gates[:, 2 * H:3 * H])
            o_g = jax.nn.sigmoid(gates[:, 3 * H:4 * H])
            c = f_g * c + i_g * g_g
            h = o_g * jnp.tanh(c)
            outs.append(h)
        seq = jnp.stack(outs, axis=1)
        h_out.append(h)
        c_out.append(c)
    pred = seq @ fc_w + fc_b[0]
    return pred, jnp.stack(h_out), jnp.stack(c_out)


# --------------------------------- main ---------------------------------------
if __name__ == "__main__":
    # Module hyper-params (emb_dim == hid_dim so LSTM layer weights stack).
    OUTPUT_DIM = 16
    EMB_DIM = 32
    HID_DIM = 32
    N_LAYERS = 2
    B, T = 2, 8

    key = jax.random.PRNGKey(0)
    ks = jax.random.split(key, 10)
    s = 0.1
    emb_w = s * jax.random.normal(ks[0], (OUTPUT_DIM, EMB_DIM), jnp.float32)
    emb_b = s * jax.random.normal(ks[1], (1, EMB_DIM), jnp.float32)
    w_ih = s * jax.random.normal(ks[2], (N_LAYERS, EMB_DIM, 4 * HID_DIM),
                                 jnp.float32)
    w_hh = s * jax.random.normal(ks[3], (N_LAYERS, HID_DIM, 4 * HID_DIM),
                                 jnp.float32)
    b = s * jax.random.normal(ks[4], (N_LAYERS, 1, 4 * HID_DIM), jnp.float32)
    fc_w = s * jax.random.normal(ks[5], (HID_DIM, OUTPUT_DIM), jnp.float32)
    fc_b = s * jax.random.normal(ks[6], (1, OUTPUT_DIM), jnp.float32)
    params = (emb_w, emb_b, w_ih, w_hh, b, fc_w, fc_b)

    x = jax.random.normal(ks[7], (B, T, OUTPUT_DIM), jnp.float32)
    h0 = jax.random.normal(ks[8], (N_LAYERS, B, HID_DIM), jnp.float32)
    c0 = jax.random.normal(ks[9], (N_LAYERS, B, HID_DIM), jnp.float32)

    pred, hN, cN = decoder_forward(x, h0, c0, params)
    jax.block_until_ready((pred, hN, cN))

    pred_r, hN_r, cN_r = decoder_reference(x, h0, c0, params)
    assert pred.shape == (B, T, OUTPUT_DIM)
    assert hN.shape == (N_LAYERS, B, HID_DIM) and cN.shape == hN.shape
    assert jnp.allclose(pred, pred_r, atol=1e-3, rtol=1e-3)
    assert jnp.allclose(hN, hN_r, atol=1e-3, rtol=1e-3)
    assert jnp.allclose(cN, cN_r, atol=1e-3, rtol=1e-3)

    print("KERNEL_OK")
</pallas_src>

<mosaic_0001>
module attributes {stable_mosaic.version = 11 : i64} {
  func.func @decoder_kernel(%arg0: memref<2x8x16xf32, #tpu.memory_space<vmem>>, %arg1: memref<16x512xf32, #tpu.memory_space<vmem>>, %arg2: memref<1x512xf32, #tpu.memory_space<vmem>>, %arg3: memref<2x128x512xf32, #tpu.memory_space<vmem>>, %arg4: memref<2x128x512xf32, #tpu.memory_space<vmem>>, %arg5: memref<2x1x512xf32, #tpu.memory_space<vmem>>, %arg6: memref<2x2x128xf32, #tpu.memory_space<vmem>>, %arg7: memref<2x2x128xf32, #tpu.memory_space<vmem>>, %arg8: memref<128x16xf32, #tpu.memory_space<vmem>>, %arg9: memref<1x16xf32, #tpu.memory_space<vmem>>, %arg10: memref<2x8x16xf32, #tpu.memory_space<vmem>>, %arg11: memref<2x2x32xf32, #tpu.memory_space<vmem>>, %arg12: memref<2x2x32xf32, #tpu.memory_space<vmem>>, %arg13: memref<8x2x128xf32, #tpu.memory_space<vmem>>, %arg14: memref<8x2x512xf32, #tpu.memory_space<vmem>>) attributes {dimension_semantics = [], scalar_prefetch = 0 : i64, scratch_operands = 2 : i64, tpu.core_type = #tpu.core_type<tc>} {
    %c0 = arith.constant 0 : index
    %c0_0 = arith.constant 0 : index
    %c0_1 = arith.constant 0 : index
    %0 = vector.load %arg0[%c0, %c0_0, %c0_1] : memref<2x8x16xf32, #tpu.memory_space<vmem>>, vector<2x8x16xf32>
    %1 = tpu.transpose %0, [1, 0, 2] : vector<2x8x16xf32> -> vector<8x2x16xf32>
    %2 = vector.shape_cast %1 : vector<8x2x16xf32> to vector<16x16xf32>
    %c0_2 = arith.constant 0 : index
    %c0_3 = arith.constant 0 : index
    %3 = vector.load %arg1[%c0_2, %c0_3] : memref<16x512xf32, #tpu.memory_space<vmem>>, vector<16x512xf32>
    %cst = arith.constant dense<0.000000e+00> : vector<16x512xf32>
    %4 = tpu.matmul %2, %3, %cst {dimension_numbers = #tpu.dot_dimension_numbers<[1], [0], [0], [1], [0, 0, 1, 1], [], []>} : vector<16x16xf32>, vector<16x512xf32>, vector<16x512xf32> -> vector<16x512xf32>
    %c0_4 = arith.constant 0 : index
    %c0_5 = arith.constant 0 : index
    %5 = vector.load %arg2[%c0_4, %c0_5] : memref<1x512xf32, #tpu.memory_space<vmem>>, vector<1x512xf32>
    %6 = vector.broadcast %5 : vector<1x512xf32> to vector<16x512xf32>
    %7 = arith.addf %4, %6 : vector<16x512xf32>
    %8 = vector.shape_cast %7 : vector<16x512xf32> to vector<8x2x512xf32>
    %c0_6 = arith.constant 0 : index
    %c0_7 = arith.constant 0 : index
    %c0_8 = arith.constant 0 : index
    %9 = vector.load %arg14[%c0_6, %c0_7, %c0_8] : memref<8x2x512xf32, #tpu.memory_space<vmem>>, vector<8x2x512xf32>
    tpu.vector_store %arg14[%c0_6, %c0_7, %c0_8], %8 {strides = array<i32>} : memref<8x2x512xf32, #tpu.memory_space<vmem>>, vector<8x2x512xf32>,
    %c0_9 = arith.constant 0 : index
    %c0_10 = arith.constant 0 : index
    %c0_11 = arith.constant 0 : index
    %10 = vector.load %arg6[%c0_9, %c0_10, %c0_11] : memref<2x2x128xf32, #tpu.memory_space<vmem>>, vector<1x2x128xf32>
    %11 = vector.shape_cast %10 : vector<1x2x128xf32> to vector<2x128xf32>
    %c0_12 = arith.constant 0 : index
    %c0_13 = arith.constant 0 : index
    %c0_14 = arith.constant 0 : index
    %12 = vector.load %arg7[%c0_12, %c0_13, %c0_14] : memref<2x2x128xf32, #tpu.memory_space<vmem>>, vector<1x2x128xf32>
    %13 = vector.shape_cast %12 : vector<1x2x128xf32> to vector<2x128xf32>
    %c0_i32 = arith.constant 0 : i32
    %14 = arith.index_cast %c0_i32 : i32 to index
    %c0_15 = arith.constant 0 : index
    %c0_16 = arith.constant 0 : index
    %15 = vector.load %arg14[%14, %c0_15, %c0_16] : memref<8x2x512xf32, #tpu.memory_space<vmem>>, vector<1x2x512xf32>
    %16 = vector.shape_cast %15 : vector<1x2x512xf32> to vector<2x512xf32>
    %c0_17 = arith.constant 0 : index
    %c0_18 = arith.constant 0 : index
    %c0_19 = arith.constant 0 : index
    %17 = vector.load %arg4[%c0_17, %c0_18, %c0_19] : memref<2x128x512xf32, #tpu.memory_space<vmem>>, vector<1x128x512xf32>
    %18 = vector.shape_cast %17 : vector<1x128x512xf32> to vector<128x512xf32>
    %cst_20 = arith.constant dense<0.000000e+00> : vector<2x512xf32>
    %19 = tpu.matmul %11, %18, %cst_20 {dimension_numbers = #tpu.dot_dimension_numbers<[1], [0], [0], [1], [0, 0, 1, 1], [], []>} : vector<2x128xf32>, vector<128x512xf32>, vector<2x512xf32> -> vector<2x512xf32>
    %20 = arith.addf %16, %19 : vector<2x512xf32>
    %21 = vector.extract_strided_slice %20 {offsets = [0, 0], sizes = [2, 128], strides = [1, 1]} : vector<2x512xf32> to vector<2x128xf32>
    %22 = arith.negf %21 : vector<2x128xf32>
    %23 = math.exp %22 : vector<2x128xf32>
    %cst_21 = arith.constant 1.000000e+00 : f32
    %24 = vector.broadcast %cst_21 : f32 to vector<2x128xf32>
    %25 = arith.addf %24, %23 : vector<2x128xf32>
    %26 = arith.divf %24, %25 : vector<2x128xf32>
    %27 = vector.extract_strided_slice %20 {offsets = [0, 128], sizes = [2, 128], strides = [1, 1]} : vector<2x512xf32> to vector<2x128xf32>
    %28 = arith.negf %27 : vector<2x128xf32>
    %29 = math.exp %28 : vector<2x128xf32>
    %cst_22 = arith.constant 1.000000e+00 : f32
    %30 = vector.broadcast %cst_22 : f32 to vector<2x128xf32>
    %31 = arith.addf %30, %29 : vector<2x128xf32>
    %32 = arith.divf %30, %31 : vector<2x128xf32>
    %33 = vector.extract_strided_slice %20 {offsets = [0, 256], sizes = [2, 128], strides = [1, 1]} : vector<2x512xf32> to vector<2x128xf32>
    %34 = math.tanh %33 : vector<2x128xf32>
    %35 = vector.extract_strided_slice %20 {offsets = [0, 384], sizes = [2, 128], strides = [1, 1]} : vector<2x512xf32> to vector<2x128xf32>
    %36 = arith.negf %35 : vector<2x128xf32>
    %37 = math.exp %36 : vector<2x128xf32>
    %cst_23 = arith.constant 1.000000e+00 : f32
    %38 = vector.broadcast %cst_23 : f32 to vector<2x128xf32>
    %39 = arith.addf %38, %37 : vector<2x128xf32>
    %40 = arith.divf %38, %39 : vector<2x128xf32>
    %41 = arith.mulf %32, %13 : vector<2x128xf32>
    %42 = arith.mulf %26, %34 : vector<2x128xf32>
    %43 = arith.addf %41, %42 : vector<2x128xf32>
    %44 = math.tanh %43 : vector<2x128xf32>
    %45 = arith.mulf %40, %44 : vector<2x128xf32>
    %46 = arith.index_cast %c0_i32 : i32 to index
    %c0_24 = arith.constant 0 : index
    %c0_25 = arith.constant 0 : index
    %47 = vector.load %arg13[%46, %c0_24, %c0_25] : memref<8x2x128xf32, #tpu.memory_space<vmem>>, vector<1x2x128xf32>
    %48 = vector.shape_cast %47 : vector<1x2x128xf32> to vector<2x128xf32>
    %49 = vector.shape_cast %45 : vector<2x128xf32> to vector<1x2x128xf32>
    tpu.vector_store %arg13[%46, %c0_24, %c0_25], %49 {strides = array<i32>} : memref<8x2x128xf32, #tpu.memory_space<vmem>>, vector<1x2x128xf32>,
    %c1_i32 = arith.constant 1 : i32
    %50 = arith.index_cast %c1_i32 : i32 to index
    %c0_26 = arith.constant 0 : index
    %c0_27 = arith.constant 0 : index
    %51 = vector.load %arg14[%50, %c0_26, %c0_27] : memref<8x2x512xf32, #tpu.memory_space<vmem>>, vector<1x2x512xf32>
    %52 = vector.shape_cast %51 : vector<1x2x512xf32> to vector<2x512xf32>
    %c0_28 = arith.constant 0 : index
    %c0_29 = arith.constant 0 : index
    %c0_30 = arith.constant 0 : index
    %53 = vector.load %arg4[%c0_28, %c0_29, %c0_30] : memref<2x128x512xf32, #tpu.memory_space<vmem>>, vector<1x128x512xf32>
    %54 = vector.shape_cast %53 : vector<1x128x512xf32> to vector<128x512xf32>
    %cst_31 = arith.constant dense<0.000000e+00> : vector<2x512xf32>
    %55 = tpu.matmul %45, %54, %cst_31 {dimension_numbers = #tpu.dot_dimension_numbers<[1], [0], [0], [1], [0, 0, 1, 1], [], []>} : vector<2x128xf32>, vector<128x512xf32>, vector<2x512xf32> -> vector<2x512xf32>
    %56 = arith.addf %52, %55 : vector<2x512xf32>
    %57 = vector.extract_strided_slice %56 {offsets = [0, 0], sizes = [2, 128], strides = [1, 1]} : vector<2x512xf32> to vector<2x128xf32>
    %58 = arith.negf %57 : vector<2x128xf32>
    %59 = math.exp %58 : vector<2x128xf32>
    %cst_32 = arith.constant 1.000000e+00 : f32
    %60 = vector.broadcast %cst_32 : f32 to vector<2x128xf32>
    %61 = arith.addf %60, %59 : vector<2x128xf32>
    %62 = arith.divf %60, %61 : vector<2x128xf32>
    %63 = vector.extract_strided_slice %56 {offsets = [0, 128], sizes = [2, 128], strides = [1, 1]} : vector<2x512xf32> to vector<2x128xf32>
    %64 = arith.negf %63 : vector<2x128xf32>
    %65 = math.exp %64 : vector<2x128xf32>
    %cst_33 = arith.constant 1.000000e+00 : f32
    %66 = vector.broadcast %cst_33 : f32 to vector<2x128xf32>
    %67 = arith.addf %66, %65 : vector<2x128xf32>
    %68 = arith.divf %66, %67 : vector<2x128xf32>
    %69 = vector.extract_strided_slice %56 {offsets = [0, 256], sizes = [2, 128], strides = [1, 1]} : vector<2x512xf32> to vector<2x128xf32>
    %70 = math.tanh %69 : vector<2x128xf32>
    %71 = vector.extract_strided_slice %56 {offsets = [0, 384], sizes = [2, 128], strides = [1, 1]} : vector<2x512xf32> to vector<2x128xf32>
    %72 = arith.negf %71 : vector<2x128xf32>
    %73 = math.exp %72 : vector<2x128xf32>
    %cst_34 = arith.constant 1.000000e+00 : f32
    %74 = vector.broadcast %cst_34 : f32 to vector<2x128xf32>
    %75 = arith.addf %74, %73 : vector<2x128xf32>
    %76 = arith.divf %74, %75 : vector<2x128xf32>
    %77 = arith.mulf %68, %43 : vector<2x128xf32>
    %78 = arith.mulf %62, %70 : vector<2x128xf32>
    %79 = arith.addf %77, %78 : vector<2x128xf32>
    %80 = math.tanh %79 : vector<2x128xf32>
    %81 = arith.mulf %76, %80 : vector<2x128xf32>
    %82 = arith.index_cast %c1_i32 : i32 to index
    %c0_35 = arith.constant 0 : index
    %c0_36 = arith.constant 0 : index
    %83 = vector.load %arg13[%82, %c0_35, %c0_36] : memref<8x2x128xf32, #tpu.memory_space<vmem>>, vector<1x2x128xf32>
    %84 = vector.shape_cast %83 : vector<1x2x128xf32> to vector<2x128xf32>
    %85 = vector.shape_cast %81 : vector<2x128xf32> to vector<1x2x128xf32>
    tpu.vector_store %arg13[%82, %c0_35, %c0_36], %85 {strides = array<i32>} : memref<8x2x128xf32, #tpu.memory_space<vmem>>, vector<1x2x128xf32>,
    %c2_i32 = arith.constant 2 : i32
    %86 = arith.index_cast %c2_i32 : i32 to index
    %c0_37 = arith.constant 0 : index
    %c0_38 = arith.constant 0 : index
    %87 = vector.load %arg14[%86, %c0_37, %c0_38] : memref<8x2x512xf32, #tpu.memory_space<vmem>>, vector<1x2x512xf32>
    %88 = vector.shape_cast %87 : vector<1x2x512xf32> to vector<2x512xf32>
    %c0_39 = arith.constant 0 : index
    %c0_40 = arith.constant 0 : index
    %c0_41 = arith.constant 0 : index
    %89 = vector.load %arg4[%c0_39, %c0_40, %c0_41] : memref<2x128x512xf32, #tpu.memory_space<vmem>>, vector<1x128x512xf32>
    %90 = vector.shape_cast %89 : vector<1x128x512xf32> to vector<128x512xf32>
    %cst_42 = arith.constant dense<0.000000e+00> : vector<2x512xf32>
    %91 = tpu.matmul %81, %90, %cst_42 {dimension_numbers = #tpu.dot_dimension_numbers<[1], [0], [0], [1], [0, 0, 1, 1], [], []>} : vector<2x128xf32>, vector<128x512xf32>, vector<2x512xf32> -> vector<2x512xf32>
    %92 = arith.addf %88, %91 : vector<2x512xf32>
    %93 = vector.extract_strided_slice %92 {offsets = [0, 0], sizes = [2, 128], strides = [1, 1]} : vector<2x512xf32> to vector<2x128xf32>
    %94 = arith.negf %93 : vector<2x128xf32>
    %95 = math.exp %94 : vector<2x128xf32>
    %cst_43 = arith.constant 1.000000e+00 : f32
    %96 = vector.broadcast %cst_43 : f32 to vector<2x128xf32>
    %97 = arith.addf %96, %95 : vector<2x128xf32>
    %98 = arith.divf %96, %97 : vector<2x128xf32>
    %99 = vector.extract_strided_slice %92 {offsets = [0, 128], sizes = [2, 128], strides = [1, 1]} : vector<2x512xf32> to vector<2x128xf32>
    %100 = arith.negf %99 : vector<2x128xf32>
    %101 = math.exp %100 : vector<2x128xf32>
    %cst_44 = arith.constant 1.000000e+00 : f32
    %102 = vector.broadcast %cst_44 : f32 to vector<2x128xf32>
    %103 = arith.addf %102, %101 : vector<2x128xf32>
    %104 = arith.divf %102, %103 : vector<2x128xf32>
    %105 = vector.extract_strided_slice %92 {offsets = [0, 256], sizes = [2, 128], strides = [1, 1]} : vector<2x512xf32> to vector<2x128xf32>
    %106 = math.tanh %105 : vector<2x128xf32>
    %107 = vector.extract_strided_slice %92 {offsets = [0, 384], sizes = [2, 128], strides = [1, 1]} : vector<2x512xf32> to vector<2x128xf32>
    %108 = arith.negf %107 : vector<2x128xf32>
    %109 = math.exp %108 : vector<2x128xf32>
    %cst_45 = arith.constant 1.000000e+00 : f32
    %110 = vector.broadcast %cst_45 : f32 to vector<2x128xf32>
    %111 = arith.addf %110, %109 : vector<2x128xf32>
    %112 = arith.divf %110, %111 : vector<2x128xf32>
    %113 = arith.mulf %104, %79 : vector<2x128xf32>
    %114 = arith.mulf %98, %106 : vector<2x128xf32>
    %115 = arith.addf %113, %114 : vector<2x128xf32>
    %116 = math.tanh %115 : vector<2x128xf32>
    %117 = arith.mulf %112, %116 : vector<2x128xf32>
    %118 = arith.index_cast %c2_i32 : i32 to index
    %c0_46 = arith.constant 0 : index
    %c0_47 = arith.constant 0 : index
    %119 = vector.load %arg13[%118, %c0_46, %c0_47] : memref<8x2x128xf32, #tpu.memory_space<vmem>>, vector<1x2x128xf32>
    %120 = vector.shape_cast %119 : vector<1x2x128xf32> to vector<2x128xf32>
    %121 = vector.shape_cast %117 : vector<2x128xf32> to vector<1x2x128xf32>
    tpu.vector_store %arg13[%118, %c0_46, %c0_47], %121 {strides = array<i32>} : memref<8x2x128xf32, #tpu.memory_space<vmem>>, vector<1x2x128xf32>,
    %c3_i32 = arith.constant 3 : i32
    %122 = arith.index_cast %c3_i32 : i32 to index
    %c0_48 = arith.constant 0 : index
    %c0_49 = arith.constant 0 : index
    %123 = vector.load %arg14[%122, %c0_48, %c0_49] : memref<8x2x512xf32, #tpu.memory_space<vmem>>, vector<1x2x512xf32>
    %124 = vector.shape_cast %123 : vector<1x2x512xf32> to vector<2x512xf32>
    %c0_50 = arith.constant 0 : index
    %c0_51 = arith.constant 0 : index
    %c0_52 = arith.constant 0 : index
    %125 = vector.load %arg4[%c0_50, %c0_51, %c0_52] : memref<2x128x512xf32, #tpu.memory_space<vmem>>, vector<1x128x512xf32>
    %126 = vector.shape_cast %125 : vector<1x128x512xf32> to vector<128x512xf32>
    %cst_53 = arith.constant dense<0.000000e+00> : vector<2x512xf32>
    %127 = tpu.matmul %117, %126, %cst_53 {dimension_numbers = #tpu.dot_dimension_numbers<[1], [0], [0], [1], [0, 0, 1, 1], [], []>} : vector<2x128xf32>, vector<128x512xf32>, vector<2x512xf32> -> vector<2x512xf32>
    %128 = arith.addf %124, %127 : vector<2x512xf32>
    %129 = vector.extract_strided_slice %128 {offsets = [0, 0], sizes = [2, 128], strides = [1, 1]} : vector<2x512xf32> to vector<2x128xf32>
    %130 = arith.negf %129 : vector<2x128xf32>
    %131 = math.exp %130 : vector<2x128xf32>
    %cst_54 = arith.constant 1.000000e+00 : f32
    %132 = vector.broadcast %cst_54 : f32 to vector<2x128xf32>
    %133 = arith.addf %132, %131 : vector<2x128xf32>
    %134 = arith.divf %132, %133 : vector<2x128xf32>
    %135 = vector.extract_strided_slice %128 {offsets = [0, 128], sizes = [2, 128], strides = [1, 1]} : vector<2x512xf32> to vector<2x128xf32>
    %136 = arith.negf %135 : vector<2x128xf32>
    %137 = math.exp %136 : vector<2x128xf32>
    %cst_55 = arith.constant 1.000000e+00 : f32
    %138 = vector.broadcast %cst_55 : f32 to vector<2x128xf32>
    %139 = arith.addf %138, %137 : vector<2x128xf32>
    %140 = arith.divf %138, %139 : vector<2x128xf32>
    %141 = vector.extract_strided_slice %128 {offsets = [0, 256], sizes = [2, 128], strides = [1, 1]} : vector<2x512xf32> to vector<2x128xf32>
    %142 = math.tanh %141 : vector<2x128xf32>
    %143 = vector.extract_strided_slice %128 {offsets = [0, 384], sizes = [2, 128], strides = [1, 1]} : vector<2x512xf32> to vector<2x128xf32>
    %144 = arith.negf %143 : vector<2x128xf32>
    %145 = math.exp %144 : vector<2x128xf32>
    %cst_56 = arith.constant 1.000000e+00 : f32
    %146 = vector.broadcast %cst_56 : f32 to vector<2x128xf32>
    %147 = arith.addf %146, %145 : vector<2x128xf32>
    %148 = arith.divf %146, %147 : vector<2x128xf32>
    %149 = arith.mulf %140, %115 : vector<2x128xf32>
    %150 = arith.mulf %134, %142 : vector<2x128xf32>
    %151 = arith.addf %149, %150 : vector<2x128xf32>
    %152 = math.tanh %151 : vector<2x128xf32>
    %153 = arith.mulf %148, %152 : vector<2x128xf32>
    %154 = arith.index_cast %c3_i32 : i32 to index
    %c0_57 = arith.constant 0 : index
    %c0_58 = arith.constant 0 : index
    %155 = vector.load %arg13[%154, %c0_57, %c0_58] : memref<8x2x128xf32, #tpu.memory_space<vmem>>, vector<1x2x128xf32>
    %156 = vector.shape_cast %155 : vector<1x2x128xf32> to vector<2x128xf32>
    %157 = vector.shape_cast %153 : vector<2x128xf32> to vector<1x2x128xf32>
    tpu.vector_store %arg13[%154, %c0_57, %c0_58], %157 {strides = array<i32>} : memref<8x2x128xf32, #tpu.memory_space<vmem>>, vector<1x2x128xf32>,
    %c4_i32 = arith.constant 4 : i32
    %158 = arith.index_cast %c4_i32 : i32 to index
    %c0_59 = arith.constant 0 : index
    %c0_60 = arith.constant 0 : index
    %159 = vector.load %arg14[%158, %c0_59, %c0_60] : memref<8x2x512xf32, #tpu.memory_space<vmem>>, vector<1x2x512xf32>
    %160 = vector.shape_cast %159 : vector<1x2x512xf32> to vector<2x512xf32>
    %c0_61 = arith.constant 0 : index
    %c0_62 = arith.constant 0 : index
    %c0_63 = arith.constant 0 : index
    %161 = vector.load %arg4[%c0_61, %c0_62, %c0_63] : memref<2x128x512xf32, #tpu.memory_space<vmem>>, vector<1x128x512xf32>
    %162 = vector.shape_cast %161 : vector<1x128x512xf32> to vector<128x512xf32>
    %cst_64 = arith.constant dense<0.000000e+00> : vector<2x512xf32>
    %163 = tpu.matmul %153, %162, %cst_64 {dimension_numbers = #tpu.dot_dimension_numbers<[1], [0], [0], [1], [0, 0, 1, 1], [], []>} : vector<2x128xf32>, vector<128x512xf32>, vector<2x512xf32> -> vector<2x512xf32>
    %164 = arith.addf %160, %163 : vector<2x512xf32>
    %165 = vector.extract_strided_slice %164 {offsets = [0, 0], sizes = [2, 128], strides = [1, 1]} : vector<2x512xf32> to vector<2x128xf32>
    %166 = arith.negf %165 : vector<2x128xf32>
    %167 = math.exp %166 : vector<2x128xf32>
    %cst_65 = arith.constant 1.000000e+00 : f32
    %168 = vector.broadcast %cst_65 : f32 to vector<2x128xf32>
    %169 = arith.addf %168, %167 : vector<2x128xf32>
    %170 = arith.divf %168, %169 : vector<2x128xf32>
    %171 = vector.extract_strided_slice %164 {offsets = [0, 128], sizes = [2, 128], strides = [1, 1]} : vector<2x512xf32> to vector<2x128xf32>
    %172 = arith.negf %171 : vector<2x128xf32>
    %173 = math.exp %172 : vector<2x128xf32>
    %cst_66 = arith.constant 1.000000e+00 : f32
    %174 = vector.broadcast %cst_66 : f32 to vector<2x128xf32>
    %175 = arith.addf %174, %173 : vector<2x128xf32>
    %176 = arith.divf %174, %175 : vector<2x128xf32>
    %177 = vector.extract_strided_slice %164 {offsets = [0, 256], sizes = [2, 128], strides = [1, 1]} : vector<2x512xf32> to vector<2x128xf32>
    %178 = math.tanh %177 : vector<2x128xf32>
    %179 = vector.extract_strided_slice %164 {offsets = [0, 384], sizes = [2, 128], strides = [1, 1]} : vector<2x512xf32> to vector<2x128xf32>
    %180 = arith.negf %179 : vector<2x128xf32>
    %181 = math.exp %180 : vector<2x128xf32>
    %cst_67 = arith.constant 1.000000e+00 : f32
    %182 = vector.broadcast %cst_67 : f32 to vector<2x128xf32>
    %183 = arith.addf %182, %181 : vector<2x128xf32>
    %184 = arith.divf %182, %183 : vector<2x128xf32>
    %185 = arith.mulf %176, %151 : vector<2x128xf32>
    %186 = arith.mulf %170, %178 : vector<2x128xf32>
    %187 = arith.addf %185, %186 : vector<2x128xf32>
    %188 = math.tanh %187 : vector<2x128xf32>
    %189 = arith.mulf %184, %188 : vector<2x128xf32>
    %190 = arith.index_cast %c4_i32 : i32 to index
    %c0_68 = arith.constant 0 : index
    %c0_69 = arith.constant 0 : index
    %191 = vector.load %arg13[%190, %c0_68, %c0_69] : memref<8x2x128xf32, #tpu.memory_space<vmem>>, vector<1x2x128xf32>
    %192 = vector.shape_cast %191 : vector<1x2x128xf32> to vector<2x128xf32>
    %193 = vector.shape_cast %189 : vector<2x128xf32> to vector<1x2x128xf32>
    tpu.vector_store %arg13[%190, %c0_68, %c0_69], %193 {strides = array<i32>} : memref<8x2x128xf32, #tpu.memory_space<vmem>>, vector<1x2x128xf32>,
    %c5_i32 = arith.constant 5 : i32
    %194 = arith.index_cast %c5_i32 : i32 to index
    %c0_70 = arith.constant 0 : index
    %c0_71 = arith.constant 0 : index
    %195 = vector.load %arg14[%194, %c0_70, %c0_71] : memref<8x2x512xf32, #tpu.memory_space<vmem>>, vector<1x2x512xf32>
    %196 = vector.shape_cast %195 : vector<1x2x512xf32> to vector<2x512xf32>
    %c0_72 = arith.constant 0 : index
    %c0_73 = arith.constant 0 : index
    %c0_74 = arith.constant 0 : index
    %197 = vector.load %arg4[%c0_72, %c0_73, %c0_74] : memref<2x128x512xf32, #tpu.memory_space<vmem>>, vector<1x128x512xf32>
    %198 = vector.shape_cast %197 : vector<1x128x512xf32> to vector<128x512xf32>
    %cst_75 = arith.constant dense<0.000000e+00> : vector<2x512xf32>
    %199 = tpu.matmul %189, %198, %cst_75 {dimension_numbers = #tpu.dot_dimension_numbers<[1], [0], [0], [1], [0, 0, 1, 1], [], []>} : vector<2x128xf32>, vector<128x512xf32>, vector<2x512xf32> -> vector<2x512xf32>
    %200 = arith.addf %196, %199 : vector<2x512xf32>
    %201 = vector.extract_strided_slice %200 {offsets = [0, 0], sizes = [2, 128], strides = [1, 1]} : vector<2x512xf32> to vector<2x128xf32>
    %202 = arith.negf %201 : vector<2x128xf32>
    %203 = math.exp %202 : vector<2x128xf32>
    %cst_76 = arith.constant 1.000000e+00 : f32
    %204 = vector.broadcast %cst_76 : f32 to vector<2x128xf32>
    %205 = arith.addf %204, %203 : vector<2x128xf32>
    %206 = arith.divf %204, %205 : vector<2x128xf32>
    %207 = vector.extract_strided_slice %200 {offsets = [0, 128], sizes = [2, 128], strides = [1, 1]} : vector<2x512xf32> to vector<2x128xf32>
    %208 = arith.negf %207 : vector<2x128xf32>
    %209 = math.exp %208 : vector<2x128xf32>
    %cst_77 = arith.constant 1.000000e+00 : f32
    %210 = vector.broadcast %cst_77 : f32 to vector<2x128xf32>
    %211 = arith.addf %210, %209 : vector<2x128xf32>
    %212 = arith.divf %210, %211 : vector<2x128xf32>
    %213 = vector.extract_strided_slice %200 {offsets = [0, 256], sizes = [2, 128], strides = [1, 1]} : vector<2x512xf32> to vector<2x128xf32>
    %214 = math.tanh %213 : vector<2x128xf32>
    %215 = vector.extract_strided_slice %200 {offsets = [0, 384], sizes = [2, 128], strides = [1, 1]} : vector<2x512xf32> to vector<2x128xf32>
    %216 = arith.negf %215 : vector<2x128xf32>
    %217 = math.exp %216 : vector<2x128xf32>
    %cst_78 = arith.constant 1.000000e+00 : f32
    %218 = vector.broadcast %cst_78 : f32 to vector<2x128xf32>
    %219 = arith.addf %218, %217 : vector<2x128xf32>
    %220 = arith.divf %218, %219 : vector<2x128xf32>
    %221 = arith.mulf %212, %187 : vector<2x128xf32>
    %222 = arith.mulf %206, %214 : vector<2x128xf32>
    %223 = arith.addf %221, %222 : vector<2x128xf32>
    %224 = math.tanh %223 : vector<2x128xf32>
    %225 = arith.mulf %220, %224 : vector<2x128xf32>
    %226 = arith.index_cast %c5_i32 : i32 to index
    %c0_79 = arith.constant 0 : index
    %c0_80 = arith.constant 0 : index
    %227 = vector.load %arg13[%226, %c0_79, %c0_80] : memref<8x2x128xf32, #tpu.memory_space<vmem>>, vector<1x2x128xf32>
    %228 = vector.shape_cast %227 : vector<1x2x128xf32> to vector<2x128xf32>
    %229 = vector.shape_cast %225 : vector<2x128xf32> to vector<1x2x128xf32>
    tpu.vector_store %arg13[%226, %c0_79, %c0_80], %229 {strides = array<i32>} : memref<8x2x128xf32, #tpu.memory_space<vmem>>, vector<1x2x128xf32>,
    %c6_i32 = arith.constant 6 : i32
    %230 = arith.index_cast %c6_i32 : i32 to index
    %c0_81 = arith.constant 0 : index
    %c0_82 = arith.constant 0 : index
    %231 = vector.load %arg14[%230, %c0_81, %c0_82] : memref<8x2x512xf32, #tpu.memory_space<vmem>>, vector<1x2x512xf32>
    %232 = vector.shape_cast %231 : vector<1x2x512xf32> to vector<2x512xf32>
    %c0_83 = arith.constant 0 : index
    %c0_84 = arith.constant 0 : index
    %c0_85 = arith.constant 0 : index
    %233 = vector.load %arg4[%c0_83, %c0_84, %c0_85] : memref<2x128x512xf32, #tpu.memory_space<vmem>>, vector<1x128x512xf32>
    %234 = vector.shape_cast %233 : vector<1x128x512xf32> to vector<128x512xf32>
    %cst_86 = arith.constant dense<0.000000e+00> : vector<2x512xf32>
    %235 = tpu.matmul %225, %234, %cst_86 {dimension_numbers = #tpu.dot_dimension_numbers<[1], [0], [0], [1], [0, 0, 1, 1], [], []>} : vector<2x128xf32>, vector<128x512xf32>, vector<2x512xf32> -> vector<2x512xf32>
    %236 = arith.addf %232, %235 : vector<2x512xf32>
    %237 = vector.extract_strided_slice %236 {offsets = [0, 0], sizes = [2, 128], strides = [1, 1]} : vector<2x512xf32> to vector<2x128xf32>
    %238 = arith.negf %237 : vector<2x128xf32>
    %239 = math.exp %238 : vector<2x128xf32>
    %cst_87 = arith.constant 1.000000e+00 : f32
    %240 = vector.broadcast %cst_87 : f32 to vector<2x128xf32>
    %241 = arith.addf %240, %239 : vector<2x128xf32>
    %242 = arith.divf %240, %241 : vector<2x128xf32>
    %243 = vector.extract_strided_slice %236 {offsets = [0, 128], sizes = [2, 128], strides = [1, 1]} : vector<2x512xf32> to vector<2x128xf32>
    %244 = arith.negf %243 : vector<2x128xf32>
    %245 = math.exp %244 : vector<2x128xf32>
    %cst_88 = arith.constant 1.000000e+00 : f32
    %246 = vector.broadcast %cst_88 : f32 to vector<2x128xf32>
    %247 = arith.addf %246, %245 : vector<2x128xf32>
    %248 = arith.divf %246, %247 : vector<2x128xf32>
    %249 = vector.extract_strided_slice %236 {offsets = [0, 256], sizes = [2, 128], strides = [1, 1]} : vector<2x512xf32> to vector<2x128xf32>
    %250 = math.tanh %249 : vector<2x128xf32>
    %251 = vector.extract_strided_slice %236 {offsets = [0, 384], sizes = [2, 128], strides = [1, 1]} : vector<2x512xf32> to vector<2x128xf32>
    %252 = arith.negf %251 : vector<2x128xf32>
    %253 = math.exp %252 : vector<2x128xf32>
    %cst_89 = arith.constant 1.000000e+00 : f32
    %254 = vector.broadcast %cst_89 : f32 to vector<2x128xf32>
    %255 = arith.addf %254, %253 : vector<2x128xf32>
    %256 = arith.divf %254, %255 : vector<2x128xf32>
    %257 = arith.mulf %248, %223 : vector<2x128xf32>
    %258 = arith.mulf %242, %250 : vector<2x128xf32>
    %259 = arith.addf %257, %258 : vector<2x128xf32>
    %260 = math.tanh %259 : vector<2x128xf32>
    %261 = arith.mulf %256, %260 : vector<2x128xf32>
    %262 = arith.index_cast %c6_i32 : i32 to index
    %c0_90 = arith.constant 0 : index
    %c0_91 = arith.constant 0 : index
    %263 = vector.load %arg13[%262, %c0_90, %c0_91] : memref<8x2x128xf32, #tpu.memory_space<vmem>>, vector<1x2x128xf32>
    %264 = vector.shape_cast %263 : vector<1x2x128xf32> to vector<2x128xf32>
    %265 = vector.shape_cast %261 : vector<2x128xf32> to vector<1x2x128xf32>
    tpu.vector_store %arg13[%262, %c0_90, %c0_91], %265 {strides = array<i32>} : memref<8x2x128xf32, #tpu.memory_space<vmem>>, vector<1x2x128xf32>,
    %c7_i32 = arith.constant 7 : i32
    %266 = arith.index_cast %c7_i32 : i32 to index
    %c0_92 = arith.constant 0 : index
    %c0_93 = arith.constant 0 : index
    %267 = vector.load %arg14[%266, %c0_92, %c0_93] : memref<8x2x512xf32, #tpu.memory_space<vmem>>, vector<1x2x512xf32>
    %268 = vector.shape_cast %267 : vector<1x2x512xf32> to vector<2x512xf32>
    %c0_94 = arith.constant 0 : index
    %c0_95 = arith.constant 0 : index
    %c0_96 = arith.constant 0 : index
    %269 = vector.load %arg4[%c0_94, %c0_95, %c0_96] : memref<2x128x512xf32, #tpu.memory_space<vmem>>, vector<1x128x512xf32>
    %270 = vector.shape_cast %269 : vector<1x128x512xf32> to vector<128x512xf32>
    %cst_97 = arith.constant dense<0.000000e+00> : vector<2x512xf32>
    %271 = tpu.matmul %261, %270, %cst_97 {dimension_numbers = #tpu.dot_dimension_numbers<[1], [0], [0], [1], [0, 0, 1, 1], [], []>} : vector<2x128xf32>, vector<128x512xf32>, vector<2x512xf32> -> vector<2x512xf32>
    %272 = arith.addf %268, %271 : vector<2x512xf32>
    %273 = vector.extract_strided_slice %272 {offsets = [0, 0], sizes = [2, 128], strides = [1, 1]} : vector<2x512xf32> to vector<2x128xf32>
    %274 = arith.negf %273 : vector<2x128xf32>
    %275 = math.exp %274 : vector<2x128xf32>
    %cst_98 = arith.constant 1.000000e+00 : f32
    %276 = vector.broadcast %cst_98 : f32 to vector<2x128xf32>
    %277 = arith.addf %276, %275 : vector<2x128xf32>
    %278 = arith.divf %276, %277 : vector<2x128xf32>
    %279 = vector.extract_strided_slice %272 {offsets = [0, 128], sizes = [2, 128], strides = [1, 1]} : vector<2x512xf32> to vector<2x128xf32>
    %280 = arith.negf %279 : vector<2x128xf32>
    %281 = math.exp %280 : vector<2x128xf32>
    %cst_99 = arith.constant 1.000000e+00 : f32
    %282 = vector.broadcast %cst_99 : f32 to vector<2x128xf32>
    %283 = arith.addf %282, %281 : vector<2x128xf32>
    %284 = arith.divf %282, %283 : vector<2x128xf32>
    %285 = vector.extract_strided_slice %272 {offsets = [0, 256], sizes = [2, 128], strides = [1, 1]} : vector<2x512xf32> to vector<2x128xf32>
    %286 = math.tanh %285 : vector<2x128xf32>
    %287 = vector.extract_strided_slice %272 {offsets = [0, 384], sizes = [2, 128], strides = [1, 1]} : vector<2x512xf32> to vector<2x128xf32>
    %288 = arith.negf %287 : vector<2x128xf32>
    %289 = math.exp %288 : vector<2x128xf32>
    %cst_100 = arith.constant 1.000000e+00 : f32
    %290 = vector.broadcast %cst_100 : f32 to vector<2x128xf32>
    %291 = arith.addf %290, %289 : vector<2x128xf32>
    %292 = arith.divf %290, %291 : vector<2x128xf32>
    %293 = arith.mulf %284, %259 : vector<2x128xf32>
    %294 = arith.mulf %278, %286 : vector<2x128xf32>
    %295 = arith.addf %293, %294 : vector<2x128xf32>
    %296 = math.tanh %295 : vector<2x128xf32>
    %297 = arith.mulf %292, %296 : vector<2x128xf32>
    %298 = arith.index_cast %c7_i32 : i32 to index
    %c0_101 = arith.constant 0 : index
    %c0_102 = arith.constant 0 : index
    %299 = vector.load %arg13[%298, %c0_101, %c0_102] : memref<8x2x128xf32, #tpu.memory_space<vmem>>, vector<1x2x128xf32>
    %300 = vector.shape_cast %299 : vector<1x2x128xf32> to vector<2x128xf32>
    %301 = vector.shape_cast %297 : vector<2x128xf32> to vector<1x2x128xf32>
    tpu.vector_store %arg13[%298, %c0_101, %c0_102], %301 {strides = array<i32>} : memref<8x2x128xf32, #tpu.memory_space<vmem>>, vector<1x2x128xf32>,
    %c8_i32 = arith.constant 8 : i32
    %302 = vector.extract_strided_slice %297 {offsets = [0, 0], sizes = [2, 32], strides = [1, 1]} : vector<2x128xf32> to vector<2x32xf32>
    %c0_103 = arith.constant 0 : index
    %c0_104 = arith.constant 0 : index
    %c0_105 = arith.constant 0 : index
    %303 = vector.load %arg11[%c0_103, %c0_104, %c0_105] : memref<2x2x32xf32, #tpu.memory_space<vmem>>, vector<1x2x32xf32>
    %304 = vector.shape_cast %303 : vector<1x2x32xf32> to vector<2x32xf32>
    %305 = vector.shape_cast %302 : vector<2x32xf32> to vector<1x2x32xf32>
    tpu.vector_store %arg11[%c0_103, %c0_104, %c0_105], %305 {strides = array<i32>} : memref<2x2x32xf32, #tpu.memory_space<vmem>>, vector<1x2x32xf32>,
    %306 = vector.extract_strided_slice %295 {offsets = [0, 0], sizes = [2, 32], strides = [1, 1]} : vector<2x128xf32> to vector<2x32xf32>
    %c0_106 = arith.constant 0 : index
    %c0_107 = arith.constant 0 : index
    %c0_108 = arith.constant 0 : index
    %307 = vector.load %arg12[%c0_106, %c0_107, %c0_108] : memref<2x2x32xf32, #tpu.memory_space<vmem>>, vector<1x2x32xf32>
    %308 = vector.shape_cast %307 : vector<1x2x32xf32> to vector<2x32xf32>
    %309 = vector.shape_cast %306 : vector<2x32xf32> to vector<1x2x32xf32>
    tpu.vector_store %arg12[%c0_106, %c0_107, %c0_108], %309 {strides = array<i32>} : memref<2x2x32xf32, #tpu.memory_space<vmem>>, vector<1x2x32xf32>,
    %c0_109 = arith.constant 0 : index
    %c0_110 = arith.constant 0 : index
    %c0_111 = arith.constant 0 : index
    %310 = vector.load %arg13[%c0_109, %c0_110, %c0_111] : memref<8x2x128xf32, #tpu.memory_space<vmem>>, vector<8x2x128xf32>
    %311 = vector.shape_cast %310 : vector<8x2x128xf32> to vector<16x128xf32>
    %c1 = arith.constant 1 : index
    %c0_112 = arith.constant 0 : index
    %c0_113 = arith.constant 0 : index
    %312 = vector.load %arg3[%c1, %c0_112, %c0_113] : memref<2x128x512xf32, #tpu.memory_space<vmem>>, vector<1x128x512xf32>
    %313 = vector.shape_cast %312 : vector<1x128x512xf32> to vector<128x512xf32>
    %cst_114 = arith.constant dense<0.000000e+00> : vector<16x512xf32>
    %314 = tpu.matmul %311, %313, %cst_114 {dimension_numbers = #tpu.dot_dimension_numbers<[1], [0], [0], [1], [0, 0, 1, 1], [], []>} : vector<16x128xf32>, vector<128x512xf32>, vector<16x512xf32> -> vector<16x512xf32>
    %c1_115 = arith.constant 1 : index
    %c0_116 = arith.constant 0 : index
    %c0_117 = arith.constant 0 : index
    %315 = vector.load %arg5[%c1_115, %c0_116, %c0_117] : memref<2x1x512xf32, #tpu.memory_space<vmem>>, vector<1x1x512xf32>
    %316 = vector.shape_cast %315 : vector<1x1x512xf32> to vector<1x512xf32>
    %317 = vector.broadcast %316 : vector<1x512xf32> to vector<16x512xf32>
    %318 = arith.addf %314, %317 : vector<16x512xf32>
    %319 = vector.shape_cast %318 : vector<16x512xf32> to vector<8x2x512xf32>
    %c0_118 = arith.constant 0 : index
    %c0_119 = arith.constant 0 : index
    %c0_120 = arith.constant 0 : index
    %320 = vector.load %arg14[%c0_118, %c0_119, %c0_120] : memref<8x2x512xf32, #tpu.memory_space<vmem>>, vector<8x2x512xf32>
    tpu.vector_store %arg14[%c0_118, %c0_119, %c0_120], %319 {strides = array<i32>} : memref<8x2x512xf32, #tpu.memory_space<vmem>>, vector<8x2x512xf32>,
    %c1_121 = arith.constant 1 : index
    %c0_122 = arith.constant 0 : index
    %c0_123 = arith.constant 0 : index
    %321 = vector.load %arg6[%c1_121, %c0_122, %c0_123] : memref<2x2x128xf32, #tpu.memory_space<vmem>>, vector<1x2x128xf32>
    %322 = vector.shape_cast %321 : vector<1x2x128xf32> to vector<2x128xf32>
    %c1_124 = arith.constant 1 : index
    %c0_125 = arith.constant 0 : index
    %c0_126 = arith.constant 0 : index
    %323 = vector.load %arg7[%c1_124, %c0_125, %c0_126] : memref<2x2x128xf32, #tpu.memory_space<vmem>>, vector<1x2x128xf32>
    %324 = vector.shape_cast %323 : vector<1x2x128xf32> to vector<2x128xf32>
    %c0_i32_127 = arith.constant 0 : i32
    %325 = arith.index_cast %c0_i32_127 : i32 to index
    %c0_128 = arith.constant 0 : index
    %c0_129 = arith.constant 0 : index
    %326 = vector.load %arg14[%325, %c0_128, %c0_129] : memref<8x2x512xf32, #tpu.memory_space<vmem>>, vector<1x2x512xf32>
    %327 = vector.shape_cast %326 : vector<1x2x512xf32> to vector<2x512xf32>
    %c1_130 = arith.constant 1 : index
    %c0_131 = arith.constant 0 : index
    %c0_132 = arith.constant 0 : index
    %328 = vector.load %arg4[%c1_130, %c0_131, %c0_132] : memref<2x128x512xf32, #tpu.memory_space<vmem>>, vector<1x128x512xf32>
    %329 = vector.shape_cast %328 : vector<1x128x512xf32> to vector<128x512xf32>
    %cst_133 = arith.constant dense<0.000000e+00> : vector<2x512xf32>
    %330 = tpu.matmul %322, %329, %cst_133 {dimension_numbers = #tpu.dot_dimension_numbers<[1], [0], [0], [1], [0, 0, 1, 1], [], []>} : vector<2x128xf32>, vector<128x512xf32>, vector<2x512xf32> -> vector<2x512xf32>
    %331 = arith.addf %327, %330 : vector<2x512xf32>
    %332 = vector.extract_strided_slice %331 {offsets = [0, 0], sizes = [2, 128], strides = [1, 1]} : vector<2x512xf32> to vector<2x128xf32>
    %333 = arith.negf %332 : vector<2x128xf32>
    %334 = math.exp %333 : vector<2x128xf32>
    %cst_134 = arith.constant 1.000000e+00 : f32
    %335 = vector.broadcast %cst_134 : f32 to vector<2x128xf32>
    %336 = arith.addf %335, %334 : vector<2x128xf32>
    %337 = arith.divf %335, %336 : vector<2x128xf32>
    %338 = vector.extract_strided_slice %331 {offsets = [0, 128], sizes = [2, 128], strides = [1, 1]} : vector<2x512xf32> to vector<2x128xf32>
    %339 = arith.negf %338 : vector<2x128xf32>
    %340 = math.exp %339 : vector<2x128xf32>
    %cst_135 = arith.constant 1.000000e+00 : f32
    %341 = vector.broadcast %cst_135 : f32 to vector<2x128xf32>
    %342 = arith.addf %341, %340 : vector<2x128xf32>
    %343 = arith.divf %341, %342 : vector<2x128xf32>
    %344 = vector.extract_strided_slice %331 {offsets = [0, 256], sizes = [2, 128], strides = [1, 1]} : vector<2x512xf32> to vector<2x128xf32>
    %345 = math.tanh %344 : vector<2x128xf32>
    %346 = vector.extract_strided_slice %331 {offsets = [0, 384], sizes = [2, 128], strides = [1, 1]} : vector<2x512xf32> to vector<2x128xf32>
    %347 = arith.negf %346 : vector<2x128xf32>
    %348 = math.exp %347 : vector<2x128xf32>
    %cst_136 = arith.constant 1.000000e+00 : f32
    %349 = vector.broadcast %cst_136 : f32 to vector<2x128xf32>
    %350 = arith.addf %349, %348 : vector<2x128xf32>
    %351 = arith.divf %349, %350 : vector<2x128xf32>
    %352 = arith.mulf %343, %324 : vector<2x128xf32>
    %353 = arith.mulf %337, %345 : vector<2x128xf32>
    %354 = arith.addf %352, %353 : vector<2x128xf32>
    %355 = math.tanh %354 : vector<2x128xf32>
    %356 = arith.mulf %351, %355 : vector<2x128xf32>
    %357 = arith.index_cast %c0_i32_127 : i32 to index
    %c0_137 = arith.constant 0 : index
    %c0_138 = arith.constant 0 : index
    %358 = vector.load %arg13[%357, %c0_137, %c0_138] : memref<8x2x128xf32, #tpu.memory_space<vmem>>, vector<1x2x128xf32>
    %359 = vector.shape_cast %358 : vector<1x2x128xf32> to vector<2x128xf32>
    %360 = vector.shape_cast %356 : vector<2x128xf32> to vector<1x2x128xf32>
    tpu.vector_store %arg13[%357, %c0_137, %c0_138], %360 {strides = array<i32>} : memref<8x2x128xf32, #tpu.memory_space<vmem>>, vector<1x2x128xf32>,
    %c1_i32_139 = arith.constant 1 : i32
    %361 = arith.index_cast %c1_i32_139 : i32 to index
    %c0_140 = arith.constant 0 : index
    %c0_141 = arith.constant 0 : index
    %362 = vector.load %arg14[%361, %c0_140, %c0_141] : memref<8x2x512xf32, #tpu.memory_space<vmem>>, vector<1x2x512xf32>
    %363 = vector.shape_cast %362 : vector<1x2x512xf32> to vector<2x512xf32>
    %c1_142 = arith.constant 1 : index
    %c0_143 = arith.constant 0 : index
    %c0_144 = arith.constant 0 : index
    %364 = vector.load %arg4[%c1_142, %c0_143, %c0_144] : memref<2x128x512xf32, #tpu.memory_space<vmem>>, vector<1x128x512xf32>
    %365 = vector.shape_cast %364 : vector<1x128x512xf32> to vector<128x512xf32>
    %cst_145 = arith.constant dense<0.000000e+00> : vector<2x512xf32>
    %366 = tpu.matmul %356, %365, %cst_145 {dimension_numbers = #tpu.dot_dimension_numbers<[1], [0], [0], [1], [0, 0, 1, 1], [], []>} : vector<2x128xf32>, vector<128x512xf32>, vector<2x512xf32> -> vector<2x512xf32>
    %367 = arith.addf %363, %366 : vector<2x512xf32>
    %368 = vector.extract_strided_slice %367 {offsets = [0, 0], sizes = [2, 128], strides = [1, 1]} : vector<2x512xf32> to vector<2x128xf32>
    %369 = arith.negf %368 : vector<2x128xf32>
    %370 = math.exp %369 : vector<2x128xf32>
    %cst_146 = arith.constant 1.000000e+00 : f32
    %371 = vector.broadcast %cst_146 : f32 to vector<2x128xf32>
    %372 = arith.addf %371, %370 : vector<2x128xf32>
    %373 = arith.divf %371, %372 : vector<2x128xf32>
    %374 = vector.extract_strided_slice %367 {offsets = [0, 128], sizes = [2, 128], strides = [1, 1]} : vector<2x512xf32> to vector<2x128xf32>
    %375 = arith.negf %374 : vector<2x128xf32>
    %376 = math.exp %375 : vector<2x128xf32>
    %cst_147 = arith.constant 1.000000e+00 : f32
    %377 = vector.broadcast %cst_147 : f32 to vector<2x128xf32>
    %378 = arith.addf %377, %376 : vector<2x128xf32>
    %379 = arith.divf %377, %378 : vector<2x128xf32>
    %380 = vector.extract_strided_slice %367 {offsets = [0, 256], sizes = [2, 128], strides = [1, 1]} : vector<2x512xf32> to vector<2x128xf32>
    %381 = math.tanh %380 : vector<2x128xf32>
    %382 = vector.extract_strided_slice %367 {offsets = [0, 384], sizes = [2, 128], strides = [1, 1]} : vector<2x512xf32> to vector<2x128xf32>
    %383 = arith.negf %382 : vector<2x128xf32>
    %384 = math.exp %383 : vector<2x128xf32>
    %cst_148 = arith.constant 1.000000e+00 : f32
    %385 = vector.broadcast %cst_148 : f32 to vector<2x128xf32>
    %386 = arith.addf %385, %384 : vector<2x128xf32>
    %387 = arith.divf %385, %386 : vector<2x128xf32>
    %388 = arith.mulf %379, %354 : vector<2x128xf32>
    %389 = arith.mulf %373, %381 : vector<2x128xf32>
    %390 = arith.addf %388, %389 : vector<2x128xf32>
    %391 = math.tanh %390 : vector<2x128xf32>
    %392 = arith.mulf %387, %391 : vector<2x128xf32>
    %393 = arith.index_cast %c1_i32_139 : i32 to index
    %c0_149 = arith.constant 0 : index
    %c0_150 = arith.constant 0 : index
    %394 = vector.load %arg13[%393, %c0_149, %c0_150] : memref<8x2x128xf32, #tpu.memory_space<vmem>>, vector<1x2x128xf32>
    %395 = vector.shape_cast %394 : vector<1x2x128xf32> to vector<2x128xf32>
    %396 = vector.shape_cast %392 : vector<2x128xf32> to vector<1x2x128xf32>
    tpu.vector_store %arg13[%393, %c0_149, %c0_150], %396 {strides = array<i32>} : memref<8x2x128xf32, #tpu.memory_space<vmem>>, vector<1x2x128xf32>,
    %c2_i32_151 = arith.constant 2 : i32
    %397 = arith.index_cast %c2_i32_151 : i32 to index
    %c0_152 = arith.constant 0 : index
    %c0_153 = arith.constant 0 : index
    %398 = vector.load %arg14[%397, %c0_152, %c0_153] : memref<8x2x512xf32, #tpu.memory_space<vmem>>, vector<1x2x512xf32>
    %399 = vector.shape_cast %398 : vector<1x2x512xf32> to vector<2x512xf32>
    %c1_154 = arith.constant 1 : index
    %c0_155 = arith.constant 0 : index
    %c0_156 = arith.constant 0 : index
    %400 = vector.load %arg4[%c1_154, %c0_155, %c0_156] : memref<2x128x512xf32, #tpu.memory_space<vmem>>, vector<1x128x512xf32>
    %401 = vector.shape_cast %400 : vector<1x128x512xf32> to vector<128x512xf32>
    %cst_157 = arith.constant dense<0.000000e+00> : vector<2x512xf32>
    %402 = tpu.matmul %392, %401, %cst_157 {dimension_numbers = #tpu.dot_dimension_numbers<[1], [0], [0], [1], [0, 0, 1, 1], [], []>} : vector<2x128xf32>, vector<128x512xf32>, vector<2x512xf32> -> vector<2x512xf32>
    %403 = arith.addf %399, %402 : vector<2x512xf32>
    %404 = vector.extract_strided_slice %403 {offsets = [0, 0], sizes = [2, 128], strides = [1, 1]} : vector<2x512xf32> to vector<2x128xf32>
    %405 = arith.negf %404 : vector<2x128xf32>
    %406 = math.exp %405 : vector<2x128xf32>
    %cst_158 = arith.constant 1.000000e+00 : f32
    %407 = vector.broadcast %cst_158 : f32 to vector<2x128xf32>
    %408 = arith.addf %407, %406 : vector<2x128xf32>
    %409 = arith.divf %407, %408 : vector<2x128xf32>
    %410 = vector.extract_strided_slice %403 {offsets = [0, 128], sizes = [2, 128], strides = [1, 1]} : vector<2x512xf32> to vector<2x128xf32>
    %411 = arith.negf %410 : vector<2x128xf32>
    %412 = math.exp %411 : vector<2x128xf32>
    %cst_159 = arith.constant 1.000000e+00 : f32
    %413 = vector.broadcast %cst_159 : f32 to vector<2x128xf32>
    %414 = arith.addf %413, %412 : vector<2x128xf32>
    %415 = arith.divf %413, %414 : vector<2x128xf32>
    %416 = vector.extract_strided_slice %403 {offsets = [0, 256], sizes = [2, 128], strides = [1, 1]} : vector<2x512xf32> to vector<2x128xf32>
    %417 = math.tanh %416 : vector<2x128xf32>
    %418 = vector.extract_strided_slice %403 {offsets = [0, 384], sizes = [2, 128], strides = [1, 1]} : vector<2x512xf32> to vector<2x128xf32>
    %419 = arith.negf %418 : vector<2x128xf32>
    %420 = math.exp %419 : vector<2x128xf32>
    %cst_160 = arith.constant 1.000000e+00 : f32
    %421 = vector.broadcast %cst_160 : f32 to vector<2x128xf32>
    %422 = arith.addf %421, %420 : vector<2x128xf32>
    %423 = arith.divf %421, %422 : vector<2x128xf32>
    %424 = arith.mulf %415, %390 : vector<2x128xf32>
    %425 = arith.mulf %409, %417 : vector<2x128xf32>
    %426 = arith.addf %424, %425 : vector<2x128xf32>
    %427 = math.tanh %426 : vector<2x128xf32>
    %428 = arith.mulf %423, %427 : vector<2x128xf32>
    %429 = arith.index_cast %c2_i32_151 : i32 to index
    %c0_161 = arith.constant 0 : index
    %c0_162 = arith.constant 0 : index
    %430 = vector.load %arg13[%429, %c0_161, %c0_162] : memref<8x2x128xf32, #tpu.memory_space<vmem>>, vector<1x2x128xf32>
    %431 = vector.shape_cast %430 : vector<1x2x128xf32> to vector<2x128xf32>
    %432 = vector.shape_cast %428 : vector<2x128xf32> to vector<1x2x128xf32>
    tpu.vector_store %arg13[%429, %c0_161, %c0_162], %432 {strides = array<i32>} : memref<8x2x128xf32, #tpu.memory_space<vmem>>, vector<1x2x128xf32>,
    %c3_i32_163 = arith.constant 3 : i32
    %433 = arith.index_cast %c3_i32_163 : i32 to index
    %c0_164 = arith.constant 0 : index
    %c0_165 = arith.constant 0 : index
    %434 = vector.load %arg14[%433, %c0_164, %c0_165] : memref<8x2x512xf32, #tpu.memory_space<vmem>>, vector<1x2x512xf32>
    %435 = vector.shape_cast %434 : vector<1x2x512xf32> to vector<2x512xf32>
    %c1_166 = arith.constant 1 : index
    %c0_167 = arith.constant 0 : index
    %c0_168 = arith.constant 0 : index
    %436 = vector.load %arg4[%c1_166, %c0_167, %c0_168] : memref<2x128x512xf32, #tpu.memory_space<vmem>>, vector<1x128x512xf32>
    %437 = vector.shape_cast %436 : vector<1x128x512xf32> to vector<128x512xf32>
    %cst_169 = arith.constant dense<0.000000e+00> : vector<2x512xf32>
    %438 = tpu.matmul %428, %437, %cst_169 {dimension_numbers = #tpu.dot_dimension_numbers<[1], [0], [0], [1], [0, 0, 1, 1], [], []>} : vector<2x128xf32>, vector<128x512xf32>, vector<2x512xf32> -> vector<2x512xf32>
    %439 = arith.addf %435, %438 : vector<2x512xf32>
    %440 = vector.extract_strided_slice %439 {offsets = [0, 0], sizes = [2, 128], strides = [1, 1]} : vector<2x512xf32> to vector<2x128xf32>
    %441 = arith.negf %440 : vector<2x128xf32>
    %442 = math.exp %441 : vector<2x128xf32>
    %cst_170 = arith.constant 1.000000e+00 : f32
    %443 = vector.broadcast %cst_170 : f32 to vector<2x128xf32>
    %444 = arith.addf %443, %442 : vector<2x128xf32>
    %445 = arith.divf %443, %444 : vector<2x128xf32>
    %446 = vector.extract_strided_slice %439 {offsets = [0, 128], sizes = [2, 128], strides = [1, 1]} : vector<2x512xf32> to vector<2x128xf32>
    %447 = arith.negf %446 : vector<2x128xf32>
    %448 = math.exp %447 : vector<2x128xf32>
    %cst_171 = arith.constant 1.000000e+00 : f32
    %449 = vector.broadcast %cst_171 : f32 to vector<2x128xf32>
    %450 = arith.addf %449, %448 : vector<2x128xf32>
    %451 = arith.divf %449, %450 : vector<2x128xf32>
    %452 = vector.extract_strided_slice %439 {offsets = [0, 256], sizes = [2, 128], strides = [1, 1]} : vector<2x512xf32> to vector<2x128xf32>
    %453 = math.tanh %452 : vector<2x128xf32>
    %454 = vector.extract_strided_slice %439 {offsets = [0, 384], sizes = [2, 128], strides = [1, 1]} : vector<2x512xf32> to vector<2x128xf32>
    %455 = arith.negf %454 : vector<2x128xf32>
    %456 = math.exp %455 : vector<2x128xf32>
    %cst_172 = arith.constant 1.000000e+00 : f32
    %457 = vector.broadcast %cst_172 : f32 to vector<2x128xf32>
    %458 = arith.addf %457, %456 : vector<2x128xf32>
    %459 = arith.divf %457, %458 : vector<2x128xf32>
    %460 = arith.mulf %451, %426 : vector<2x128xf32>
    %461 = arith.mulf %445, %453 : vector<2x128xf32>
    %462 = arith.addf %460, %461 : vector<2x128xf32>
    %463 = math.tanh %462 : vector<2x128xf32>
    %464 = arith.mulf %459, %463 : vector<2x128xf32>
    %465 = arith.index_cast %c3_i32_163 : i32 to index
    %c0_173 = arith.constant 0 : index
    %c0_174 = arith.constant 0 : index
    %466 = vector.load %arg13[%465, %c0_173, %c0_174] : memref<8x2x128xf32, #tpu.memory_space<vmem>>, vector<1x2x128xf32>
    %467 = vector.shape_cast %466 : vector<1x2x128xf32> to vector<2x128xf32>
    %468 = vector.shape_cast %464 : vector<2x128xf32> to vector<1x2x128xf32>
    tpu.vector_store %arg13[%465, %c0_173, %c0_174], %468 {strides = array<i32>} : memref<8x2x128xf32, #tpu.memory_space<vmem>>, vector<1x2x128xf32>,
    %c4_i32_175 = arith.constant 4 : i32
    %469 = arith.index_cast %c4_i32_175 : i32 to index
    %c0_176 = arith.constant 0 : index
    %c0_177 = arith.constant 0 : index
    %470 = vector.load %arg14[%469, %c0_176, %c0_177] : memref<8x2x512xf32, #tpu.memory_space<vmem>>, vector<1x2x512xf32>
    %471 = vector.shape_cast %470 : vector<1x2x512xf32> to vector<2x512xf32>
    %c1_178 = arith.constant 1 : index
    %c0_179 = arith.constant 0 : index
    %c0_180 = arith.constant 0 : index
    %472 = vector.load %arg4[%c1_178, %c0_179, %c0_180] : memref<2x128x512xf32, #tpu.memory_space<vmem>>, vector<1x128x512xf32>
    %473 = vector.shape_cast %472 : vector<1x128x512xf32> to vector<128x512xf32>
    %cst_181 = arith.constant dense<0.000000e+00> : vector<2x512xf32>
    %474 = tpu.matmul %464, %473, %cst_181 {dimension_numbers = #tpu.dot_dimension_numbers<[1], [0], [0], [1], [0, 0, 1, 1], [], []>} : vector<2x128xf32>, vector<128x512xf32>, vector<2x512xf32> -> vector<2x512xf32>
    %475 = arith.addf %471, %474 : vector<2x512xf32>
    %476 = vector.extract_strided_slice %475 {offsets = [0, 0], sizes = [2, 128], strides = [1, 1]} : vector<2x512xf32> to vector<2x128xf32>
    %477 = arith.negf %476 : vector<2x128xf32>
    %478 = math.exp %477 : vector<2x128xf32>
    %cst_182 = arith.constant 1.000000e+00 : f32
    %479 = vector.broadcast %cst_182 : f32 to vector<2x128xf32>
    %480 = arith.addf %479, %478 : vector<2x128xf32>
    %481 = arith.divf %479, %480 : vector<2x128xf32>
    %482 = vector.extract_strided_slice %475 {offsets = [0, 128], sizes = [2, 128], strides = [1, 1]} : vector<2x512xf32> to vector<2x128xf32>
    %483 = arith.negf %482 : vector<2x128xf32>
    %484 = math.exp %483 : vector<2x128xf32>
    %cst_183 = arith.constant 1.000000e+00 : f32
    %485 = vector.broadcast %cst_183 : f32 to vector<2x128xf32>
    %486 = arith.addf %485, %484 : vector<2x128xf32>
    %487 = arith.divf %485, %486 : vector<2x128xf32>
    %488 = vector.extract_strided_slice %475 {offsets = [0, 256], sizes = [2, 128], strides = [1, 1]} : vector<2x512xf32> to vector<2x128xf32>
    %489 = math.tanh %488 : vector<2x128xf32>
    %490 = vector.extract_strided_slice %475 {offsets = [0, 384], sizes = [2, 128], strides = [1, 1]} : vector<2x512xf32> to vector<2x128xf32>
    %491 = arith.negf %490 : vector<2x128xf32>
    %492 = math.exp %491 : vector<2x128xf32>
    %cst_184 = arith.constant 1.000000e+00 : f32
    %493 = vector.broadcast %cst_184 : f32 to vector<2x128xf32>
    %494 = arith.addf %493, %492 : vector<2x128xf32>
    %495 = arith.divf %493, %494 : vector<2x128xf32>
    %496 = arith.mulf %487, %462 : vector<2x128xf32>
    %497 = arith.mulf %481, %489 : vector<2x128xf32>
    %498 = arith.addf %496, %497 : vector<2x128xf32>
    %499 = math.tanh %498 : vector<2x128xf32>
    %500 = arith.mulf %495, %499 : vector<2x128xf32>
    %501 = arith.index_cast %c4_i32_175 : i32 to index
    %c0_185 = arith.constant 0 : index
    %c0_186 = arith.constant 0 : index
    %502 = vector.load %arg13[%501, %c0_185, %c0_186] : memref<8x2x128xf32, #tpu.memory_space<vmem>>, vector<1x2x128xf32>
    %503 = vector.shape_cast %502 : vector<1x2x128xf32> to vector<2x128xf32>
    %504 = vector.shape_cast %500 : vector<2x128xf32> to vector<1x2x128xf32>
    tpu.vector_store %arg13[%501, %c0_185, %c0_186], %504 {strides = array<i32>} : memref<8x2x128xf32, #tpu.memory_space<vmem>>, vector<1x2x128xf32>,
    %c5_i32_187 = arith.constant 5 : i32
    %505 = arith.index_cast %c5_i32_187 : i32 to index
    %c0_188 = arith.constant 0 : index
    %c0_189 = arith.constant 0 : index
    %506 = vector.load %arg14[%505, %c0_188, %c0_189] : memref<8x2x512xf32, #tpu.memory_space<vmem>>, vector<1x2x512xf32>
    %507 = vector.shape_cast %506 : vector<1x2x512xf32> to vector<2x512xf32>
    %c1_190 = arith.constant 1 : index
    %c0_191 = arith.constant 0 : index
    %c0_192 = arith.constant 0 : index
    %508 = vector.load %arg4[%c1_190, %c0_191, %c0_192] : memref<2x128x512xf32, #tpu.memory_space<vmem>>, vector<1x128x512xf32>
    %509 = vector.shape_cast %508 : vector<1x128x512xf32> to vector<128x512xf32>
    %cst_193 = arith.constant dense<0.000000e+00> : vector<2x512xf32>
    %510 = tpu.matmul %500, %509, %cst_193 {dimension_numbers = #tpu.dot_dimension_numbers<[1], [0], [0], [1], [0, 0, 1, 1], [], []>} : vector<2x128xf32>, vector<128x512xf32>, vector<2x512xf32> -> vector<2x512xf32>
    %511 = arith.addf %507, %510 : vector<2x512xf32>
    %512 = vector.extract_strided_slice %511 {offsets = [0, 0], sizes = [2, 128], strides = [1, 1]} : vector<2x512xf32> to vector<2x128xf32>
    %513 = arith.negf %512 : vector<2x128xf32>
    %514 = math.exp %513 : vector<2x128xf32>
    %cst_194 = arith.constant 1.000000e+00 : f32
    %515 = vector.broadcast %cst_194 : f32 to vector<2x128xf32>
    %516 = arith.addf %515, %514 : vector<2x128xf32>
    %517 = arith.divf %515, %516 : vector<2x128xf32>
    %518 = vector.extract_strided_slice %511 {offsets = [0, 128], sizes = [2, 128], strides = [1, 1]} : vector<2x512xf32> to vector<2x128xf32>
    %519 = arith.negf %518 : vector<2x128xf32>
    %520 = math.exp %519 : vector<2x128xf32>
    %cst_195 = arith.constant 1.000000e+00 : f32
    %521 = vector.broadcast %cst_195 : f32 to vector<2x128xf32>
    %522 = arith.addf %521, %520 : vector<2x128xf32>
    %523 = arith.divf %521, %522 : vector<2x128xf32>
    %524 = vector.extract_strided_slice %511 {offsets = [0, 256], sizes = [2, 128], strides = [1, 1]} : vector<2x512xf32> to vector<2x128xf32>
    %525 = math.tanh %524 : vector<2x128xf32>
    %526 = vector.extract_strided_slice %511 {offsets = [0, 384], sizes = [2, 128], strides = [1, 1]} : vector<2x512xf32> to vector<2x128xf32>
    %527 = arith.negf %526 : vector<2x128xf32>
    %528 = math.exp %527 : vector<2x128xf32>
    %cst_196 = arith.constant 1.000000e+00 : f32
    %529 = vector.broadcast %cst_196 : f32 to vector<2x128xf32>
    %530 = arith.addf %529, %528 : vector<2x128xf32>
    %531 = arith.divf %529, %530 : vector<2x128xf32>
    %532 = arith.mulf %523, %498 : vector<2x128xf32>
    %533 = arith.mulf %517, %525 : vector<2x128xf32>
    %534 = arith.addf %532, %533 : vector<2x128xf32>
    %535 = math.tanh %534 : vector<2x128xf32>
    %536 = arith.mulf %531, %535 : vector<2x128xf32>
    %537 = arith.index_cast %c5_i32_187 : i32 to index
    %c0_197 = arith.constant 0 : index
    %c0_198 = arith.constant 0 : index
    %538 = vector.load %arg13[%537, %c0_197, %c0_198] : memref<8x2x128xf32, #tpu.memory_space<vmem>>, vector<1x2x128xf32>
    %539 = vector.shape_cast %538 : vector<1x2x128xf32> to vector<2x128xf32>
    %540 = vector.shape_cast %536 : vector<2x128xf32> to vector<1x2x128xf32>
    tpu.vector_store %arg13[%537, %c0_197, %c0_198], %540 {strides = array<i32>} : memref<8x2x128xf32, #tpu.memory_space<vmem>>, vector<1x2x128xf32>,
    %c6_i32_199 = arith.constant 6 : i32
    %541 = arith.index_cast %c6_i32_199 : i32 to index
    %c0_200 = arith.constant 0 : index
    %c0_201 = arith.constant 0 : index
    %542 = vector.load %arg14[%541, %c0_200, %c0_201] : memref<8x2x512xf32, #tpu.memory_space<vmem>>, vector<1x2x512xf32>
    %543 = vector.shape_cast %542 : vector<1x2x512xf32> to vector<2x512xf32>
    %c1_202 = arith.constant 1 : index
    %c0_203 = arith.constant 0 : index
    %c0_204 = arith.constant 0 : index
    %544 = vector.load %arg4[%c1_202, %c0_203, %c0_204] : memref<2x128x512xf32, #tpu.memory_space<vmem>>, vector<1x128x512xf32>
    %545 = vector.shape_cast %544 : vector<1x128x512xf32> to vector<128x512xf32>
    %cst_205 = arith.constant dense<0.000000e+00> : vector<2x512xf32>
    %546 = tpu.matmul %536, %545, %cst_205 {dimension_numbers = #tpu.dot_dimension_numbers<[1], [0], [0], [1], [0, 0, 1, 1], [], []>} : vector<2x128xf32>, vector<128x512xf32>, vector<2x512xf32> -> vector<2x512xf32>
    %547 = arith.addf %543, %546 : vector<2x512xf32>
    %548 = vector.extract_strided_slice %547 {offsets = [0, 0], sizes = [2, 128], strides = [1, 1]} : vector<2x512xf32> to vector<2x128xf32>
    %549 = arith.negf %548 : vector<2x128xf32>
    %550 = math.exp %549 : vector<2x128xf32>
    %cst_206 = arith.constant 1.000000e+00 : f32
    %551 = vector.broadcast %cst_206 : f32 to vector<2x128xf32>
    %552 = arith.addf %551, %550 : vector<2x128xf32>
    %553 = arith.divf %551, %552 : vector<2x128xf32>
    %554 = vector.extract_strided_slice %547 {offsets = [0, 128], sizes = [2, 128], strides = [1, 1]} : vector<2x512xf32> to vector<2x128xf32>
    %555 = arith.negf %554 : vector<2x128xf32>
    %556 = math.exp %555 : vector<2x128xf32>
    %cst_207 = arith.constant 1.000000e+00 : f32
    %557 = vector.broadcast %cst_207 : f32 to vector<2x128xf32>
    %558 = arith.addf %557, %556 : vector<2x128xf32>
    %559 = arith.divf %557, %558 : vector<2x128xf32>
    %560 = vector.extract_strided_slice %547 {offsets = [0, 256], sizes = [2, 128], strides = [1, 1]} : vector<2x512xf32> to vector<2x128xf32>
    %561 = math.tanh %560 : vector<2x128xf32>
    %562 = vector.extract_strided_slice %547 {offsets = [0, 384], sizes = [2, 128], strides = [1, 1]} : vector<2x512xf32> to vector<2x128xf32>
    %563 = arith.negf %562 : vector<2x128xf32>
    %564 = math.exp %563 : vector<2x128xf32>
    %cst_208 = arith.constant 1.000000e+00 : f32
    %565 = vector.broadcast %cst_208 : f32 to vector<2x128xf32>
    %566 = arith.addf %565, %564 : vector<2x128xf32>
    %567 = arith.divf %565, %566 : vector<2x128xf32>
    %568 = arith.mulf %559, %534 : vector<2x128xf32>
    %569 = arith.mulf %553, %561 : vector<2x128xf32>
    %570 = arith.addf %568, %569 : vector<2x128xf32>
    %571 = math.tanh %570 : vector<2x128xf32>
    %572 = arith.mulf %567, %571 : vector<2x128xf32>
    %573 = arith.index_cast %c6_i32_199 : i32 to index
    %c0_209 = arith.constant 0 : index
    %c0_210 = arith.constant 0 : index
    %574 = vector.load %arg13[%573, %c0_209, %c0_210] : memref<8x2x128xf32, #tpu.memory_space<vmem>>, vector<1x2x128xf32>
    %575 = vector.shape_cast %574 : vector<1x2x128xf32> to vector<2x128xf32>
    %576 = vector.shape_cast %572 : vector<2x128xf32> to vector<1x2x128xf32>
    tpu.vector_store %arg13[%573, %c0_209, %c0_210], %576 {strides = array<i32>} : memref<8x2x128xf32, #tpu.memory_space<vmem>>, vector<1x2x128xf32>,
    %c7_i32_211 = arith.constant 7 : i32
    %577 = arith.index_cast %c7_i32_211 : i32 to index
    %c0_212 = arith.constant 0 : index
    %c0_213 = arith.constant 0 : index
    %578 = vector.load %arg14[%577, %c0_212, %c0_213] : memref<8x2x512xf32, #tpu.memory_space<vmem>>, vector<1x2x512xf32>
    %579 = vector.shape_cast %578 : vector<1x2x512xf32> to vector<2x512xf32>
    %c1_214 = arith.constant 1 : index
    %c0_215 = arith.constant 0 : index
    %c0_216 = arith.constant 0 : index
    %580 = vector.load %arg4[%c1_214, %c0_215, %c0_216] : memref<2x128x512xf32, #tpu.memory_space<vmem>>, vector<1x128x512xf32>
    %581 = vector.shape_cast %580 : vector<1x128x512xf32> to vector<128x512xf32>
    %cst_217 = arith.constant dense<0.000000e+00> : vector<2x512xf32>
    %582 = tpu.matmul %572, %581, %cst_217 {dimension_numbers = #tpu.dot_dimension_numbers<[1], [0], [0], [1], [0, 0, 1, 1], [], []>} : vector<2x128xf32>, vector<128x512xf32>, vector<2x512xf32> -> vector<2x512xf32>
    %583 = arith.addf %579, %582 : vector<2x512xf32>
    %584 = vector.extract_strided_slice %583 {offsets = [0, 0], sizes = [2, 128], strides = [1, 1]} : vector<2x512xf32> to vector<2x128xf32>
    %585 = arith.negf %584 : vector<2x128xf32>
    %586 = math.exp %585 : vector<2x128xf32>
    %cst_218 = arith.constant 1.000000e+00 : f32
    %587 = vector.broadcast %cst_218 : f32 to vector<2x128xf32>
    %588 = arith.addf %587, %586 : vector<2x128xf32>
    %589 = arith.divf %587, %588 : vector<2x128xf32>
    %590 = vector.extract_strided_slice %583 {offsets = [0, 128], sizes = [2, 128], strides = [1, 1]} : vector<2x512xf32> to vector<2x128xf32>
    %591 = arith.negf %590 : vector<2x128xf32>
    %592 = math.exp %591 : vector<2x128xf32>
    %cst_219 = arith.constant 1.000000e+00 : f32
    %593 = vector.broadcast %cst_219 : f32 to vector<2x128xf32>
    %594 = arith.addf %593, %592 : vector<2x128xf32>
    %595 = arith.divf %593, %594 : vector<2x128xf32>
    %596 = vector.extract_strided_slice %583 {offsets = [0, 256], sizes = [2, 128], strides = [1, 1]} : vector<2x512xf32> to vector<2x128xf32>
    %597 = math.tanh %596 : vector<2x128xf32>
    %598 = vector.extract_strided_slice %583 {offsets = [0, 384], sizes = [2, 128], strides = [1, 1]} : vector<2x512xf32> to vector<2x128xf32>
    %599 = arith.negf %598 : vector<2x128xf32>
    %600 = math.exp %599 : vector<2x128xf32>
    %cst_220 = arith.constant 1.000000e+00 : f32
    %601 = vector.broadcast %cst_220 : f32 to vector<2x128xf32>
    %602 = arith.addf %601, %600 : vector<2x128xf32>
    %603 = arith.divf %601, %602 : vector<2x128xf32>
    %604 = arith.mulf %595, %570 : vector<2x128xf32>
    %605 = arith.mulf %589, %597 : vector<2x128xf32>
    %606 = arith.addf %604, %605 : vector<2x128xf32>
    %607 = math.tanh %606 : vector<2x128xf32>
    %608 = arith.mulf %603, %607 : vector<2x128xf32>
    %609 = arith.index_cast %c7_i32_211 : i32 to index
    %c0_221 = arith.constant 0 : index
    %c0_222 = arith.constant 0 : index
    %610 = vector.load %arg13[%609, %c0_221, %c0_222] : memref<8x2x128xf32, #tpu.memory_space<vmem>>, vector<1x2x128xf32>
    %611 = vector.shape_cast %610 : vector<1x2x128xf32> to vector<2x128xf32>
    %612 = vector.shape_cast %608 : vector<2x128xf32> to vector<1x2x128xf32>
    tpu.vector_store %arg13[%609, %c0_221, %c0_222], %612 {strides = array<i32>} : memref<8x2x128xf32, #tpu.memory_space<vmem>>, vector<1x2x128xf32>,
    %c8_i32_223 = arith.constant 8 : i32
    %613 = vector.extract_strided_slice %608 {offsets = [0, 0], sizes = [2, 32], strides = [1, 1]} : vector<2x128xf32> to vector<2x32xf32>
    %c1_224 = arith.constant 1 : index
    %c0_225 = arith.constant 0 : index
    %c0_226 = arith.constant 0 : index
    %614 = vector.load %arg11[%c1_224, %c0_225, %c0_226] : memref<2x2x32xf32, #tpu.memory_space<vmem>>, vector<1x2x32xf32>
    %615 = vector.shape_cast %614 : vector<1x2x32xf32> to vector<2x32xf32>
    %616 = vector.shape_cast %613 : vector<2x32xf32> to vector<1x2x32xf32>
    tpu.vector_store %arg11[%c1_224, %c0_225, %c0_226], %616 {strides = array<i32>} : memref<2x2x32xf32, #tpu.memory_space<vmem>>, vector<1x2x32xf32>,
    %617 = vector.extract_strided_slice %606 {offsets = [0, 0], sizes = [2, 32], strides = [1, 1]} : vector<2x128xf32> to vector<2x32xf32>
    %c1_227 = arith.constant 1 : index
    %c0_228 = arith.constant 0 : index
    %c0_229 = arith.constant 0 : index
    %618 = vector.load %arg12[%c1_227, %c0_228, %c0_229] : memref<2x2x32xf32, #tpu.memory_space<vmem>>, vector<1x2x32xf32>
    %619 = vector.shape_cast %618 : vector<1x2x32xf32> to vector<2x32xf32>
    %620 = vector.shape_cast %617 : vector<2x32xf32> to vector<1x2x32xf32>
    tpu.vector_store %arg12[%c1_227, %c0_228, %c0_229], %620 {strides = array<i32>} : memref<2x2x32xf32, #tpu.memory_space<vmem>>, vector<1x2x32xf32>,
    %c0_230 = arith.constant 0 : index
    %c0_231 = arith.constant 0 : index
    %c0_232 = arith.constant 0 : index
    %621 = vector.load %arg13[%c0_230, %c0_231, %c0_232] : memref<8x2x128xf32, #tpu.memory_space<vmem>>, vector<8x2x128xf32>
    %622 = vector.shape_cast %621 : vector<8x2x128xf32> to vector<16x128xf32>
    %c0_233 = arith.constant 0 : index
    %c0_234 = arith.constant 0 : index
    %623 = vector.load %arg8[%c0_233, %c0_234] : memref<128x16xf32, #tpu.memory_space<vmem>>, vector<128x16xf32>
    %cst_235 = arith.constant dense<0.000000e+00> : vector<16x16xf32>
    %624 = tpu.matmul %622, %623, %cst_235 {dimension_numbers = #tpu.dot_dimension_numbers<[1], [0], [0], [1], [0, 0, 1, 1], [], []>} : vector<16x128xf32>, vector<128x16xf32>, vector<16x16xf32> -> vector<16x16xf32>
    %c0_236 = arith.constant 0 : index
    %c0_237 = arith.constant 0 : index
    %625 = vector.load %arg9[%c0_236, %c0_237] : memref<1x16xf32, #tpu.memory_space<vmem>>, vector<1x16xf32>
    %626 = vector.broadcast %625 : vector<1x16xf32> to vector<16x16xf32>
    %627 = arith.addf %624, %626 : vector<16x16xf32>
    %628 = vector.shape_cast %627 : vector<16x16xf32> to vector<8x2x16xf32>
    %629 = tpu.transpose %628, [1, 0, 2] : vector<8x2x16xf32> -> vector<2x8x16xf32>
    %c0_238 = arith.constant 0 : index
    %c0_239 = arith.constant 0 : index
    %c0_240 = arith.constant 0 : index
    %630 = vector.load %arg10[%c0_238, %c0_239, %c0_240] : memref<2x8x16xf32, #tpu.memory_space<vmem>>, vector<2x8x16xf32>
    tpu.vector_store %arg10[%c0_238, %c0_239, %c0_240], %629 {strides = array<i32>} : memref<2x8x16xf32, #tpu.memory_space<vmem>>, vector<2x8x16xf32>,
    return
  }
}

</mosaic_0001>

<bundles_post_ra>
// kernel: tpu_custom_call.1
= control target key start
LH: loop header
LB: loop body
LE: loop exit
PB: predicated region body
PF: predicated region fallthrough
CT: control target
= control target key end

     0   :  { %18 = vsyncpa [#allocation5], 0  ;;  %s7472_s0 = inlined_call_operand.vmem [shape: f32[2,8,16], index: 0, kind: input, shape index: {}]   ;;  %s7473_s1 = inlined_call_operand.vmem [shape: f32[16,512], index: 1, kind: input, shape index: {}]   ;;  %s7474_s2 = inlined_call_operand.vmem [shape: f32[1,512], index: 2, kind: input, shape index: {}]   ;;  %s7475_s3 = inlined_call_operand.hbm [shape: f32[2,128,512], index: 3, kind: input, shape index: {}]   ;;  %s7476_s4 = inlined_call_operand.hbm [shape: f32[2,128,512], index: 4, kind: input, shape index: {}]   ;;  %s7477_s5 = inlined_call_operand.vmem [shape: f32[2,1,512], index: 5, kind: input, shape index: {}]   ;;  %s7478_s6 = inlined_call_operand.vmem [shape: f32[2,2,128], index: 6, kind: input, shape index: {}]   ;;  %s7479_s7 = inlined_call_operand.vmem [shape: f32[2,2,128], index: 7, kind: input, shape index: {}]   ;;  %s7480_s8 = inlined_call_operand.vmem [shape: f32[128,16], index: 8, kind: input, shape index: {}]   ;;  %s7481_s9 = inlined_call_operand.vmem [shape: f32[1,16], index: 9, kind: input, shape index: {}]   ;;  %s7482_s10 = inlined_call_operand.hbm [shape: f32[2,8,16], index: 10, kind: output, shape index: {0}]   ;;  %s7483_s11 = inlined_call_operand.hbm [shape: f32[2,2,32], index: 11, kind: output, shape index: {1}]   ;;  %s7484_s12 = inlined_call_operand.hbm [shape: f32[2,2,32], index: 12, kind: output, shape index: {2}]  }
   0x1   :  { %19 = vsyncpa [#allocation8], 0 }
   0x2   :  { %20 = vsyncpa [#allocation6], 0 }
   0x3   :  { %21 = vsyncpa [#allocation11], 0  ;;  %s32_s23 = sshll.u32 %s7475_s3, 4  ;;  %s4940_s24 = smov [#allocation4]   ;;  %s33_s23 = int_to_ptr.hbm [resolvable:$true] %s32_s23 }
   0x4   :  { %s34_s25 = sshll.u32 %s4940_s24, 4  ;;  %s45_s28 = sshll.u32 %s7476_s4, 4  ;;  %s35_s25 = int_to_ptr.vmem [resolvable:$true] %s34_s25  ;;  %s46_s28 = int_to_ptr.hbm [resolvable:$true] %s45_s28 }
   0x5   :  { %s4941_s29 = smov 512   ;;  %s4942_s30 = smov 32  }
   0x6   :  { %40 = dma.hbm_to_vmem [thread:$0]  %s33_s23, 16384, %s35_s25, [#allocation5], %s4941_s29, %s4941_s29, %s4942_s30  }
   0x7   :  { %s4943_s13 = smov [#allocation7]  }
   0x8   :  { %s47_s14 = sshll.u32 %s4943_s13, 4  ;;  %s48_s14 = int_to_ptr.vmem [resolvable:$true] %s47_s14 }
   0x9   :  { %53 = dma.hbm_to_vmem [thread:$0]  %s46_s28, 16384, %s48_s14, [#allocation8], %s4941_s29, %s4941_s29, %s4942_s30  }
   0xa   :  { %4932 = dma.done.wait [#allocation5], 16384  }
   0xb   :  { %4933 = vsyncadd [#allocation5], 4294950912 }
   0xc   :  { %4934 = dma.done.wait [#allocation8], 16384  }
   0xd   :  { %4935 = vsyncadd [#allocation8], 4294950912  ;;  %v4944_v0 = vmov 1983009808   ;;  %v5025_v2 = vld [vmem:[#allocation7 + $0x1e0] sm:$0xff]  ;;  %v132_v8 = vld [vmem:[%s7473_s1 + $0x28] sm:$0xff] }
   0xe   :  { %v78_v1 = vunpack.c.l.s4 %v4944_v0  ;;  %v5027_v3 = vld [vmem:[#allocation7 + $0x1c0] sm:$0xff]  ;;  %400 = vmatpush.msra.mxu1 %v5025_v2  ;;  %v4945_v5 = vmov 1934713408   ;;  %212 = vmatpush.msra.mxu2 %v132_v8  ;;  %v128_v9 = vld [vmem:[%s7473_s1 + $0x8] sm:$0xff]  ;;  %v72_v10 = vld [vmem:[%s7472_s0] sm:$0xff]  ;;  %vm75_vm0 = vcmask 1047556  }
   0xf   :  { %v100_v6 = vunpack.c.l.s4 %v4945_v5  ;;  %v5030_v7 = vld [vmem:[#allocation7 + $0x1a0] sm:$0xff]  ;;  %v73_v12 = vld [vmem:[%s7472_s0 + $0x8] sm:$0xff]  ;;  %v74_v13 = vrot.slane %v72_v10, 4  ;;  %v133_v18 = vld [vmem:[%s7473_s1 + $0x30] sm:$0xff]  ;;  %vm170_vm1 = vcmask 130048   ;;  %vm283_vm2 = vcmask 1045508  }
  0x10   :  { %v79_v4 = vunpack.c.0.s8 %v78_v1  ;;  %401 = vmatpush.msra.mxu1 %v5027_v3  ;;  %v5042_v11 = vld [vmem:[#allocation7 + $0x180] sm:$0xff]  ;;  %213 = vmatpush.msra.mxu2 %v128_v9  ;;  %v85_v15 = vrot.slane %v73_v12, 4  ;;  %v129_v22 = vld [vmem:[%s7473_s1 + $0x10] sm:$0xff]  ;;  %v131_v36 = vld [vmem:[%s7473_s1 + $0x20] sm:$0xff]  ;;  %vm287_vm3 = vcmask 1043458   ;;  %vm289_vm4 = vcmask 1045504  }
  0x11   :  { %v5048_v17 = vunpack.c.0.s8 %v100_v6  ;;  %v134_v19 = vld [vmem:[%s7473_s1 + $0x38] sm:$0xff]  ;;  %v76_v24 = vsel %vm75_vm0, 0.0, %v74_v13  ;;  %v5066_v26 = vld [vmem:[#allocation7 + $0x1f8] sm:$0xff]  ;;  %189 = vmatpush.msra.mxu0 %v131_v36  ;;  %v127_v41 = vld [vmem:[%s7473_s1] sm:$0xff]  ;;  %vm281_vm5 = vcmask 1041408   ;;  %vm285_vm6 = vcmask 1043456  }
  0x12   :  { %v80_v14 = vperm.slane %v72_v10, %v79_v4  ;;  %402 = vmatpush.msra.mxu1 %v5030_v7  ;;  %v90_v16 = vperm.slane %v73_v12, %v79_v4  ;;  %v5056_v20 = vld [vmem:[#allocation7 + $0x160] sm:$0xff]  ;;  %235 = vmatpush.msrb.mxu2 %v133_v18  ;;  %v84_v27 = vperm.slane %v76_v24, %v79_v4  ;;  %v86_v28 = vsel %vm75_vm0, 0.0, %v85_v15  ;;  %v5072_v32 = vld [vmem:[#allocation7 + $0x1d8] sm:$0xff]  ;;  %v5130_v63 = vld [vmem:[#allocation7 + $0x1f0] sm:$0xff]  ;;  %s4444_s28 = sshll.u32 %s7483_s11, 4  ;;  %s4946_s29 = smov [#allocation10]   ;;  %s4445_s28 = int_to_ptr.hbm [resolvable:$true] %s4444_s28 }
  0x13   :  { %7572 = vst [vmem:[#allocation17_spill] sm:$0xff] %v5048_v17  ;;  %258 = vmatpush.msra.mxu3 %v134_v19  ;;  %v130_v23 = vld [vmem:[%s7473_s1 + $0x18] sm:$0xff]  ;;  %v94_v31 = vperm.slane %v86_v28, %v79_v4  ;;  %v5084_v40 = vld [vmem:[#allocation7 + $0x1b8] sm:$0xff]  ;;  %190 = vmatpush.msra.mxu0 %v127_v41  ;;  %v5138_v4 = vld [vmem:[#allocation7 + $0x1d0] sm:$0xff]  ;;  %vm291_vm7 = vcmask 1045506   ;;  %s4442_s13 = sshll.u32 %s4946_s29, 4  ;;  %s4443_s13 = int_to_ptr.vmem [resolvable:$true] %s4442_s13 }
  0x14   :  { %v97_v21 = vrot.slane %v80_v14, 4  ;;  %403 = vmatpush.msra.mxu1 %v5042_v11  ;;  %v95_v25 = vrot.slane %v90_v16, 4  ;;  %v5069_v29 = vld [vmem:[#allocation7 + $0x140] sm:$0xff]  ;;  %236 = vmatpush.msrb.mxu2 %v129_v22  ;;  %v109_v35 = vrot.slane %v84_v27, 4  ;;  %v5096_v48 = vld [vmem:[#allocation7 + $0x198] sm:$0xff]  ;;  %v5147_v8 = vld [vmem:[#allocation7 + $0x1b0] sm:$0xff] }
  0x15   :  { %259 = vmatpush.msra.mxu3 %v130_v23  ;;  %v5081_v37 = vld [vmem:[#allocation7 + $0x120] sm:$0xff]  ;;  %v107_v39 = vrot.slane %v94_v31, 4  ;;  %v5105_v54 = vld [vmem:[#allocation7 + $0x178] sm:$0xff]  ;;  %629 = vmatpush.msrb.mxu0 %v5025_v2  ;;  %v5169_v15 = vld [vmem:[#allocation7 + $0x1e8] sm:$0xff]  ;;  %s4947_s14 = smov 2   ;;  %s4948_s1 = smov [#allocation12]  }
  0x16   :  { %v98_v30 = vsel %vm75_vm0, %v90_v16, %v97_v21  ;;  %404 = vmatpush.msra.mxu1 %v5056_v20  ;;  %v96_v33 = vsel %vm75_vm0, %v95_v25, %v80_v14  ;;  %v110_v43 = vsel %vm75_vm0, %v94_v31, %v109_v35  ;;  %v5092_v44 = vld [vmem:[#allocation7 + $0x100] sm:$0xff]  ;;  %v5113_v58 = vld [vmem:[#allocation7 + $0x158] sm:$0xff]  ;;  %v5171_v16 = vld [vmem:[#allocation7 + $0x170] sm:$0xff]  ;;  %s4455_s3 = sshll.u32 %s4948_s1, 4  ;;  %s4949_s11 = smov [#allocation9]   ;;  %s4456_s3 = int_to_ptr.vmem [resolvable:$true] %s4455_s3 }
  0x17   :  { %v106_v34 = vperm.slane %v98_v30, %v5048_v17  ;;  %460 = vmatpush.msrb.mxu3 %v5066_v26  ;;  %v102_v38 = vperm.slane %v96_v33, %v5048_v17  ;;  %v108_v46 = vsel %vm75_vm0, %v107_v39, %v84_v27  ;;  %v118_v47 = vperm.slane %v110_v43, %v5048_v17  ;;  %v5102_v51 = vld [vmem:[#allocation7 + $0xe0] sm:$0xff]  ;;  %v5121_v61 = vld [vmem:[#allocation7 + $0x138] sm:$0xff]  ;;  %v5179_v18 = vld [vmem:[#allocation7 + $0x1c8] sm:$0xff]  ;;  %s4431_s17 = sshll.u32 %s7482_s10, 4  ;;  %s4950_s18 = smov 128   ;;  %s4432_s17 = int_to_ptr.hbm [resolvable:$true] %s4431_s17 }
  0x18   :  { %405 = vmatpush.msra.mxu1 %v5069_v29  ;;  %v114_v50 = vperm.slane %v108_v46, %v5048_v17  ;;  %v5110_v56 = vld [vmem:[#allocation7 + $0xc0] sm:$0xff]  ;;  %630 = vmatpush.msrb.mxu0 %v5027_v3  ;;  %v5140_v5 = vld [vmem:[#allocation7 + $0x118] sm:$0xff]  ;;  %v5181_v19 = vld [vmem:[#allocation7 + $0x150] sm:$0xff] }
  0x19   :  { %v121_v42 = vrot.slane %v106_v34, 4  ;;  %157 = vst [vmem:[#allocation1 + $0x2] ss:$4 sm:$0xff] %v106_v34  ;;  %461 = vmatpush.msrb.mxu3 %v5072_v32  ;;  %v119_v45 = vrot.slane %v102_v38, 4  ;;  %v125_v53 = vrot.slane %v118_v47, 4  ;;  %v5119_v60 = vld [vmem:[#allocation7 + $0xa0] sm:$0xff] }
  0x1a   :  { %153 = vst [vmem:[#allocation1] ss:$4 sm:$0xff] %v102_v38  ;;  %406 = vmatpush.msra.mxu1 %v5081_v37  ;;  %v123_v55 = vrot.slane %v114_v50, 4  ;;  %631 = vmatpush.msrb.mxu0 %v5030_v7  ;;  %v5126_v62 = vld [vmem:[#allocation7 + $0x80] sm:$0xff]  ;;  %v5150_v9 = vld [vmem:[#allocation7 + $0xf8] sm:$0xff]  ;;  %v5192_v22 = vld [vmem:[#allocation7 + $0x1a8] sm:$0xff] }
  0x1b   :  { %v122_v49 = vsel %vm75_vm0, 0.0, %v121_v42  ;;  %462 = vmatpush.msrb.mxu3 %v5084_v40  ;;  %v120_v52 = vsel %vm75_vm0, 0.0, %v119_v45  ;;  %v126_v57 = vsel %vm75_vm0, 0.0, %v125_v53  ;;  %161 = vst [vmem:[#allocation1 + $0x20] ss:$4 sm:$0xff] %v114_v50  ;;  %v5133_v1 = vld [vmem:[#allocation7 + $0x60] sm:$0xff] }
  0x1c   :  { %159 = vst [vmem:[#allocation1 + $0x3] ss:$4 sm:$0xff] %v122_v49  ;;  %407 = vmatpush.msra.mxu1 %v5092_v44  ;;  %v124_v59 = vsel %vm75_vm0, 0.0, %v123_v55  ;;  %632 = vmatpush.msrb.mxu0 %v5042_v11  ;;  %v5143_v6 = vld [vmem:[#allocation7 + $0x40] sm:$0xff]  ;;  %v5157_v11 = vld [vmem:[#allocation7 + $0x190] sm:$0xff]  ;;  %v5159_v12 = vld [vmem:[#allocation7 + $0xd8] sm:$0xff] }
  0x1d   :  { %155 = vst [vmem:[#allocation1 + $0x1] ss:$4 sm:$0xff] %v120_v52  ;;  %463 = vmatpush.msrb.mxu3 %v5096_v48  ;;  %v5153_v10 = vld [vmem:[#allocation7 + $0x20] sm:$0xff]  ;;  %v5190_v21 = vld [vmem:[%s7478_s6] sm:$0x3]  ;;  %v5194_v23 = vld [vmem:[#allocation7 + $0x130] sm:$0xff] }
  0x1e   :  { %408 = vmatpush.msra.mxu1 %v5102_v51  ;;  %165 = vst [vmem:[#allocation1 + $0x22] ss:$4 sm:$0xff] %v118_v47  ;;  %633 = vmatpush.msrb.mxu0 %v5056_v20  ;;  %v5165_v14 = vld [vmem:[#allocation7] sm:$0xff]  ;;  %v5185_v20 = vld [vmem:[#allocation7 + $0xb8] sm:$0xff]  ;;  %v5204_v25 = vld [vmem:[#allocation7 + $0x188] sm:$0xff] }
  0x1f   :  { %464 = vmatpush.msrb.mxu3 %v5105_v54  ;;  %163 = vst [vmem:[#allocation1 + $0x21] ss:$4 sm:$0xff] %v124_v59  ;;  %v5202_v24 = vld [vmem:[#allocation7 + $0x98] sm:$0xff]  ;;  %v5206_v27 = vld [vmem:[#allocation7 + $0x110] sm:$0xff]  ;;  %v5225_v33 = vld [vmem:[#allocation7 + $0x148] sm:$0xff] }
  0x20   :  { %409 = vmatpush.msra.mxu1 %v5110_v56  ;;  %167 = vst [vmem:[#allocation1 + $0x23] ss:$4 sm:$0xff] %v126_v57  ;;  %634 = vmatpush.msrb.mxu0 %v5069_v29  ;;  %v5212_v28 = vld [vmem:[#allocation7 + $0x78] sm:$0xff]  ;;  %v5214_v29 = vld [vmem:[#allocation7 + $0x168] sm:$0xff]  ;;  %v5216_v30 = vld [vmem:[#allocation7 + $0xf0] sm:$0xff] }
  0x21   :  { %465 = vmatpush.msrb.mxu3 %v5113_v58  ;;  %v5222_v31 = vld [vmem:[#allocation7 + $0x58] sm:$0xff]  ;;  %v5227_v34 = vld [vmem:[#allocation7 + $0xd0] sm:$0xff]  ;;  %v5234_v36 = vld [vmem:[#allocation7 + $0x128] sm:$0xff] }
  0x22   :  { %410 = vmatpush.msra.mxu1 %v5119_v60  ;;  %635 = vmatpush.msrb.mxu0 %v5081_v37  ;;  %v5232_v35 = vld [vmem:[#allocation7 + $0x38] sm:$0xff]  ;;  %v5236_v37 = vld [vmem:[#allocation7 + $0xb0] sm:$0xff]  ;;  %v5244_v39 = vld [vmem:[#allocation7 + $0x108] sm:$0xff] }
  0x23   :  { %466 = vmatpush.msrb.mxu3 %v5121_v61  ;;  %v5242_v38 = vld [vmem:[#allocation7 + $0x18] sm:$0xff]  ;;  %v5246_v41 = vld [vmem:[#allocation7 + $0x90] sm:$0xff]  ;;  %v5252_v42 = vld [vmem:[#allocation7 + $0xe8] sm:$0xff] }
  0x24   :  { %v168_v0 = vld.sshfl [vmem:[#allocation1] sm:$0xff pattern:$0x73625140]  ;;  %411 = vmatpush.msra.mxu1 %v5126_v62  ;;  %636 = vmatpush.msrb.mxu0 %v5092_v44  ;;  %v5254_v43 = vld [vmem:[#allocation7 + $0x70] sm:$0xff]  ;;  %v5641_v17 = vld [vmem:[#allocation7 + $0x58] sm:$0xff] }
  0x25   :  { %4482 = vmatmul.msk.f32.vlgmr.msra.gmra.mxu2 %vm170_vm1, %v168_v0  ;;  %4480 = vmatmul.msk.f32.vlgmr.msra.gmra.mxu0 %vm170_vm1, %v168_v0  ;;  %v5262_v44 = vld [vmem:[#allocation7 + $0xc8] sm:$0xff]  ;;  %v5264_v45 = vld [vmem:[#allocation7 + $0x50] sm:$0xff]  ;;  %7594 = vst [vmem:[#allocation39_spill] sm:$0xff] %v5641_v17 }
  0x26   :  { %440 = vmatpush.msra.mxu2 %v5130_v63  ;;  %412 = vmatpush.msra.mxu1 %v5133_v1  ;;  %v5269_v46 = vld [vmem:[#allocation7 + $0xa8] sm:$0xff]  ;;  %v5271_v47 = vld [vmem:[#allocation7 + $0x30] sm:$0xff] }
  0x27   :  { %4486 = vmatmul.msk.f32.vlgmr.msra.gmra.mxu3 %vm170_vm1, %v168_v0  ;;  %v5162_v13 = vld.sshfl [vmem:[#allocation1 + $0x20] sm:$0xff pattern:$0x73625140]  ;;  %637 = vmatpush.msrb.mxu0 %v5102_v51  ;;  %v5279_v50 = vld [vmem:[#allocation7 + $0x10] sm:$0xff] }
  0x28   :  { %441 = vmatpush.msra.mxu2 %v5138_v4  ;;  %467 = vmatpush.msrb.mxu3 %v5140_v5  ;;  %v5277_v49 = vld [vmem:[#allocation7 + $0x88] sm:$0xff] }
  0x29   :  { %413 = vmatpush.msra.mxu1 %v5143_v6  ;;  %638 = vmatpush.msrb.mxu0 %v5110_v56  ;;  %v5285_v51 = vld [vmem:[#allocation7 + $0x68] sm:$0xff] }
  0x2a   :  { %442 = vmatpush.msra.mxu2 %v5147_v8  ;;  %468 = vmatpush.msrb.mxu3 %v5150_v9  ;;  %v5292_v52 = vld [vmem:[#allocation7 + $0x48] sm:$0xff] }
  0x2b   :  { %414 = vmatpush.msra.mxu1 %v5153_v10  ;;  %639 = vmatpush.msrb.mxu0 %v5119_v60  ;;  %v5297_v53 = vld [vmem:[#allocation7 + $0x28] sm:$0xff] }
  0x2c   :  { %443 = vmatpush.msra.mxu2 %v5157_v11  ;;  %469 = vmatpush.msrb.mxu3 %v5159_v12  ;;  %v5303_v55 = vld [vmem:[#allocation7 + $0x8] sm:$0xff] }
  0x2d   :  { %4483 = vmatmul.msk.f32.gmra.mxu2 %vm170_vm1, %v5162_v13  ;;  %415 = vmatpush.msra.mxu1 %v5165_v14 }
  0x2e   :  { %444 = vmatpush.msra.mxu2 %v5171_v16  ;;  %4481 = vmatmul.msk.f32.gmra.mxu0 %vm170_vm1, %v5162_v13 }
  0x2f   :  { %420 = vmatpush.msrb.mxu1 %v5169_v15  ;;  %4487 = vmatmul.msk.f32.gmra.mxu3 %vm170_vm1, %v5162_v13 }
  0x30   :  { %445 = vmatpush.msra.mxu2 %v5181_v19  ;;  %470 = vmatpush.msrb.mxu3 %v5185_v20 }
  0x31   :  { %421 = vmatpush.msrb.mxu1 %v5179_v18  ;;  %640 = vmatpush.msrb.mxu0 %v5126_v62 }
  0x32   :  { %416 = vmatmul.f32.vlgmr.msra.gmra.mxu1 %v5190_v21  ;;  %446 = vmatpush.msra.mxu2 %v5194_v23 }
  0x33   :  { %422 = vmatpush.msrb.mxu1 %v5192_v22  ;;  %471 = vmatpush.msrb.mxu3 %v5202_v24 }
  0x34   :  { %447 = vmatpush.msra.mxu2 %v5206_v27  ;;  %641 = vmatpush.msrb.mxu0 %v5133_v1 }
  0x35   :  { %423 = vmatpush.msrb.mxu1 %v5204_v25  ;;  %4484 = vmatmul.msk.f32.vlgmr.msrb.gmra.mxu2 %vm170_vm1, %v168_v0 }
  0x36   :  { %472 = vmatpush.msrb.mxu3 %v5212_v28  ;;  %448 = vmatpush.msra.mxu2 %v5216_v30 }
  0x37   :  { %424 = vmatpush.msrb.mxu1 %v5214_v29  ;;  %642 = vmatpush.msrb.mxu0 %v5143_v6 }
  0x38   :  { %473 = vmatpush.msrb.mxu3 %v5222_v31  ;;  %449 = vmatpush.msra.mxu2 %v5227_v34 }
  0x39   :  { %425 = vmatpush.msrb.mxu1 %v5225_v33  ;;  %643 = vmatpush.msrb.mxu0 %v5153_v10 }
  0x3a   :  { %474 = vmatpush.msrb.mxu3 %v5232_v35  ;;  %450 = vmatpush.msra.mxu2 %v5236_v37 }
  0x3b   :  { %426 = vmatpush.msrb.mxu1 %v5234_v36  ;;  %644 = vmatpush.msrb.mxu0 %v5165_v14 }
  0x3c   :  { %475 = vmatpush.msrb.mxu3 %v5242_v38  ;;  %451 = vmatpush.msra.mxu2 %v5246_v41 }
  0x3d   :  { %427 = vmatpush.msrb.mxu1 %v5244_v39  ;;  %4485 = vmatmul.msk.f32.gmra.mxu2 %vm170_vm1, %v5162_v13 }
  0x3e   :  { %476 = vmatmul.f32.vlgmr.msrb.gmra.mxu3 %v5190_v21  ;;  %452 = vmatpush.msra.mxu2 %v5254_v43 }
  0x3f   :  { %428 = vmatpush.msrb.mxu1 %v5252_v42  ;;  %689 = vmatpush.msra.mxu3 %v5066_v26 }
  0x40   :  { %453 = vmatpush.msra.mxu2 %v5264_v45  ;;  %859 = vmatpush.msra.mxu0 %v5025_v2  ;;  %v135_v2 = vld [vmem:[%s7474_s2] sm:$0xf]  ;;  %s4457_s2 = sshll.u32 %s7484_s12, 4  ;;  %s4429_s12 = sshll.u32 %s4949_s11, 4  ;;  %s4458_s2 = int_to_ptr.hbm [resolvable:$true] %s4457_s2  ;;  %s4430_s12 = int_to_ptr.vmem [resolvable:$true] %s4429_s12 }
  0x41   :  { %429 = vmatpush.msrb.mxu1 %v5262_v44  ;;  %690 = vmatpush.msra.mxu3 %v5072_v32  ;;  %v140_v62 = vperm.slane %v135_v2, 3 }
  0x42   :  { %454 = vmatpush.msra.mxu2 %v5271_v47  ;;  %860 = vmatpush.msra.mxu0 %v5027_v3 }
  0x43   :  { %430 = vmatpush.msrb.mxu1 %v5269_v46  ;;  %691 = vmatpush.msra.mxu3 %v5084_v40 }
  0x44   :  { %455 = vmatpush.msra.mxu2 %v5279_v50  ;;  %861 = vmatpush.msra.mxu0 %v5030_v7  ;;  %v138_v7 = vperm.slane %v135_v2, 1 }
  0x45   :  { %431 = vmatpush.msrb.mxu1 %v5277_v49  ;;  %456 = vmatmul.f32.vlgmr.msra.gmra.mxu2 %v5190_v21 }
  0x46   :  { %692 = vmatpush.msra.mxu3 %v5096_v48  ;;  %669 = vmatpush.msrb.mxu2 %v5130_v63 }
  0x47   :  { %432 = vmatpush.msrb.mxu1 %v5285_v51 }
  0x48   :  { %693 = vmatpush.msra.mxu3 %v5105_v54  ;;  %670 = vmatpush.msrb.mxu2 %v5138_v4 }
  0x49   :  { %433 = vmatpush.msrb.mxu1 %v5292_v52 }
  0x4a   :  { %694 = vmatpush.msra.mxu3 %v5113_v58  ;;  %671 = vmatpush.msrb.mxu2 %v5147_v8 }
  0x4b   :  { %434 = vmatpush.msrb.mxu1 %v5297_v53 }
  0x4c   :  { %695 = vmatpush.msra.mxu3 %v5121_v61  ;;  %672 = vmatpush.msrb.mxu2 %v5157_v11 }
  0x4d   :  { %435 = vmatpush.msrb.mxu1 %v5303_v55 }
  0x4e   :  { %436 = vmatmul.f32.vlgmr.msrb.gmra.mxu1 %v5190_v21  ;;  %696 = vmatpush.msra.mxu3 %v5140_v5 }
  0x4f   :  { %649 = vmatpush.msra.mxu1 %v5169_v15  ;;  %673 = vmatpush.msrb.mxu2 %v5171_v16 }
  0x50   :  { %697 = vmatpush.msra.mxu3 %v5150_v9 }
  0x51   :  { %650 = vmatpush.msra.mxu1 %v5179_v18  ;;  %674 = vmatpush.msrb.mxu2 %v5181_v19 }
  0x52   :  { %698 = vmatpush.msra.mxu3 %v5159_v12 }
  0x53   :  { %651 = vmatpush.msra.mxu1 %v5192_v22  ;;  %675 = vmatpush.msrb.mxu2 %v5194_v23 }
  0x54   :  { %699 = vmatpush.msra.mxu3 %v5185_v20 }
  0x55   :  { %652 = vmatpush.msra.mxu1 %v5204_v25  ;;  %676 = vmatpush.msrb.mxu2 %v5206_v27 }
  0x56   :  { %700 = vmatpush.msra.mxu3 %v5202_v24 }
  0x57   :  { %653 = vmatpush.msra.mxu1 %v5214_v29  ;;  %677 = vmatpush.msrb.mxu2 %v5216_v30 }
  0x58   :  { %701 = vmatpush.msra.mxu3 %v5212_v28 }
  0x59   :  { %654 = vmatpush.msra.mxu1 %v5225_v33  ;;  %678 = vmatpush.msrb.mxu2 %v5227_v34 }
  0x5a   :  { %702 = vmatpush.msra.mxu3 %v5222_v31 }
  0x5b   :  { %655 = vmatpush.msra.mxu1 %v5234_v36  ;;  %679 = vmatpush.msrb.mxu2 %v5236_v37 }
  0x5c   :  { %703 = vmatpush.msra.mxu3 %v5232_v35 }
  0x5d   :  { %656 = vmatpush.msra.mxu1 %v5244_v39  ;;  %680 = vmatpush.msrb.mxu2 %v5246_v41 }
  0x5e   :  { %704 = vmatpush.msra.mxu3 %v5242_v38 }
  0x5f   :  { %657 = vmatpush.msra.mxu1 %v5252_v42  ;;  %681 = vmatpush.msrb.mxu2 %v5254_v43 }
  0x60   :  { %919 = vmatpush.msrb.mxu3 %v5066_v26  ;;  %v137_v26 = vperm.slane %v135_v2, 0 }
  0x61   :  { %658 = vmatpush.msra.mxu1 %v5262_v44  ;;  %682 = vmatpush.msrb.mxu2 %v5264_v45 }
  0x62   :  { %920 = vmatpush.msrb.mxu3 %v5072_v32 }
  0x63   :  { %659 = vmatpush.msra.mxu1 %v5269_v46  ;;  %683 = vmatpush.msrb.mxu2 %v5271_v47 }
  0x64   :  { %921 = vmatpush.msrb.mxu3 %v5084_v40 }
  0x65   :  { %660 = vmatpush.msra.mxu1 %v5277_v49  ;;  %684 = vmatpush.msrb.mxu2 %v5279_v50 }
  0x66   :  { %922 = vmatpush.msrb.mxu3 %v5096_v48 }
  0x67   :  { %899 = vmatpush.msra.mxu2 %v5130_v63  ;;  %661 = vmatpush.msra.mxu1 %v5285_v51 }
  0x68   :  { %923 = vmatpush.msrb.mxu3 %v5105_v54 }
  0x69   :  { %900 = vmatpush.msra.mxu2 %v5138_v4  ;;  %662 = vmatpush.msra.mxu1 %v5292_v52 }
  0x6a   :  { %924 = vmatpush.msrb.mxu3 %v5113_v58 }
  0x6b   :  { %901 = vmatpush.msra.mxu2 %v5147_v8  ;;  %663 = vmatpush.msra.mxu1 %v5297_v53  ;;  %v139_v8 = vperm.slane %v135_v2, 2 }
  0x6c   :  { %925 = vmatpush.msrb.mxu3 %v5121_v61 }
  0x6d   :  { %902 = vmatpush.msra.mxu2 %v5157_v11  ;;  %664 = vmatpush.msra.mxu1 %v5303_v55 }
  0x6e   :  { %926 = vmatpush.msrb.mxu3 %v5140_v5 }
  0x6f   :  { %879 = vmatpush.msrb.mxu1 %v5169_v15  ;;  %903 = vmatpush.msra.mxu2 %v5171_v16 }
  0x70   :  { %927 = vmatpush.msrb.mxu3 %v5150_v9 }
  0x71   :  { %880 = vmatpush.msrb.mxu1 %v5179_v18  ;;  %904 = vmatpush.msra.mxu2 %v5181_v19 }
  0x72   :  { %928 = vmatpush.msrb.mxu3 %v5159_v12 }
  0x73   :  { %881 = vmatpush.msrb.mxu1 %v5192_v22  ;;  %905 = vmatpush.msra.mxu2 %v5194_v23 }
  0x74   :  { %929 = vmatpush.msrb.mxu3 %v5185_v20 }
  0x75   :  { %882 = vmatpush.msrb.mxu1 %v5204_v25  ;;  %906 = vmatpush.msra.mxu2 %v5206_v27 }
  0x76   :  { %930 = vmatpush.msrb.mxu3 %v5202_v24 }
  0x77   :  { %883 = vmatpush.msrb.mxu1 %v5214_v29  ;;  %907 = vmatpush.msra.mxu2 %v5216_v30 }
  0x78   :  { %931 = vmatpush.msrb.mxu3 %v5212_v28 }
  0x79   :  { %884 = vmatpush.msrb.mxu1 %v5225_v33  ;;  %908 = vmatpush.msra.mxu2 %v5227_v34 }
  0x7a   :  { %932 = vmatpush.msrb.mxu3 %v5222_v31 }
  0x7b   :  { %885 = vmatpush.msrb.mxu1 %v5234_v36  ;;  %909 = vmatpush.msra.mxu2 %v5236_v37 }
  0x7c   :  { %933 = vmatpush.msrb.mxu3 %v5232_v35 }
  0x7d   :  { %886 = vmatpush.msrb.mxu1 %v5244_v39  ;;  %910 = vmatpush.msra.mxu2 %v5246_v41 }
  0x7e   :  { %934 = vmatpush.msrb.mxu3 %v5242_v38 }
  0x7f   :  { %887 = vmatpush.msrb.mxu1 %v5252_v42  ;;  %911 = vmatpush.msra.mxu2 %v5254_v43 }
  0x81   :  { %888 = vmatpush.msrb.mxu1 %v5262_v44  ;;  %912 = vmatpush.msra.mxu2 %v5264_v45 }
  0x83   :  { %889 = vmatpush.msrb.mxu1 %v5269_v46  ;;  %913 = vmatpush.msra.mxu2 %v5271_v47 }
  0x85   :  { %890 = vmatpush.msrb.mxu1 %v5277_v49  ;;  %914 = vmatpush.msra.mxu2 %v5279_v50 }
  0x87   :  { %891 = vmatpush.msrb.mxu1 %v5285_v51 }
  0x89   :  { %892 = vmatpush.msrb.mxu1 %v5292_v52 }
  0x8b   :  { %893 = vmatpush.msrb.mxu1 %v5297_v53 }
  0x8d   :  { %894 = vmatpush.msrb.mxu1 %v5303_v55 }
  0xa2   :  { %v192_v3 = vpop.f32.mrf.mxu0 }
  0xa3   :  { %v193_v48 = vadd.f32 %v192_v3, %v137_v26 }
  0xa8   :  { %v215_v32 = vpop.f32.mrf.mxu2 }
  0xa9   :  { %v216_v40 = vadd.f32 %v215_v32, %v138_v7 }
  0xaa   :  { %v261_v54 = vpop.f32.mrf.mxu3 }
  0xab   :  { %v275_v56 = vrot.slane %v216_v40, 6  ;;  %v195_v60 = vpop.f32.mrf.mxu0  ;;  %v262_v9 = vadd.f32 %v261_v54, %v140_v62 }
  0xac   :  { %v196_v0 = vadd.f32 %v195_v60, %v137_v26 }
  0xad   :  { %v288_v57 = vsel %vm287_vm3, %v193_v48, %v275_v56  ;;  %v294_v58 = vsel %vm283_vm2, %v193_v48, %v275_v56  ;;  %v298_v59 = vsel %vm289_vm4, %v275_v56, %v193_v48  ;;  %v277_v19 = vrot.slane %v262_v9, 2 }
  0xae   :  { %v282_v52 = vsel %vm281_vm5, %v193_v48, %v275_v56 }
  0xaf   :  { %v417_v29 = vpop.f32.mrf.mxu1 }
  0xb0   :  { %v218_v61 = vpop.f32.mrf.mxu2 }
  0xb1   :  { %v219_v63 = vadd.f32 %v218_v61, %v138_v7 }
  0xb2   :  { %v264_v1 = vpop.f32.mrf.mxu3 }
  0xb3   :  { %v278_v4 = vrot.slane %v219_v63, 6  ;;  %v265_v5 = vadd.f32 %v264_v1, %v140_v62 }
  0xb5   :  { %v302_v11 = vsel %vm281_vm5, %v196_v0, %v278_v4  ;;  %v305_v12 = vsel %vm287_vm3, %v196_v0, %v278_v4  ;;  %v309_v13 = vsel %vm283_vm2, %v196_v0, %v278_v4  ;;  %v313_v15 = vsel %vm289_vm4, %v278_v4, %v196_v0 }
  0xb6   :  { %v280_v31 = vrot.slane %v265_v5, 2 }
  0xb8   :  { %v238_v16 = vpop.f32.mrf.mxu2 }
  0xb9   :  { %v239_v18 = vadd.f32 %v238_v16, %v139_v8 }
  0xbb   :  { %v276_v20 = vrot.slane %v239_v18, 4 }
  0xbd   :  { %v290_v21 = vsel %vm289_vm4, %v277_v19, %v276_v20  ;;  %v295_v22 = vsel %vm281_vm5, %v276_v20, %v277_v19  ;;  %v299_v23 = vsel %vm287_vm3, %v276_v20, %v277_v19  ;;  %v284_v49 = vsel %vm283_vm2, %v276_v20, %v277_v19 }
  0xbe   :  { %v5415_v24 = vsel %vm291_vm7, %v288_v57, %v290_v21  ;;  %v5418_v25 = vsel %vm285_vm6, %v295_v22, %v294_v58  ;;  %v5421_v27 = vsel %vm291_vm7, %v299_v23, %v298_v59  ;;  %v286_v55 = vsel %vm285_vm6, %v282_v52, %v284_v49 }
  0xbf   :  { %7573 = vst [vmem:[#allocation18_spill] sm:$0xff] %v5421_v27 }
  0xc0   :  { %v241_v28 = vpop.f32.mrf.mxu2 }
  0xc1   :  { %v242_v30 = vadd.f32 %v241_v28, %v139_v8  ;;  %v477_v34 = vpop.f32.mrf.mxu3  ;;  %v334_v28 = vld [vmem:[%s7479_s7] sm:$0x3] }
  0xc2   :  { %v486_v44 = vrot.slane %v477_v34, 2 }
  0xc3   :  { %v279_v33 = vrot.slane %v242_v30, 4 }
  0xc5   :  { %v303_v35 = vsel %vm283_vm2, %v279_v33, %v280_v31  ;;  %v306_v36 = vsel %vm289_vm4, %v280_v31, %v279_v33  ;;  %v310_v37 = vsel %vm281_vm5, %v279_v33, %v280_v31  ;;  %v314_v38 = vsel %vm287_vm3, %v279_v33, %v280_v31 }
  0xc6   :  { %v5428_v39 = vsel %vm285_vm6, %v302_v11, %v303_v35  ;;  %v5431_v41 = vsel %vm291_vm7, %v305_v12, %v306_v36  ;;  %v5434_v42 = vsel %vm285_vm6, %v310_v37, %v309_v13  ;;  %v5437_v43 = vsel %vm291_vm7, %v314_v38, %v313_v15 }
  0xc7   :  { %7574 = vst [vmem:[#allocation19_spill] sm:$0xff] %v5428_v39  ;;  %v5653_v39 = vld [vmem:[#allocation7 + $0x38] sm:$0xff] }
  0xc8   :  { %7575 = vst [vmem:[#allocation20_spill] sm:$0xff] %v5431_v41  ;;  %v457_v45 = vpop.f32.mrf.mxu2  ;;  %v5651_v41 = vld [vmem:[#allocation7 + $0x30] sm:$0xff] }
  0xc9   :  { %7576 = vst [vmem:[#allocation21_spill] sm:$0xff] %v5434_v42  ;;  %v485_v46 = vrot.slane %v457_v45, 4 }
  0xca   :  { %7577 = vst [vmem:[#allocation22_spill] sm:$0xff] %v5437_v43  ;;  %v5647_v43 = vld [vmem:[#allocation7 + $0x28] sm:$0xff] }
  0xcb   :  { %v437_v47 = vpop.f32.mrf.mxu1  ;;  %v488_v51 = vsel %vm283_vm2, %v485_v46, %v486_v44 }
  0xcc   :  { %v484_v50 = vrot.slane %v437_v47, 6 }
  0xce   :  { %v487_v53 = vsel %vm281_vm5, %v417_v29, %v484_v50 }
  0xcf   :  { %v489_v2 = vsel %vm285_vm6, %v487_v53, %v488_v51 }
  0xd0   :  { %v491_v3 = vadd.f32 %v489_v2, %v286_v55  ;;  %v5451_v55 = vld [vmem:[#allocation7 + $0x180] sm:$0xff] }
  0xd1   :  { %862 = vmatpush.msra.mxu0 %v5451_v55 }
  0xd2   :  { %v4488_v7 = vmul.f32 -1.442695, %v491_v3  ;;  %v512_v26 = vrot.slane %v491_v3, 2  ;;  %v536_v32 = vrot.slane %v491_v3, 6  ;;  %v533_v0 = vrot.slane %v491_v3, 4  ;;  %v5454_v3 = vld [vmem:[#allocation7 + $0x160] sm:$0xff] }
  0xd3   :  { %863 = vmatpush.msra.mxu0 %v5454_v3 }
  0xd4   :  { %4556 = vpow2.f32 %v4488_v7  ;;  %v4489_v40 = vmul.f32 -1.442695, %v512_v26  ;;  %v4490_v54 = vmul.f32 -1.442695, %v536_v32  ;;  %v5456_v7 = vld [vmem:[#allocation7 + $0x140] sm:$0xff] }
  0xd5   :  { %v5459_v32 = vld [vmem:[#allocation7 + $0x120] sm:$0xff]  ;;  %864 = vmatpush.msra.mxu0 %v5456_v7 }
  0xd6   :  { %4558 = vpow2.f32 %v4489_v40 }
  0xd7   :  { %4560 = vpow2.f32 %v4490_v54  ;;  %865 = vmatpush.msra.mxu0 %v5459_v32 }
  0xda   :  { %v4557_v57 = vpop.eup %4556 }
  0xdb   :  { %v495_v58 = vadd.f32 1.0, %v4557_v57 }
  0xdc   :  { %v4559_v59 = vpop.eup %4558 }
  0xdd   :  { %v4561_v60 = vpop.eup %4560  ;;  %4562 = vrcp.f32 %v495_v58  ;;  %v517_v48 = vadd.f32 1.0, %v4559_v59  ;;  %v507_v8 = vand.u32 2147483648, %v495_v58  ;;  %v505_v13 = vand.u32 2147483647, %v495_v58  ;;  %v5462_v59 = vld [vmem:[#allocation7 + $0x100] sm:$0xff] }
  0xde   :  { %v541_v56 = vadd.f32 1.0, %v4561_v60  ;;  %vm501_vm9 = vweird.f32 %v495_v58  ;;  %866 = vmatpush.msra.mxu0 %v5462_v59 }
  0xdf   :  { %4564 = vrcp.f32 %v517_v48  ;;  %v529_v15 = vand.u32 2147483648, %v517_v48  ;;  %v527_v19 = vand.u32 2147483647, %v517_v48  ;;  %v508_v20 = vor.u32 1.1754944e-38, %v507_v8 }
  0xe0   :  { %4566 = vrcp.f32 %v541_v56  ;;  %vm506_vm12 = vcmp.eq.f32.partialorder %v505_v13, 8.507059e+37  ;;  %vm523_vm13 = vweird.f32 %v517_v48  ;;  %v553_v45 = vand.u32 2147483648, %v541_v56  ;;  %v5481_v13 = vld [vmem:[#allocation7 + $0x60] sm:$0xff] }
  0xe1   :  { %4568 = vtanh.f32 %v533_v0  ;;  %v530_v30 = vor.u32 1.1754944e-38, %v529_v15  ;;  %vm528_vm15 = vcmp.eq.f32.partialorder %v527_v19, 8.507059e+37  ;;  %v551_v46 = vand.u32 2147483647, %v541_v56  ;;  %7578 = vst [vmem:[#allocation23_spill] sm:$0xff] %v5481_v13 }
  0xe2   :  { %v554_v49 = vor.u32 1.1754944e-38, %v553_v45 }
  0xe3   :  { %v4563_v61 = vpop.eup %4562 }
  0xe4   :  { %v497_v62 = vmul.f32 %v4563_v61, %v495_v58  ;;  %vm502_vm8 = vweird.f32 %v4563_v61 }
  0xe5   :  { %v4565_v63 = vpop.eup %4564  ;;  %vm503_vm11 = vmor %vm501_vm9, %vm502_vm8  ;;  %vm547_vm9 = vweird.f32 %v541_v56 }
  0xe6   :  { %v4567_v1 = vpop.eup %4566  ;;  %v498_v4 = vsub.f32 1.0, %v497_v62  ;;  %v519_v5 = vmul.f32 %v4565_v63, %v517_v48  ;;  %vm524_vm10 = vweird.f32 %v4565_v63  ;;  %v5468_v62 = vld [vmem:[#allocation7 + $0xe0] sm:$0xff] }
  0xe7   :  { %v543_v9 = vmul.f32 %v4567_v1, %v541_v56  ;;  %vm525_vm14 = vmor %vm523_vm13, %vm524_vm10  ;;  %v4569_v33 = vpop.eup %4568  ;;  %vm548_vm8 = vweird.f32 %v4567_v1  ;;  %vm552_vm10 = vcmp.eq.f32.partialorder %v551_v46, 8.507059e+37  ;;  %v293_v56 = vrot.slane %v5415_v24, 2  ;;  %867 = vmatpush.msra.mxu0 %v5468_v62 }
  0xe8   :  { %v520_v11 = vsub.f32 1.0, %v519_v5  ;;  %v499_v12 = vmul.f32 %v4563_v61, %v498_v4 }
  0xe9   :  { %v544_v21 = vsub.f32 1.0, %v543_v9  ;;  %v5475_v9 = vld [vmem:[#allocation7 + $0xa0] sm:$0xff] }
  0xea   :  { %v500_v16 = vadd.f32 %v4563_v61, %v499_v12  ;;  %v521_v18 = vmul.f32 %v4565_v63, %v520_v11  ;;  %v5478_v12 = vld [vmem:[#allocation7 + $0x80] sm:$0xff] }
  0xeb   :  { %v545_v35 = vmul.f32 %v4567_v1, %v544_v21 }
  0xec   :  { %v504_v22 = vsel %vm503_vm11, %v4563_v61, %v500_v16  ;;  %v522_v23 = vadd.f32 %v4565_v63, %v521_v18  ;;  %vm549_vm11 = vmor %vm547_vm9, %vm548_vm8 }
  0xed   :  { %v509_v29 = vsel %vm506_vm12, %v508_v20, %v504_v22  ;;  %v546_v44 = vadd.f32 %v4567_v1, %v545_v35 }
  0xee   :  { %v526_v31 = vsel %vm525_vm14, %v4565_v63, %v522_v23  ;;  %v558_v37 = vmul.f32 %v4569_v33, %v509_v29 }
  0xef   :  { %v531_v34 = vsel %vm528_vm15, %v530_v30, %v526_v31  ;;  %v550_v47 = vsel %vm549_vm11, %v4567_v1, %v546_v44  ;;  %v5472_v1 = vld [vmem:[#allocation7 + $0xc0] sm:$0xff] }
  0xf0   :  { %v557_v36 = vmul.f32 %v531_v34, %v334_v28  ;;  %v555_v51 = vsel %vm552_vm10, %v554_v49, %v550_v47  ;;  %868 = vmatpush.msra.mxu0 %v5472_v1 }
  0xf2   :  { %v5448_v38 = vadd.f32 %v558_v37, %v557_v36  ;;  %869 = vmatpush.msra.mxu0 %v5475_v9 }
  0xf4   :  { %4570 = vtanh.f32 %v5448_v38  ;;  %870 = vmatpush.msra.mxu0 %v5478_v12 }
  0xf6   :  { %871 = vmatpush.msra.mxu0 %v5481_v13 }
  0xf8   :  { %872 = vmatpush.msra.mxu0 %v5143_v6 }
  0xfa   :  { %v4571_v50 = vpop.eup %4570  ;;  %873 = vmatpush.msra.mxu0 %v5153_v10 }
  0xfb   :  { %v561_v52 = vmul.f32 %v4571_v50, %v555_v51 }
  0xfc   :  { %874 = vmatpush.msra.mxu0 %v5165_v14 }
  0xfd   :  { %562 = vst [vmem:[#allocation2] sm:$0x3] %v561_v52  ;;  %645 = vmatmul.f32.vlgmr.msrb.gmra.mxu0 %v561_v52  ;;  %665 = vmatmul.f32.vlgmr.msra.gmra.mxu1 %v561_v52 }
  0xfe   :  { %685 = vmatmul.f32.vlgmr.msrb.gmra.mxu2 %v561_v52  ;;  %705 = vmatmul.f32.vlgmr.msra.gmra.mxu3 %v561_v52 }
 0x104   :  { %v2176_v53 = vld [vmem:[#allocation2] sm:$0x3] }
 0x105   :  { %2268 = vst [vmem:[#allocation1] ss:$4 sm:$0xff] %v2176_v53 }
 0x17a   :  { %v666_v2 = vpop.f32.mrf.mxu1  ;;  %v646_v60 = vpop.f32.mrf.mxu0 }
 0x17b   :  { %v713_v26 = vrot.slane %v666_v2, 6 }
 0x17d   :  { %v716_v48 = vsel %vm281_vm5, %v646_v60, %v713_v26 }
 0x181   :  { %v686_v40 = vpop.f32.mrf.mxu2  ;;  %v706_v54 = vpop.f32.mrf.mxu3 }
 0x182   :  { %v714_v57 = vrot.slane %v686_v40, 4  ;;  %v715_v58 = vrot.slane %v706_v54, 2 }
 0x184   :  { %v717_v61 = vsel %vm283_vm2, %v714_v57, %v715_v58 }
 0x185   :  { %v718_v63 = vsel %vm285_vm6, %v716_v48, %v717_v61 }
 0x186   :  { %v720_v0 = vadd.f32 %v718_v63, %v293_v56 }
 0x188   :  { %v4491_v4 = vmul.f32 -1.442695, %v720_v0  ;;  %v741_v5 = vrot.slane %v720_v0, 2  ;;  %v765_v8 = vrot.slane %v720_v0, 6  ;;  %v762_v29 = vrot.slane %v720_v0, 4 }
 0x18a   :  { %4572 = vpow2.f32 %v4491_v4  ;;  %v4492_v24 = vmul.f32 -1.442695, %v741_v5  ;;  %v4493_v11 = vmul.f32 -1.442695, %v765_v8  ;;  %v5492_v8 = vld [vmem:[#allocation7 + $0x1e0] sm:$0xff] }
 0x18b   :  { %1089 = vmatpush.msrb.mxu0 %v5492_v8 }
 0x18c   :  { %4574 = vpow2.f32 %v4492_v24  ;;  %v5494_v24 = vld [vmem:[#allocation7 + $0x1e8] sm:$0xff] }
 0x18d   :  { %4576 = vpow2.f32 %v4493_v11  ;;  %7579 = vst [vmem:[#allocation24_spill] sm:$0xff] %v5494_v24  ;;  %v5496_v11 = vld [vmem:[#allocation7 + $0x1f0] sm:$0xff]  ;;  %1109 = vmatpush.msra.mxu1 %v5494_v24 }
 0x18e   :  { %7580 = vst [vmem:[#allocation25_spill] sm:$0xff] %v5496_v11  ;;  %1129 = vmatpush.msrb.mxu2 %v5496_v11 }
 0x190   :  { %v4573_v15 = vpop.eup %4572 }
 0x191   :  { %v724_v16 = vadd.f32 1.0, %v4573_v15  ;;  %v5500_v15 = vld [vmem:[#allocation7 + $0x1f8] sm:$0xff] }
 0x192   :  { %v4575_v18 = vpop.eup %4574  ;;  %1149 = vmatpush.msra.mxu3 %v5500_v15 }
 0x193   :  { %v4577_v19 = vpop.eup %4576  ;;  %4578 = vrcp.f32 %v724_v16  ;;  %v746_v20 = vadd.f32 1.0, %v4575_v18  ;;  %v736_v34 = vand.u32 2147483648, %v724_v16  ;;  %v734_v37 = vand.u32 2147483647, %v724_v16  ;;  %v5506_v18 = vld [vmem:[#allocation7 + $0x1c8] sm:$0xff] }
 0x194   :  { %v770_v21 = vadd.f32 1.0, %v4577_v19  ;;  %vm730_vm13 = vweird.f32 %v724_v16  ;;  %7582 = vst [vmem:[#allocation27_spill] sm:$0xff] %v5506_v18  ;;  %v5508_v19 = vld [vmem:[#allocation7 + $0x1d0] sm:$0xff]  ;;  %1110 = vmatpush.msra.mxu1 %v5506_v18 }
 0x195   :  { %4580 = vrcp.f32 %v746_v20  ;;  %v758_v10 = vand.u32 2147483648, %v746_v20  ;;  %v756_v14 = vand.u32 2147483647, %v746_v20  ;;  %v737_v46 = vor.u32 1.1754944e-38, %v736_v34  ;;  %7583 = vst [vmem:[#allocation28_spill] sm:$0xff] %v5508_v19  ;;  %1130 = vmatpush.msrb.mxu2 %v5508_v19  ;;  %v5538_v34 = vld [vmem:[#allocation7 + $0x168] sm:$0xff] }
 0x196   :  { %4582 = vrcp.f32 %v770_v21  ;;  %vm735_vm8 = vcmp.eq.f32.partialorder %v734_v37, 8.507059e+37  ;;  %vm752_vm9 = vweird.f32 %v746_v20  ;;  %v782_v48 = vand.u32 2147483648, %v770_v21  ;;  %v5548_v37 = vld [vmem:[#allocation7 + $0x150] sm:$0xff] }
 0x197   :  { %4584 = vtanh.f32 %v762_v29  ;;  %v759_v52 = vor.u32 1.1754944e-38, %v758_v10  ;;  %vm757_vm10 = vcmp.eq.f32.partialorder %v756_v14, 8.507059e+37  ;;  %v780_v56 = vand.u32 2147483647, %v770_v21  ;;  %v5528_v29 = vld [vmem:[#allocation7 + $0x188] sm:$0xff]  ;;  %v5550_v10 = vld [vmem:[#allocation7 + $0x158] sm:$0xff] }
 0x198   :  { %v783_v63 = vor.u32 1.1754944e-38, %v782_v48  ;;  %v5558_v14 = vld [vmem:[#allocation7 + $0x130] sm:$0xff] }
 0x199   :  { %v4579_v22 = vpop.eup %4578  ;;  %v5581_v48 = vld [vmem:[#allocation7 + $0xf0] sm:$0xff] }
 0x19a   :  { %v726_v23 = vmul.f32 %v4579_v22, %v724_v16  ;;  %vm731_vm12 = vweird.f32 %v4579_v22  ;;  %v5504_v16 = vld [vmem:[#allocation7 + $0x1c0] sm:$0xff] }
 0x19b   :  { %v4581_v28 = vpop.eup %4580  ;;  %vm732_vm15 = vmor %vm730_vm13, %vm731_vm12  ;;  %vm776_vm13 = vweird.f32 %v770_v21  ;;  %7581 = vst [vmem:[#allocation26_spill] sm:$0xff] %v5504_v16  ;;  %1090 = vmatpush.msrb.mxu0 %v5504_v16 }
 0x19c   :  { %v4583_v30 = vpop.eup %4582  ;;  %v727_v31 = vsub.f32 1.0, %v726_v23  ;;  %v748_v33 = vmul.f32 %v4581_v28, %v746_v20  ;;  %vm753_vm14 = vweird.f32 %v4581_v28  ;;  %v5512_v20 = vld [vmem:[#allocation7 + $0x1d8] sm:$0xff]  ;;  %v5520_v23 = vld [vmem:[#allocation7 + $0x1b0] sm:$0xff] }
 0x19d   :  { %v772_v6 = vmul.f32 %v4583_v30, %v770_v21  ;;  %vm754_vm11 = vmor %vm752_vm9, %vm753_vm14  ;;  %v4585_v2 = vpop.eup %4584  ;;  %vm777_vm12 = vweird.f32 %v4583_v30  ;;  %vm781_vm14 = vcmp.eq.f32.partialorder %v780_v56, 8.507059e+37  ;;  %1150 = vmatpush.msra.mxu3 %v5512_v20  ;;  %v5516_v21 = vld [vmem:[#allocation7 + $0x1a0] sm:$0xff]  ;;  %1131 = vmatpush.msrb.mxu2 %v5520_v23  ;;  %v5583_v56 = vld [vmem:[#allocation7 + $0xf8] sm:$0xff] }
 0x19e   :  { %v749_v35 = vsub.f32 1.0, %v748_v33  ;;  %v728_v36 = vmul.f32 %v4579_v22, %v727_v31  ;;  %7584 = vst [vmem:[#allocation29_spill] sm:$0xff] %v5516_v21  ;;  %1091 = vmatpush.msrb.mxu0 %v5516_v21  ;;  %v5532_v31 = vld [vmem:[#allocation7 + $0x198] sm:$0xff] }
 0x19f   :  { %v773_v47 = vsub.f32 1.0, %v772_v6  ;;  %7588 = vst [vmem:[#allocation33_spill] sm:$0xff] %v5532_v31  ;;  %v5540_v6 = vld [vmem:[#allocation7 + $0x170] sm:$0xff] }
 0x1a0   :  { %v729_v44 = vadd.f32 %v4579_v22, %v728_v36  ;;  %v750_v45 = vmul.f32 %v4581_v28, %v749_v35  ;;  %1092 = vmatpush.msrb.mxu0 %v5451_v55  ;;  %v5542_v35 = vld [vmem:[#allocation7 + $0x178] sm:$0xff]  ;;  %v5546_v36 = vld [vmem:[#allocation7 + $0x148] sm:$0xff] }
 0x1a1   :  { %v774_v40 = vmul.f32 %v4583_v30, %v773_v47 }
 0x1a2   :  { %v733_v49 = vsel %vm732_vm15, %v4579_v22, %v729_v44  ;;  %v751_v50 = vadd.f32 %v4581_v28, %v750_v45  ;;  %vm778_vm15 = vmor %vm776_vm13, %vm777_vm12  ;;  %v5518_v22 = vld [vmem:[#allocation7 + $0x1a8] sm:$0xff]  ;;  %1093 = vmatpush.msrb.mxu0 %v5454_v3 }
 0x1a3   :  { %v738_v51 = vsel %vm735_vm8, %v737_v46, %v733_v49  ;;  %v775_v60 = vadd.f32 %v4583_v30, %v774_v40  ;;  %7585 = vst [vmem:[#allocation30_spill] sm:$0xff] %v5518_v22  ;;  %1111 = vmatpush.msra.mxu1 %v5518_v22  ;;  %v5554_v44 = vld [vmem:[#allocation7 + $0x128] sm:$0xff]  ;;  %v5560_v46 = vld [vmem:[#allocation7 + $0x138] sm:$0xff] }
 0x1a4   :  { %v755_v53 = vsel %vm754_vm11, %v4581_v28, %v751_v50  ;;  %v787_v57 = vmul.f32 %v4585_v2, %v738_v51  ;;  %v5524_v28 = vld [vmem:[#allocation7 + $0x1b8] sm:$0xff]  ;;  %1094 = vmatpush.msrb.mxu0 %v5456_v7  ;;  %v5564_v50 = vld [vmem:[#allocation7 + $0x108] sm:$0xff] }
 0x1a5   :  { %v760_v26 = vsel %vm757_vm10, %v759_v52, %v755_v53  ;;  %v779_v61 = vsel %vm778_vm15, %v4583_v30, %v775_v60  ;;  %7586 = vst [vmem:[#allocation31_spill] sm:$0xff] %v5524_v28  ;;  %1151 = vmatpush.msra.mxu3 %v5524_v28  ;;  %v5530_v30 = vld [vmem:[#allocation7 + $0x190] sm:$0xff]  ;;  %1112 = vmatpush.msra.mxu1 %v5528_v29  ;;  %v5570_v2 = vld [vmem:[#allocation7 + $0x118] sm:$0xff]  ;;  %v5574_v40 = vld [vmem:[#allocation7 + $0xe8] sm:$0xff] }
 0x1a6   :  { %v786_v54 = vmul.f32 %v760_v26, %v5448_v38  ;;  %v784_v4 = vsel %vm781_vm14, %v783_v63, %v779_v61  ;;  %7587 = vst [vmem:[#allocation32_spill] sm:$0xff] %v5530_v30  ;;  %1132 = vmatpush.msrb.mxu2 %v5530_v30  ;;  %1095 = vmatpush.msrb.mxu0 %v5459_v32  ;;  %v5568_v53 = vld [vmem:[#allocation7 + $0x110] sm:$0xff]  ;;  %v5588_v63 = vld [vmem:[#allocation7 + $0xc8] sm:$0xff] }
 0x1a7   :  { %1152 = vmatpush.msra.mxu3 %v5532_v31  ;;  %1113 = vmatpush.msra.mxu1 %v5538_v34 }
 0x1a8   :  { %v5489_v58 = vadd.f32 %v787_v57, %v786_v54  ;;  %1133 = vmatpush.msrb.mxu2 %v5540_v6  ;;  %v297_v57 = vrot.slane %v5418_v25, 4  ;;  %1096 = vmatpush.msrb.mxu0 %v5462_v59  ;;  %v5594_v25 = vld [vmem:[#allocation7 + $0xd0] sm:$0xff] }
 0x1a9   :  { %1153 = vmatpush.msra.mxu3 %v5542_v35  ;;  %1114 = vmatpush.msra.mxu1 %v5546_v36 }
 0x1aa   :  { %4586 = vtanh.f32 %v5489_v58  ;;  %1134 = vmatpush.msrb.mxu2 %v5548_v37  ;;  %1097 = vmatpush.msrb.mxu0 %v5468_v62 }
 0x1ab   :  { %1154 = vmatpush.msra.mxu3 %v5550_v10  ;;  %1115 = vmatpush.msra.mxu1 %v5554_v44 }
 0x1ac   :  { %1135 = vmatpush.msrb.mxu2 %v5558_v14  ;;  %1098 = vmatpush.msrb.mxu0 %v5472_v1 }
 0x1ad   :  { %1155 = vmatpush.msra.mxu3 %v5560_v46  ;;  %1116 = vmatpush.msra.mxu1 %v5564_v50 }
 0x1ae   :  { %1136 = vmatpush.msrb.mxu2 %v5568_v53  ;;  %1099 = vmatpush.msrb.mxu0 %v5475_v9 }
 0x1af   :  { %1156 = vmatpush.msra.mxu3 %v5570_v2  ;;  %1117 = vmatpush.msra.mxu1 %v5574_v40 }
 0x1b0   :  { %v4587_v0 = vpop.eup %4586  ;;  %1137 = vmatpush.msrb.mxu2 %v5581_v48  ;;  %1100 = vmatpush.msrb.mxu0 %v5478_v12 }
 0x1b1   :  { %v790_v5 = vmul.f32 %v4587_v0, %v784_v4  ;;  %v5596_v4 = vld [vmem:[#allocation7 + $0xd8] sm:$0xff]  ;;  %1157 = vmatpush.msra.mxu3 %v5583_v56  ;;  %1118 = vmatpush.msra.mxu1 %v5588_v63 }
 0x1b2   :  { %1138 = vmatpush.msrb.mxu2 %v5594_v25  ;;  %1101 = vmatpush.msrb.mxu0 %v5481_v13 }
 0x1b3   :  { %792 = vst [vmem:[#allocation2 + $0x2] sm:$0x3] %v790_v5  ;;  %875 = vmatmul.f32.vlgmr.msra.gmra.mxu0 %v790_v5  ;;  %895 = vmatmul.f32.vlgmr.msrb.gmra.mxu1 %v790_v5 }
 0x1b4   :  { %915 = vmatmul.f32.vlgmr.msra.gmra.mxu2 %v790_v5  ;;  %935 = vmatmul.f32.vlgmr.msrb.gmra.mxu3 %v790_v5  ;;  %v5600_v5 = vld [vmem:[#allocation7 + $0xa8] sm:$0xff] }
 0x1b5   :  { %1158 = vmatpush.msra.mxu3 %v5596_v4  ;;  %1119 = vmatpush.msra.mxu1 %v5600_v5 }
 0x1ba   :  { %v2177_v38 = vld [vmem:[#allocation2 + $0x2] sm:$0x3] }
 0x1bb   :  { %2270 = vst [vmem:[#allocation1 + $0x1] ss:$4 sm:$0xff] %v2177_v38 }
 0x230   :  { %v896_v33 = vpop.f32.mrf.mxu1  ;;  %v876_v26 = vpop.f32.mrf.mxu0 }
 0x231   :  { %v943_v45 = vrot.slane %v896_v33, 6 }
 0x233   :  { %v946_v54 = vsel %vm281_vm5, %v876_v26, %v943_v45 }
 0x237   :  { %v916_v47 = vpop.f32.mrf.mxu2  ;;  %v936_v49 = vpop.f32.mrf.mxu3 }
 0x238   :  { %v944_v51 = vrot.slane %v916_v47, 4  ;;  %v945_v52 = vrot.slane %v936_v49, 2  ;;  %v5607_v47 = vld [vmem:[#allocation7 + $0xb0] sm:$0xff]  ;;  %v5609_v49 = vld [vmem:[#allocation7 + $0xb8] sm:$0xff] }
 0x239   :  { %1139 = vmatpush.msrb.mxu2 %v5607_v47  ;;  %1159 = vmatpush.msra.mxu3 %v5609_v49 }
 0x23a   :  { %v947_v60 = vsel %vm283_vm2, %v944_v51, %v945_v52  ;;  %v5613_v51 = vld [vmem:[#allocation7 + $0x88] sm:$0xff] }
 0x23b   :  { %v948_v61 = vsel %vm285_vm6, %v946_v54, %v947_v60  ;;  %v5617_v54 = vld [vmem:[#allocation7 + $0x90] sm:$0xff]  ;;  %v5623_v60 = vld [vmem:[#allocation7 + $0x68] sm:$0xff]  ;;  %1120 = vmatpush.msra.mxu1 %v5613_v51 }
 0x23c   :  { %v5590_v0 = vadd.f32 %v948_v61, %v297_v57  ;;  %v5619_v57 = vld [vmem:[#allocation7 + $0x98] sm:$0xff]  ;;  %7589 = vst [vmem:[#allocation34_spill] sm:$0xff] %v5623_v60  ;;  %v5627_v61 = vld [vmem:[#allocation7 + $0x70] sm:$0xff]  ;;  %1140 = vmatpush.msrb.mxu2 %v5617_v54 }
 0x23d   :  { %7590 = vst [vmem:[#allocation35_spill] sm:$0xff] %v5627_v61  ;;  %1160 = vmatpush.msra.mxu3 %v5619_v57  ;;  %1121 = vmatpush.msra.mxu1 %v5623_v60 }
 0x23e   :  { %v4494_v38 = vmul.f32 -1.442695, %v5590_v0  ;;  %v971_v33 = vrot.slane %v5590_v0, 2  ;;  %v995_v45 = vrot.slane %v5590_v0, 6  ;;  %1141 = vmatpush.msrb.mxu2 %v5627_v61  ;;  %v5661_v61 = vld [vmem:[#allocation7 + $0x8] sm:$0xff] }
 0x240   :  { %4588 = vpow2.f32 %v4494_v38  ;;  %v4495_v52 = vmul.f32 -1.442695, %v971_v33  ;;  %v4496_v26 = vmul.f32 -1.442695, %v995_v45  ;;  %v5629_v38 = vld [vmem:[#allocation7 + $0x78] sm:$0xff]  ;;  %v5633_v33 = vld [vmem:[#allocation7 + $0x40] sm:$0xff] }
 0x241   :  { %7591 = vst [vmem:[#allocation36_spill] sm:$0xff] %v5629_v38  ;;  %v5635_v45 = vld [vmem:[#allocation7 + $0x48] sm:$0xff]  ;;  %1161 = vmatpush.msra.mxu3 %v5629_v38  ;;  %1102 = vmatpush.msrb.mxu0 %v5633_v33  ;;  %v5659_v38 = vld [vmem:[#allocation7] sm:$0xff] }
 0x242   :  { %4590 = vpow2.f32 %v4495_v52  ;;  %7592 = vst [vmem:[#allocation37_spill] sm:$0xff] %v5633_v33  ;;  %v5639_v52 = vld [vmem:[#allocation7 + $0x50] sm:$0xff]  ;;  %1122 = vmatpush.msra.mxu1 %v5635_v45  ;;  %v5667_v33 = vld [vmem:[#allocation7 + $0x18] sm:$0xff] }
 0x243   :  { %4592 = vpow2.f32 %v4496_v26  ;;  %7593 = vst [vmem:[#allocation38_spill] sm:$0xff] %v5635_v45  ;;  %v5645_v26 = vld [vmem:[#allocation7 + $0x20] sm:$0xff]  ;;  %1142 = vmatpush.msrb.mxu2 %v5639_v52  ;;  %1162 = vmatpush.msra.mxu3 %v5641_v17  ;;  %v5665_v45 = vld [vmem:[#allocation7 + $0x10] sm:$0xff] }
 0x244   :  { %1103 = vmatpush.msrb.mxu0 %v5645_v26  ;;  %1123 = vmatpush.msra.mxu1 %v5647_v43 }
 0x245   :  { %1143 = vmatpush.msrb.mxu2 %v5651_v41  ;;  %1163 = vmatpush.msra.mxu3 %v5653_v39 }
 0x246   :  { %v4589_v42 = vpop.eup %4588  ;;  %1104 = vmatpush.msrb.mxu0 %v5659_v38  ;;  %1124 = vmatpush.msra.mxu1 %v5661_v61 }
 0x247   :  { %v5655_v27 = vadd.f32 1.0, %v4589_v42  ;;  %1144 = vmatpush.msrb.mxu2 %v5665_v45  ;;  %1164 = vmatpush.msra.mxu3 %v5667_v33 }
 0x248   :  { %v4591_v60 = vpop.eup %4590  ;;  %1319 = vmatpush.msra.mxu0 %v5492_v8  ;;  %1339 = vmatpush.msrb.mxu1 %v5494_v24 }
 0x249   :  { %v4593_v13 = vpop.eup %4592  ;;  %4594 = vrcp.f32 %v5655_v27  ;;  %v5670_v42 = vadd.f32 1.0, %v4591_v60  ;;  %1359 = vmatpush.msra.mxu2 %v5496_v11  ;;  %1379 = vmatpush.msrb.mxu3 %v5500_v15  ;;  %v992_v11 = vrot.slane %v5590_v0, 4  ;;  %vm960_vm9 = vweird.f32 %v5655_v27 }
 0x24a   :  { %v5674_v17 = vadd.f32 1.0, %v4593_v13  ;;  %1320 = vmatpush.msra.mxu0 %v5504_v16  ;;  %1340 = vmatpush.msrb.mxu1 %v5506_v18 }
 0x24b   :  { %4596 = vrcp.f32 %v5670_v42  ;;  %1360 = vmatpush.msra.mxu2 %v5508_v19  ;;  %1380 = vmatpush.msrb.mxu3 %v5512_v20  ;;  %vm982_vm13 = vweird.f32 %v5670_v42 }
 0x24c   :  { %4598 = vrcp.f32 %v5674_v17  ;;  %1321 = vmatpush.msra.mxu0 %v5516_v21  ;;  %1341 = vmatpush.msrb.mxu1 %v5518_v22  ;;  %v966_v21 = vand.u32 2147483648, %v5655_v27 }
 0x24d   :  { %1361 = vmatpush.msra.mxu2 %v5520_v23  ;;  %1381 = vmatpush.msrb.mxu3 %v5524_v28  ;;  %4600 = vtanh.f32 %v992_v11 }
 0x24e   :  { %1322 = vmatpush.msra.mxu0 %v5451_v55  ;;  %1342 = vmatpush.msrb.mxu1 %v5528_v29  ;;  %v988_v55 = vand.u32 2147483648, %v5670_v42 }
 0x24f   :  { %v4595_v13 = vpop.eup %4594  ;;  %1362 = vmatpush.msra.mxu2 %v5530_v30  ;;  %1382 = vmatpush.msrb.mxu3 %v5532_v31 }
 0x250   :  { %v956_v60 = vmul.f32 %v4595_v13, %v5655_v27  ;;  %vm961_vm8 = vweird.f32 %v4595_v13  ;;  %1323 = vmatpush.msra.mxu0 %v5454_v3  ;;  %1343 = vmatpush.msrb.mxu1 %v5538_v34  ;;  %v967_v3 = vor.u32 1.1754944e-38, %v966_v21 }
 0x251   :  { %v4597_v24 = vpop.eup %4596  ;;  %1363 = vmatpush.msra.mxu2 %v5540_v6  ;;  %1383 = vmatpush.msrb.mxu3 %v5542_v35  ;;  %vm962_vm10 = vmor %vm960_vm9, %vm961_vm8  ;;  %vm1006_vm9 = vweird.f32 %v5674_v17 }
 0x252   :  { %v5696_v16 = vpop.eup %4598  ;;  %v957_v18 = vsub.f32 1.0, %v956_v60  ;;  %v978_v19 = vmul.f32 %v4597_v24, %v5670_v42  ;;  %v964_v60 = vand.u32 2147483647, %v5655_v27  ;;  %vm983_vm11 = vweird.f32 %v4597_v24  ;;  %1324 = vmatpush.msra.mxu0 %v5456_v7  ;;  %1344 = vmatpush.msrb.mxu1 %v5546_v36 }
 0x253   :  { %v1002_v22 = vmul.f32 %v5696_v16, %v5674_v17  ;;  %1364 = vmatpush.msra.mxu2 %v5548_v37  ;;  %1384 = vmatpush.msrb.mxu3 %v5550_v10  ;;  %vm984_vm15 = vmor %vm982_vm13, %vm983_vm11  ;;  %vm1007_vm8 = vweird.f32 %v5696_v16 }
 0x254   :  { %v979_v0 = vsub.f32 1.0, %v978_v19  ;;  %v958_v28 = vmul.f32 %v4595_v13, %v957_v18  ;;  %v986_v18 = vand.u32 2147483647, %v5670_v42  ;;  %vm965_vm12 = vcmp.eq.f32.partialorder %v964_v60, 8.507059e+37  ;;  %1325 = vmatpush.msra.mxu0 %v5459_v32  ;;  %1345 = vmatpush.msrb.mxu1 %v5554_v44  ;;  %vm1008_vm11 = vmor %vm1006_vm9, %vm1007_vm8  ;;  %v7598_v60 = vld [vmem:[#allocation36_spill] sm:$0xff] }
 0x255   :  { %v1003_v11 = vsub.f32 1.0, %v1002_v22  ;;  %1365 = vmatpush.msra.mxu2 %v5558_v14  ;;  %1385 = vmatpush.msrb.mxu3 %v5560_v46  ;;  %v4601_v22 = vpop.eup %4600 }
 0x256   :  { %v959_v30 = vadd.f32 %v4595_v13, %v958_v28  ;;  %v980_v31 = vmul.f32 %v4597_v24, %v979_v0  ;;  %v989_v28 = vor.u32 1.1754944e-38, %v988_v55  ;;  %vm987_vm14 = vcmp.eq.f32.partialorder %v986_v18, 8.507059e+37  ;;  %1326 = vmatpush.msra.mxu0 %v5462_v59  ;;  %1346 = vmatpush.msrb.mxu1 %v5564_v50  ;;  %v7596_v0 = vld [vmem:[#allocation34_spill] sm:$0xff]  ;;  %v7599_v18 = vld [vmem:[#allocation37_spill] sm:$0xff] }
 0x257   :  { %v1004_v32 = vmul.f32 %v5696_v16, %v1003_v11  ;;  %1366 = vmatpush.msra.mxu2 %v5568_v53  ;;  %1386 = vmatpush.msrb.mxu3 %v5570_v2  ;;  %v7601_v11 = vld [vmem:[#allocation39_spill] sm:$0xff] }
 0x258   :  { %v963_v27 = vsel %vm962_vm10, %v4595_v13, %v959_v30  ;;  %v981_v19 = vadd.f32 %v4597_v24, %v980_v31  ;;  %1327 = vmatpush.msra.mxu0 %v5468_v62  ;;  %1347 = vmatpush.msrb.mxu1 %v5574_v40  ;;  %v1012_v62 = vand.u32 2147483648, %v5674_v17  ;;  %v7595_v13 = vld [vmem:[#allocation23_spill] sm:$0xff] }
 0x259   :  { %v968_v7 = vsel %vm965_vm12, %v967_v3, %v963_v27  ;;  %1367 = vmatpush.msra.mxu2 %v5581_v48  ;;  %1387 = vmatpush.msrb.mxu3 %v5583_v56  ;;  %v7600_v3 = vld [vmem:[#allocation38_spill] sm:$0xff]  ;;  %v7602_v27 = vld [vmem:[#allocation24_spill] sm:$0xff] }
 0x25a   :  { %v985_v21 = vsel %vm984_vm15, %v4597_v24, %v981_v19  ;;  %v1017_v42 = vmul.f32 %v4601_v22, %v968_v7  ;;  %1328 = vmatpush.msra.mxu0 %v5472_v1  ;;  %1348 = vmatpush.msrb.mxu1 %v5588_v63  ;;  %v1005_v24 = vadd.f32 %v5696_v16, %v1004_v32  ;;  %v1010_v1 = vand.u32 2147483647, %v5674_v17  ;;  %v7597_v17 = vld [vmem:[#allocation35_spill] sm:$0xff]  ;;  %v7603_v19 = vld [vmem:[#allocation25_spill] sm:$0xff]  ;;  %v7606_v22 = vld [vmem:[#allocation28_spill] sm:$0xff] }
 0x25b   :  { %v990_v30 = vsel %vm987_vm14, %v989_v28, %v985_v21  ;;  %1368 = vmatpush.msra.mxu2 %v5594_v25  ;;  %1388 = vmatpush.msrb.mxu3 %v5596_v4  ;;  %v7604_v28 = vld [vmem:[#allocation26_spill] sm:$0xff]  ;;  %v7605_v21 = vld [vmem:[#allocation27_spill] sm:$0xff] }
 0x25c   :  { %v1016_v31 = vmul.f32 %v990_v30, %v5489_v58  ;;  %1329 = vmatpush.msra.mxu0 %v5475_v9  ;;  %1349 = vmatpush.msrb.mxu1 %v5600_v5  ;;  %v1009_v58 = vsel %vm1008_vm11, %v5696_v16, %v1005_v24  ;;  %v1013_v9 = vor.u32 1.1754944e-38, %v1012_v62  ;;  %vm1011_vm10 = vcmp.eq.f32.partialorder %v1010_v1, 8.507059e+37  ;;  %v7607_v30 = vld [vmem:[#allocation29_spill] sm:$0xff]  ;;  %v7608_v32 = vld [vmem:[#allocation30_spill] sm:$0xff] }
 0x25d   :  { %1369 = vmatpush.msra.mxu2 %v5607_v47  ;;  %1389 = vmatpush.msrb.mxu3 %v5609_v49 }
 0x25e   :  { %v5735_v59 = vadd.f32 %v1017_v42, %v1016_v31  ;;  %1330 = vmatpush.msra.mxu0 %v5478_v12  ;;  %1350 = vmatpush.msrb.mxu1 %v5613_v51  ;;  %v1014_v12 = vsel %vm1011_vm10, %v1013_v9, %v1009_v58  ;;  %v7611_v31 = vld [vmem:[#allocation33_spill] sm:$0xff] }
 0x25f   :  { %1370 = vmatpush.msra.mxu2 %v5617_v54  ;;  %1390 = vmatpush.msrb.mxu3 %v5619_v57 }
 0x260   :  { %4602 = vtanh.f32 %v5735_v59  ;;  %1331 = vmatpush.msra.mxu0 %v7595_v13  ;;  %1351 = vmatpush.msrb.mxu1 %v7596_v0 }
 0x261   :  { %1371 = vmatpush.msra.mxu2 %v7597_v17  ;;  %1391 = vmatpush.msrb.mxu3 %v7598_v60 }
 0x262   :  { %1332 = vmatpush.msra.mxu0 %v7599_v18  ;;  %1352 = vmatpush.msrb.mxu1 %v7600_v3 }
 0x263   :  { %1372 = vmatpush.msra.mxu2 %v5639_v52  ;;  %1392 = vmatpush.msrb.mxu3 %v7601_v11 }
 0x264   :  { %1333 = vmatpush.msra.mxu0 %v5645_v26  ;;  %1353 = vmatpush.msrb.mxu1 %v5647_v43 }
 0x265   :  { %1373 = vmatpush.msra.mxu2 %v5651_v41  ;;  %1393 = vmatpush.msrb.mxu3 %v5653_v39 }
 0x266   :  { %v4603_v55 = vpop.eup %4602  ;;  %1334 = vmatpush.msra.mxu0 %v5659_v38  ;;  %1354 = vmatpush.msrb.mxu1 %v5661_v61 }
 0x267   :  { %v1020_v16 = vmul.f32 %v4603_v55, %v1014_v12  ;;  %1374 = vmatpush.msra.mxu2 %v5665_v45  ;;  %1394 = vmatpush.msrb.mxu3 %v5667_v33 }
 0x269   :  { %1022 = vst [vmem:[#allocation2 + $0x4] sm:$0x3] %v1020_v16  ;;  %1105 = vmatmul.f32.vlgmr.msrb.gmra.mxu0 %v1020_v16  ;;  %1125 = vmatmul.f32.vlgmr.msra.gmra.mxu1 %v1020_v16 }
 0x26a   :  { %1145 = vmatmul.f32.vlgmr.msrb.gmra.mxu2 %v1020_v16  ;;  %1165 = vmatmul.f32.vlgmr.msra.gmra.mxu3 %v1020_v16 }
 0x26b   :  { %1549 = vmatpush.msrb.mxu0 %v5492_v8  ;;  %1569 = vmatpush.msra.mxu1 %v7602_v27  ;;  %v7609_v8 = vld [vmem:[#allocation31_spill] sm:$0xff] }
 0x26c   :  { %1589 = vmatpush.msrb.mxu2 %v7603_v19  ;;  %1609 = vmatpush.msra.mxu3 %v5500_v15  ;;  %v7610_v15 = vld [vmem:[#allocation32_spill] sm:$0xff] }
 0x26d   :  { %1550 = vmatpush.msrb.mxu0 %v7604_v28  ;;  %1570 = vmatpush.msra.mxu1 %v7605_v21 }
 0x26e   :  { %1590 = vmatpush.msrb.mxu2 %v7606_v22  ;;  %1610 = vmatpush.msra.mxu3 %v5512_v20 }
 0x26f   :  { %1551 = vmatpush.msrb.mxu0 %v7607_v30  ;;  %1571 = vmatpush.msra.mxu1 %v7608_v32 }
 0x270   :  { %v2178_v7 = vld [vmem:[#allocation2 + $0x4] sm:$0x3]  ;;  %1591 = vmatpush.msrb.mxu2 %v5520_v23  ;;  %1611 = vmatpush.msra.mxu3 %v7609_v8 }
 0x271   :  { %2272 = vst [vmem:[#allocation1 + $0x2] ss:$4 sm:$0xff] %v2178_v7  ;;  %1572 = vmatpush.msra.mxu1 %v5528_v29 }
 0x272   :  { %1592 = vmatpush.msrb.mxu2 %v7610_v15  ;;  %1612 = vmatpush.msra.mxu3 %v7611_v31 }
 0x273   :  { %1573 = vmatpush.msra.mxu1 %v5538_v34 }
 0x274   :  { %1593 = vmatpush.msrb.mxu2 %v5540_v6  ;;  %1613 = vmatpush.msra.mxu3 %v5542_v35 }
 0x275   :  { %1574 = vmatpush.msra.mxu1 %v5546_v36 }
 0x276   :  { %1594 = vmatpush.msrb.mxu2 %v5548_v37  ;;  %1614 = vmatpush.msra.mxu3 %v5550_v10 }
 0x277   :  { %1575 = vmatpush.msra.mxu1 %v5554_v44 }
 0x278   :  { %1595 = vmatpush.msrb.mxu2 %v5558_v14  ;;  %1615 = vmatpush.msra.mxu3 %v5560_v46 }
 0x279   :  { %1576 = vmatpush.msra.mxu1 %v5564_v50 }
 0x27a   :  { %1596 = vmatpush.msrb.mxu2 %v5568_v53  ;;  %1616 = vmatpush.msra.mxu3 %v5570_v2 }
 0x27b   :  { %1577 = vmatpush.msra.mxu1 %v5574_v40 }
 0x27c   :  { %1597 = vmatpush.msrb.mxu2 %v5581_v48  ;;  %1617 = vmatpush.msra.mxu3 %v5583_v56 }
 0x27d   :  { %1578 = vmatpush.msra.mxu1 %v5588_v63 }
 0x27e   :  { %1598 = vmatpush.msrb.mxu2 %v5594_v25  ;;  %1618 = vmatpush.msra.mxu3 %v5596_v4 }
 0x27f   :  { %1579 = vmatpush.msra.mxu1 %v5600_v5 }
 0x280   :  { %1599 = vmatpush.msrb.mxu2 %v5607_v47  ;;  %1619 = vmatpush.msra.mxu3 %v5609_v49 }
 0x281   :  { %1580 = vmatpush.msra.mxu1 %v5613_v51 }
 0x282   :  { %1600 = vmatpush.msrb.mxu2 %v5617_v54  ;;  %1620 = vmatpush.msra.mxu3 %v5619_v57 }
 0x283   :  { %1581 = vmatpush.msra.mxu1 %v7596_v0 }
 0x284   :  { %1601 = vmatpush.msrb.mxu2 %v7597_v17  ;;  %1621 = vmatpush.msra.mxu3 %v7598_v60 }
 0x285   :  { %1582 = vmatpush.msra.mxu1 %v7600_v3 }
 0x286   :  { %1602 = vmatpush.msrb.mxu2 %v5639_v52  ;;  %1622 = vmatpush.msra.mxu3 %v7601_v11 }
 0x287   :  { %1583 = vmatpush.msra.mxu1 %v5647_v43  ;;  %v7612_v43 = vld [vmem:[#allocation18_spill] sm:$0xff] }
 0x288   :  { %1603 = vmatpush.msrb.mxu2 %v5651_v41  ;;  %1623 = vmatpush.msra.mxu3 %v5653_v39  ;;  %v301_v10 = vrot.slane %v7612_v43, 6 }
 0x289   :  { %1584 = vmatpush.msra.mxu1 %v5661_v61 }
 0x28a   :  { %1604 = vmatpush.msrb.mxu2 %v5665_v45  ;;  %1624 = vmatpush.msra.mxu3 %v5667_v33 }
 0x2e6   :  { %v1126_v20 = vpop.f32.mrf.mxu1  ;;  %v1106_v36 = vpop.f32.mrf.mxu0 }
 0x2e7   :  { %v1173_v23 = vrot.slane %v1126_v20, 6 }
 0x2e9   :  { %v1176_v37 = vsel %vm281_vm5, %v1106_v36, %v1173_v23  ;;  %v5831_v23 = vld [vmem:[#allocation7 + $0x180] sm:$0xff] }
 0x2ea   :  { %1552 = vmatpush.msrb.mxu0 %v5831_v23 }
 0x2ed   :  { %v1146_v29 = vpop.f32.mrf.mxu2  ;;  %v1166_v34 = vpop.f32.mrf.mxu3 }
 0x2ee   :  { %v1174_v6 = vrot.slane %v1146_v29, 4  ;;  %v1175_v35 = vrot.slane %v1166_v34, 2  ;;  %v5834_v29 = vld [vmem:[#allocation7 + $0x160] sm:$0xff] }
 0x2ef   :  { %1553 = vmatpush.msrb.mxu0 %v5834_v29 }
 0x2f0   :  { %v1177_v41 = vsel %vm283_vm2, %v1174_v6, %v1175_v35  ;;  %v5837_v6 = vld [vmem:[#allocation7 + $0x140] sm:$0xff] }
 0x2f1   :  { %v1178_v39 = vsel %vm285_vm6, %v1176_v37, %v1177_v41  ;;  %v5839_v35 = vld [vmem:[#allocation7 + $0x120] sm:$0xff]  ;;  %1554 = vmatpush.msrb.mxu0 %v5837_v6 }
 0x2f2   :  { %v1180_v44 = vadd.f32 %v1178_v39, %v301_v10  ;;  %v5842_v37 = vld [vmem:[#allocation7 + $0x100] sm:$0xff] }
 0x2f3   :  { %1555 = vmatpush.msrb.mxu0 %v5839_v35 }
 0x2f4   :  { %v4497_v14 = vmul.f32 -1.442695, %v1180_v44  ;;  %v1201_v46 = vrot.slane %v1180_v44, 2  ;;  %v1225_v50 = vrot.slane %v1180_v44, 6  ;;  %v1222_v51 = vrot.slane %v1180_v44, 4  ;;  %v5845_v44 = vld [vmem:[#allocation7 + $0xe0] sm:$0xff] }
 0x2f5   :  { %1556 = vmatpush.msrb.mxu0 %v5842_v37 }
 0x2f6   :  { %4604 = vpow2.f32 %v4497_v14  ;;  %v4498_v53 = vmul.f32 -1.442695, %v1201_v46  ;;  %v4499_v2 = vmul.f32 -1.442695, %v1225_v50 }
 0x2f7   :  { %1557 = vmatpush.msrb.mxu0 %v5845_v44 }
 0x2f8   :  { %4606 = vpow2.f32 %v4498_v53  ;;  %v5850_v53 = vld [vmem:[#allocation7 + $0xc0] sm:$0xff] }
 0x2f9   :  { %4608 = vpow2.f32 %v4499_v2  ;;  %1558 = vmatpush.msrb.mxu0 %v5850_v53 }
 0x2fc   :  { %v4605_v40 = vpop.eup %4604 }
 0x2fd   :  { %v1184_v48 = vadd.f32 1.0, %v4605_v40  ;;  %v7613_v40 = vld [vmem:[#allocation19_spill] sm:$0xff] }
 0x2fe   :  { %v4607_v56 = vpop.eup %4606 }
 0x2ff   :  { %v4609_v63 = vpop.eup %4608  ;;  %4610 = vrcp.f32 %v1184_v48  ;;  %v1206_v25 = vadd.f32 1.0, %v4607_v56  ;;  %v1196_v33 = vand.u32 2147483648, %v1184_v48  ;;  %v1194_v24 = vand.u32 2147483647, %v1184_v48  ;;  %v5855_v56 = vld [vmem:[#allocation7 + $0xa0] sm:$0xff] }
 0x300   :  { %v1230_v4 = vadd.f32 1.0, %v4609_v63  ;;  %vm1190_vm13 = vweird.f32 %v1184_v48  ;;  %1559 = vmatpush.msrb.mxu0 %v5855_v56 }
 0x301   :  { %4612 = vrcp.f32 %v1206_v25  ;;  %v1218_v62 = vand.u32 2147483648, %v1206_v25  ;;  %v1216_v9 = vand.u32 2147483647, %v1206_v25  ;;  %v1197_v13 = vor.u32 1.1754944e-38, %v1196_v33 }
 0x302   :  { %4614 = vrcp.f32 %v1230_v4  ;;  %vm1195_vm8 = vcmp.eq.f32.partialorder %v1194_v24, 8.507059e+37  ;;  %vm1212_vm9 = vweird.f32 %v1206_v25  ;;  %v1242_v22 = vand.u32 2147483648, %v1230_v4 }
 0x303   :  { %4616 = vtanh.f32 %v1222_v51  ;;  %v1219_v12 = vor.u32 1.1754944e-38, %v1218_v62  ;;  %vm1217_vm10 = vcmp.eq.f32.partialorder %v1216_v9, 8.507059e+37  ;;  %v1240_v30 = vand.u32 2147483647, %v1230_v4  ;;  %v5861_v51 = vld [vmem:[#allocation7 + $0x60] sm:$0xff] }
 0x304   :  { %v1243_v8 = vor.u32 1.1754944e-38, %v1242_v22 }
 0x305   :  { %v4611_v5 = vpop.eup %4610 }
 0x306   :  { %v1186_v47 = vmul.f32 %v4611_v5, %v1184_v48  ;;  %vm1191_vm12 = vweird.f32 %v4611_v5 }
 0x307   :  { %v4613_v49 = vpop.eup %4612  ;;  %vm1192_vm14 = vmor %vm1190_vm13, %vm1191_vm12  ;;  %vm1236_vm13 = vweird.f32 %v1230_v4 }
 0x308   :  { %v4615_v54 = vpop.eup %4614  ;;  %v1187_v57 = vsub.f32 1.0, %v1186_v47  ;;  %v1208_v61 = vmul.f32 %v4613_v49, %v1206_v25  ;;  %vm1213_vm15 = vweird.f32 %v4613_v49 }
 0x309   :  { %v1232_v45 = vmul.f32 %v4615_v54, %v1230_v4  ;;  %vm1214_vm11 = vmor %vm1212_vm9, %vm1213_vm15  ;;  %v4617_v16 = vpop.eup %4616  ;;  %vm1237_vm12 = vweird.f32 %v4615_v54  ;;  %vm1241_vm15 = vcmp.eq.f32.partialorder %v1240_v30, 8.507059e+37 }
 0x30a   :  { %v1209_v52 = vsub.f32 1.0, %v1208_v61  ;;  %v1188_v42 = vmul.f32 %v4611_v5, %v1187_v57 }
 0x30b   :  { %v1233_v0 = vsub.f32 1.0, %v1232_v45 }
 0x30c   :  { %v1189_v1 = vadd.f32 %v4611_v5, %v1188_v42  ;;  %v1210_v58 = vmul.f32 %v4613_v49, %v1209_v52 }
 0x30d   :  { %v1234_v27 = vmul.f32 %v4615_v54, %v1233_v0 }
 0x30e   :  { %v1193_v17 = vsel %vm1192_vm14, %v4611_v5, %v1189_v1  ;;  %v1211_v60 = vadd.f32 %v4613_v49, %v1210_v58  ;;  %vm1238_vm14 = vmor %vm1236_vm13, %vm1237_vm12  ;;  %v5858_v5 = vld [vmem:[#allocation7 + $0x80] sm:$0xff] }
 0x30f   :  { %v1198_v55 = vsel %vm1195_vm8, %v1197_v13, %v1193_v17  ;;  %v1235_v21 = vadd.f32 %v4615_v54, %v1234_v27  ;;  %1560 = vmatpush.msrb.mxu0 %v5858_v5 }
 0x310   :  { %v1215_v3 = vsel %vm1214_vm11, %v4613_v49, %v1211_v60  ;;  %v1247_v7 = vmul.f32 %v4617_v16, %v1198_v55 }
 0x311   :  { %v1220_v11 = vsel %vm1217_vm10, %v1219_v12, %v1215_v3  ;;  %v1239_v32 = vsel %vm1238_vm14, %v4615_v54, %v1235_v21  ;;  %1561 = vmatpush.msrb.mxu0 %v5861_v51 }
 0x312   :  { %v1246_v19 = vmul.f32 %v1220_v11, %v5735_v59  ;;  %v1244_v31 = vsel %vm1241_vm15, %v1243_v8, %v1239_v32 }
 0x313   :  { %1562 = vmatpush.msrb.mxu0 %v7599_v18 }
 0x314   :  { %v5828_v28 = vadd.f32 %v1247_v7, %v1246_v19 }
 0x315   :  { %1563 = vmatpush.msrb.mxu0 %v5645_v26 }
 0x316   :  { %4618 = vtanh.f32 %v5828_v28 }
 0x317   :  { %1564 = vmatpush.msrb.mxu0 %v5659_v38 }
 0x31c   :  { %v4619_v15 = vpop.eup %4618 }
 0x31d   :  { %v1250_v20 = vmul.f32 %v4619_v15, %v1244_v31 }
 0x31f   :  { %1252 = vst [vmem:[#allocation2 + $0x6] sm:$0x3] %v1250_v20  ;;  %1335 = vmatmul.f32.vlgmr.msra.gmra.mxu0 %v1250_v20  ;;  %1355 = vmatmul.f32.vlgmr.msrb.gmra.mxu1 %v1250_v20 }
 0x320   :  { %1375 = vmatmul.f32.vlgmr.msra.gmra.mxu2 %v1250_v20  ;;  %1395 = vmatmul.f32.vlgmr.msrb.gmra.mxu3 %v1250_v20 }
 0x326   :  { %v2179_v59 = vld [vmem:[#allocation2 + $0x6] sm:$0x3] }
 0x327   :  { %2274 = vst [vmem:[#allocation1 + $0x3] ss:$4 sm:$0xff] %v2179_v59 }
 0x39c   :  { %v1356_v34 = vpop.f32.mrf.mxu1  ;;  %v1336_v14 = vpop.f32.mrf.mxu0 }
 0x39d   :  { %v1403_v36 = vrot.slane %v1356_v34, 6 }
 0x39f   :  { %v1406_v46 = vsel %vm281_vm5, %v1336_v14, %v1403_v36 }
 0x3a3   :  { %v1376_v43 = vpop.f32.mrf.mxu2  ;;  %v1396_v10 = vpop.f32.mrf.mxu3 }
 0x3a4   :  { %v1404_v41 = vrot.slane %v1376_v43, 4  ;;  %v1405_v39 = vrot.slane %v1396_v10, 2 }
 0x3a6   :  { %v1407_v50 = vsel %vm283_vm2, %v1404_v41, %v1405_v39 }
 0x3a7   :  { %v1408_v2 = vsel %vm285_vm6, %v1406_v46, %v1407_v50  ;;  %v5872_v46 = vld [vmem:[#allocation7 + $0x1e0] sm:$0xff]  ;;  %v5874_v50 = vld [vmem:[#allocation7 + $0x1e8] sm:$0xff] }
 0x3a8   :  { %v1410_v48 = vadd.f32 %v1408_v2, %v7613_v40  ;;  %v5876_v2 = vld [vmem:[#allocation7 + $0x1f0] sm:$0xff]  ;;  %1779 = vmatpush.msra.mxu0 %v5872_v46  ;;  %1799 = vmatpush.msrb.mxu1 %v5874_v50  ;;  %v5880_v40 = vld [vmem:[#allocation7 + $0x1f8] sm:$0xff] }
 0x3a9   :  { %1819 = vmatpush.msra.mxu2 %v5876_v2  ;;  %1839 = vmatpush.msrb.mxu3 %v5880_v40 }
 0x3aa   :  { %v4500_v63 = vmul.f32 -1.442695, %v1410_v48  ;;  %v1431_v25 = vrot.slane %v1410_v48, 2  ;;  %v1455_v4 = vrot.slane %v1410_v48, 6  ;;  %v1452_v1 = vrot.slane %v1410_v48, 4  ;;  %v5884_v48 = vld [vmem:[#allocation7 + $0x1c0] sm:$0xff] }
 0x3ab   :  { %1780 = vmatpush.msra.mxu0 %v5884_v48 }
 0x3ac   :  { %4620 = vpow2.f32 %v4500_v63  ;;  %v4501_v47 = vmul.f32 -1.442695, %v1431_v25  ;;  %v4502_v49 = vmul.f32 -1.442695, %v1455_v4  ;;  %v5886_v63 = vld [vmem:[#allocation7 + $0x1c8] sm:$0xff]  ;;  %v5888_v25 = vld [vmem:[#allocation7 + $0x1d0] sm:$0xff] }
 0x3ad   :  { %1800 = vmatpush.msrb.mxu1 %v5886_v63  ;;  %v5892_v4 = vld [vmem:[#allocation7 + $0x1d8] sm:$0xff]  ;;  %1820 = vmatpush.msra.mxu2 %v5888_v25 }
 0x3ae   :  { %4622 = vpow2.f32 %v4501_v47  ;;  %1840 = vmatpush.msrb.mxu3 %v5892_v4  ;;  %v5896_v47 = vld [vmem:[#allocation7 + $0x1a0] sm:$0xff] }
 0x3af   :  { %4624 = vpow2.f32 %v4502_v49  ;;  %v5898_v49 = vld [vmem:[#allocation7 + $0x1a8] sm:$0xff]  ;;  %1781 = vmatpush.msra.mxu0 %v5896_v47 }
 0x3b0   :  { %1801 = vmatpush.msrb.mxu1 %v5898_v49 }
 0x3b1   :  { %1782 = vmatpush.msra.mxu0 %v5831_v23 }
 0x3b2   :  { %v4621_v54 = vpop.eup %4620 }
 0x3b3   :  { %v1414_v57 = vadd.f32 1.0, %v4621_v54  ;;  %v5900_v54 = vld [vmem:[#allocation7 + $0x1b0] sm:$0xff]  ;;  %1783 = vmatpush.msra.mxu0 %v5834_v29 }
 0x3b4   :  { %v4623_v61 = vpop.eup %4622  ;;  %1821 = vmatpush.msra.mxu2 %v5900_v54 }
 0x3b5   :  { %v4625_v33 = vpop.eup %4624  ;;  %4626 = vrcp.f32 %v1414_v57  ;;  %v1436_v45 = vadd.f32 1.0, %v4623_v61  ;;  %v1426_v13 = vand.u32 2147483648, %v1414_v57  ;;  %v1424_v60 = vand.u32 2147483647, %v1414_v57  ;;  %v5908_v61 = vld [vmem:[#allocation7 + $0x188] sm:$0xff]  ;;  %1784 = vmatpush.msra.mxu0 %v5837_v6 }
 0x3b6   :  { %v1460_v52 = vadd.f32 1.0, %v4625_v33  ;;  %vm1420_vm9 = vweird.f32 %v1414_v57  ;;  %v5910_v33 = vld [vmem:[#allocation7 + $0x190] sm:$0xff]  ;;  %1802 = vmatpush.msrb.mxu1 %v5908_v61 }
 0x3b7   :  { %4628 = vrcp.f32 %v1436_v45  ;;  %v1448_v55 = vand.u32 2147483648, %v1436_v45  ;;  %v1446_v3 = vand.u32 2147483647, %v1436_v45  ;;  %v1427_v16 = vor.u32 1.1754944e-38, %v1426_v13  ;;  %1822 = vmatpush.msra.mxu2 %v5910_v33  ;;  %v5938_v13 = vld [vmem:[#allocation7 + $0x130] sm:$0xff]  ;;  %1785 = vmatpush.msra.mxu0 %v5839_v35 }
 0x3b8   :  { %4630 = vrcp.f32 %v1460_v52  ;;  %vm1425_vm12 = vcmp.eq.f32.partialorder %v1424_v60, 8.507059e+37  ;;  %vm1442_vm13 = vweird.f32 %v1436_v45  ;;  %v1472_v34 = vand.u32 2147483648, %v1460_v52 }
 0x3b9   :  { %4632 = vtanh.f32 %v1452_v1  ;;  %v1449_v21 = vor.u32 1.1754944e-38, %v1448_v55  ;;  %vm1447_vm15 = vcmp.eq.f32.partialorder %v1446_v3, 8.507059e+37  ;;  %v1470_v36 = vand.u32 2147483647, %v1460_v52  ;;  %v5928_v1 = vld [vmem:[#allocation7 + $0x148] sm:$0xff]  ;;  %1786 = vmatpush.msra.mxu0 %v5842_v37 }
 0x3ba   :  { %v1473_v10 = vor.u32 1.1754944e-38, %v1472_v34 }
 0x3bb   :  { %v4627_v42 = vpop.eup %4626  ;;  %1787 = vmatpush.msra.mxu0 %v5845_v44 }
 0x3bc   :  { %v1416_v24 = vmul.f32 %v4627_v42, %v1414_v57  ;;  %vm1421_vm8 = vweird.f32 %v4627_v42  ;;  %v5904_v57 = vld [vmem:[#allocation7 + $0x1b8] sm:$0xff] }
 0x3bd   :  { %v4629_v62 = vpop.eup %4628  ;;  %vm1422_vm10 = vmor %vm1420_vm9, %vm1421_vm8  ;;  %vm1466_vm9 = vweird.f32 %v1460_v52  ;;  %1841 = vmatpush.msrb.mxu3 %v5904_v57  ;;  %1788 = vmatpush.msra.mxu0 %v5850_v53 }
 0x3be   :  { %v4631_v58 = vpop.eup %4630  ;;  %v1417_v9 = vsub.f32 1.0, %v1416_v24  ;;  %v1438_v18 = vmul.f32 %v4629_v62, %v1436_v45  ;;  %vm1443_vm11 = vweird.f32 %v4629_v62  ;;  %v5912_v45 = vld [vmem:[#allocation7 + $0x198] sm:$0xff] }
 0x3bf   :  { %v1462_v0 = vmul.f32 %v4631_v58, %v1460_v52  ;;  %vm1444_vm14 = vmor %vm1442_vm13, %vm1443_vm11  ;;  %v4633_v30 = vpop.eup %4632  ;;  %vm1467_vm8 = vweird.f32 %v4631_v58  ;;  %vm1471_vm11 = vcmp.eq.f32.partialorder %v1470_v36, 8.507059e+37  ;;  %1842 = vmatpush.msrb.mxu3 %v5912_v45  ;;  %v5918_v52 = vld [vmem:[#allocation7 + $0x168] sm:$0xff]  ;;  %v5922_v24 = vld [vmem:[#allocation7 + $0x178] sm:$0xff]  ;;  %1789 = vmatpush.msra.mxu0 %v5855_v56 }
 0x3c0   :  { %v1439_v17 = vsub.f32 1.0, %v1438_v18  ;;  %v1418_v26 = vmul.f32 %v4627_v42, %v1417_v9  ;;  %1803 = vmatpush.msrb.mxu1 %v5918_v52  ;;  %v5932_v9 = vld [vmem:[#allocation7 + $0x158] sm:$0xff]  ;;  %v5936_v18 = vld [vmem:[#allocation7 + $0x128] sm:$0xff] }
 0x3c1   :  { %v1463_v11 = vsub.f32 1.0, %v1462_v0  ;;  %1843 = vmatpush.msrb.mxu3 %v5922_v24  ;;  %v5940_v0 = vld [vmem:[#allocation7 + $0x138] sm:$0xff]  ;;  %v5980_v36 = vld [vmem:[#allocation7 + $0xa8] sm:$0xff]  ;;  %1790 = vmatpush.msra.mxu0 %v5858_v5 }
 0x3c2   :  { %v1419_v38 = vadd.f32 %v4627_v42, %v1418_v26  ;;  %v1440_v12 = vmul.f32 %v4629_v62, %v1439_v17  ;;  %1804 = vmatpush.msrb.mxu1 %v5928_v1  ;;  %v5944_v26 = vld [vmem:[#allocation7 + $0x108] sm:$0xff] }
 0x3c3   :  { %v1464_v8 = vmul.f32 %v4631_v58, %v1463_v11  ;;  %1844 = vmatpush.msrb.mxu3 %v5932_v9  ;;  %v5954_v11 = vld [vmem:[#allocation7 + $0xe8] sm:$0xff]  ;;  %1791 = vmatpush.msra.mxu0 %v5861_v51 }
 0x3c4   :  { %v1423_v27 = vsel %vm1422_vm10, %v4627_v42, %v1419_v38  ;;  %v1441_v19 = vadd.f32 %v4629_v62, %v1440_v12  ;;  %vm1468_vm10 = vmor %vm1466_vm9, %vm1467_vm8  ;;  %v5920_v42 = vld [vmem:[#allocation7 + $0x170] sm:$0xff]  ;;  %1805 = vmatpush.msrb.mxu1 %v5936_v18  ;;  %v5950_v12 = vld [vmem:[#allocation7 + $0x118] sm:$0xff] }
 0x3c5   :  { %v1428_v7 = vsel %vm1425_vm12, %v1427_v16, %v1423_v27  ;;  %v1465_v59 = vadd.f32 %v4631_v58, %v1464_v8  ;;  %1823 = vmatpush.msra.mxu2 %v5920_v42  ;;  %v5948_v38 = vld [vmem:[#allocation7 + $0x110] sm:$0xff]  ;;  %1845 = vmatpush.msrb.mxu3 %v5940_v0  ;;  %v5967_v8 = vld [vmem:[#allocation7 + $0xc8] sm:$0xff] }
 0x3c6   :  { %v1445_v22 = vsel %vm1444_vm14, %v4629_v62, %v1441_v19  ;;  %v1477_v31 = vmul.f32 %v4633_v30, %v1428_v7  ;;  %1806 = vmatpush.msrb.mxu1 %v5944_v26  ;;  %v5958_v19 = vld [vmem:[#allocation7 + $0xf0] sm:$0xff]  ;;  %v5960_v7 = vld [vmem:[#allocation7 + $0xf8] sm:$0xff] }
 0x3c7   :  { %v1450_v32 = vsel %vm1447_vm15, %v1449_v21, %v1445_v22  ;;  %v1469_v43 = vsel %vm1468_vm10, %v4631_v58, %v1465_v59  ;;  %v5930_v58 = vld [vmem:[#allocation7 + $0x150] sm:$0xff]  ;;  %1846 = vmatpush.msrb.mxu3 %v5950_v12  ;;  %v5974_v59 = vld [vmem:[#allocation7 + $0xd8] sm:$0xff] }
 0x3c8   :  { %v1476_v15 = vmul.f32 %v1450_v32, %v5828_v28  ;;  %v1474_v39 = vsel %vm1471_vm11, %v1473_v10, %v1469_v43  ;;  %1824 = vmatpush.msra.mxu2 %v5930_v58  ;;  %v7614_v22 = vld [vmem:[#allocation20_spill] sm:$0xff]  ;;  %1807 = vmatpush.msrb.mxu1 %v5954_v11  ;;  %v5986_v10 = vld [vmem:[#allocation7 + $0xb8] sm:$0xff] }
 0x3c9   :  { %v308_v30 = vrot.slane %v7614_v22, 2  ;;  %1847 = vmatpush.msrb.mxu3 %v5960_v7  ;;  %v5984_v43 = vld [vmem:[#allocation7 + $0xb0] sm:$0xff]  ;;  %v6015_v22 = vld [vmem:[#allocation7 + $0x48] sm:$0xff] }
 0x3ca   :  { %v5869_v20 = vadd.f32 %v1477_v31, %v1476_v15  ;;  %1825 = vmatpush.msra.mxu2 %v5938_v13  ;;  %v5972_v31 = vld [vmem:[#allocation7 + $0xd0] sm:$0xff]  ;;  %1808 = vmatpush.msrb.mxu1 %v5967_v8  ;;  %7619 = vst [vmem:[#allocation37_spill] sm:$0xff] %v6015_v22 }
 0x3cb   :  { %1848 = vmatpush.msrb.mxu3 %v5974_v59 }
 0x3cc   :  { %4634 = vtanh.f32 %v5869_v20  ;;  %1826 = vmatpush.msra.mxu2 %v5948_v38  ;;  %1809 = vmatpush.msrb.mxu1 %v5980_v36 }
 0x3cd   :  { %1849 = vmatpush.msrb.mxu3 %v5986_v10 }
 0x3ce   :  { %1827 = vmatpush.msra.mxu2 %v5958_v19 }
 0x3d0   :  { %1828 = vmatpush.msra.mxu2 %v5972_v31 }
 0x3d2   :  { %v4635_v41 = vpop.eup %4634  ;;  %1829 = vmatpush.msra.mxu2 %v5984_v43 }
 0x3d3   :  { %v1480_v14 = vmul.f32 %v4635_v41, %v1474_v39 }
 0x3d5   :  { %1482 = vst [vmem:[#allocation2 + $0x8] sm:$0x3] %v1480_v14  ;;  %1565 = vmatmul.f32.vlgmr.msrb.gmra.mxu0 %v1480_v14  ;;  %1585 = vmatmul.f32.vlgmr.msra.gmra.mxu1 %v1480_v14 }
 0x3d6   :  { %1605 = vmatmul.f32.vlgmr.msrb.gmra.mxu2 %v1480_v14  ;;  %1625 = vmatmul.f32.vlgmr.msra.gmra.mxu3 %v1480_v14 }
 0x3dc   :  { %v2180_v28 = vld [vmem:[#allocation2 + $0x8] sm:$0x3] }
 0x3dd   :  { %2276 = vst [vmem:[#allocation1 + $0x20] ss:$4 sm:$0xff] %v2180_v28  ;;  %v5993_v28 = vld [vmem:[#allocation7 + $0x88] sm:$0xff] }
 0x3de   :  { %1810 = vmatpush.msrb.mxu1 %v5993_v28 }
 0x452   :  { %v1586_v62 = vpop.f32.mrf.mxu1  ;;  %v1566_v27 = vpop.f32.mrf.mxu0 }
 0x453   :  { %v1633_v17 = vrot.slane %v1586_v62, 6  ;;  %v5997_v62 = vld [vmem:[#allocation7 + $0x90] sm:$0xff] }
 0x454   :  { %1830 = vmatpush.msra.mxu2 %v5997_v62 }
 0x455   :  { %v1636_v21 = vsel %vm281_vm5, %v1566_v27, %v1633_v17  ;;  %v5999_v17 = vld [vmem:[#allocation7 + $0x98] sm:$0xff] }
 0x456   :  { %v6009_v27 = vld [vmem:[#allocation7 + $0x78] sm:$0xff]  ;;  %1850 = vmatpush.msrb.mxu3 %v5999_v17 }
 0x457   :  { %7617 = vst [vmem:[#allocation35_spill] sm:$0xff] %v6009_v27 }
 0x458   :  { %1851 = vmatpush.msrb.mxu3 %v6009_v27  ;;  %v6039_v27 = vld [vmem:[#allocation7 + $0x8] sm:$0xff] }
 0x459   :  { %v1606_v60 = vpop.f32.mrf.mxu2  ;;  %v1626_v55 = vpop.f32.mrf.mxu3 }
 0x45a   :  { %v1634_v3 = vrot.slane %v1606_v60, 4  ;;  %v1635_v16 = vrot.slane %v1626_v55, 2 }
 0x45c   :  { %v1637_v32 = vsel %vm283_vm2, %v1634_v3, %v1635_v16  ;;  %v6003_v3 = vld [vmem:[#allocation7 + $0x68] sm:$0xff]  ;;  %v6007_v16 = vld [vmem:[#allocation7 + $0x70] sm:$0xff] }
 0x45d   :  { %v1638_v15 = vsel %vm285_vm6, %v1636_v21, %v1637_v32  ;;  %7615 = vst [vmem:[#allocation23_spill] sm:$0xff] %v6003_v3  ;;  %v6013_v21 = vld [vmem:[#allocation7 + $0x40] sm:$0xff]  ;;  %1811 = vmatpush.msrb.mxu1 %v6003_v3  ;;  %v6021_v32 = vld [vmem:[#allocation7 + $0x58] sm:$0xff]  ;;  %1831 = vmatpush.msra.mxu2 %v6007_v16 }
 0x45e   :  { %v5976_v34 = vadd.f32 %v1638_v15, %v308_v30  ;;  %7616 = vst [vmem:[#allocation34_spill] sm:$0xff] %v6007_v16  ;;  %v6019_v30 = vld [vmem:[#allocation7 + $0x50] sm:$0xff]  ;;  %v6025_v15 = vld [vmem:[#allocation7 + $0x20] sm:$0xff]  ;;  %1792 = vmatpush.msra.mxu0 %v6013_v21  ;;  %1852 = vmatpush.msrb.mxu3 %v6021_v32 }
 0x45f   :  { %7618 = vst [vmem:[#allocation36_spill] sm:$0xff] %v6013_v21  ;;  %1812 = vmatpush.msrb.mxu1 %v6015_v22  ;;  %1832 = vmatpush.msra.mxu2 %v6019_v30  ;;  %v6045_v22 = vld [vmem:[#allocation7 + $0x10] sm:$0xff]  ;;  %v6047_v21 = vld [vmem:[#allocation7 + $0x18] sm:$0xff] }
 0x460   :  { %v4503_v41 = vmul.f32 -1.442695, %v5976_v34  ;;  %v1661_v39 = vrot.slane %v5976_v34, 2  ;;  %v1685_v14 = vrot.slane %v5976_v34, 6  ;;  %7620 = vst [vmem:[#allocation38_spill] sm:$0xff] %v6019_v30  ;;  %1793 = vmatpush.msra.mxu0 %v6025_v15 }
 0x461   :  { %7621 = vst [vmem:[#allocation39_spill] sm:$0xff] %v6021_v32 }
 0x462   :  { %4636 = vpow2.f32 %v4503_v41  ;;  %v4504_v60 = vmul.f32 -1.442695, %v1661_v39  ;;  %v4505_v55 = vmul.f32 -1.442695, %v1685_v14  ;;  %v6027_v41 = vld [vmem:[#allocation7 + $0x28] sm:$0xff]  ;;  %v6031_v39 = vld [vmem:[#allocation7 + $0x30] sm:$0xff] }
 0x463   :  { %v6033_v14 = vld [vmem:[#allocation7 + $0x38] sm:$0xff]  ;;  %1813 = vmatpush.msrb.mxu1 %v6027_v41  ;;  %1833 = vmatpush.msra.mxu2 %v6031_v39 }
 0x464   :  { %4638 = vpow2.f32 %v4504_v60  ;;  %1853 = vmatpush.msrb.mxu3 %v6033_v14 }
 0x465   :  { %4640 = vpow2.f32 %v4505_v55  ;;  %v6037_v55 = vld [vmem:[#allocation7] sm:$0xff]  ;;  %1814 = vmatpush.msrb.mxu1 %v6039_v27  ;;  %1834 = vmatpush.msra.mxu2 %v6045_v22 }
 0x466   :  { %1794 = vmatpush.msra.mxu0 %v6037_v55  ;;  %1854 = vmatpush.msrb.mxu3 %v6047_v21 }
 0x467   :  { %2029 = vmatpush.msra.mxu1 %v5874_v50  ;;  %2049 = vmatpush.msrb.mxu2 %v5876_v2  ;;  %v1682_v2 = vrot.slane %v5976_v34, 4  ;;  %v2245_v34 = vld [vmem:[#allocation4 + $0x3e0] sm:$0xff] }
 0x468   :  { %v4637_v60 = vpop.eup %4636  ;;  %2009 = vmatpush.msrb.mxu0 %v5872_v46  ;;  %2069 = vmatpush.msra.mxu3 %v5880_v40 }
 0x469   :  { %v6041_v16 = vadd.f32 1.0, %v4637_v60  ;;  %2030 = vmatpush.msra.mxu1 %v5886_v63  ;;  %2050 = vmatpush.msrb.mxu2 %v5888_v25 }
 0x46a   :  { %v4639_v3 = vpop.eup %4638  ;;  %2010 = vmatpush.msrb.mxu0 %v5884_v48  ;;  %2070 = vmatpush.msra.mxu3 %v5892_v4 }
 0x46b   :  { %v4641_v32 = vpop.eup %4640  ;;  %4642 = vrcp.f32 %v6041_v16  ;;  %v6052_v30 = vadd.f32 1.0, %v4639_v3  ;;  %2031 = vmatpush.msra.mxu1 %v5898_v49  ;;  %2051 = vmatpush.msrb.mxu2 %v5900_v54  ;;  %v1656_v25 = vand.u32 2147483648, %v6041_v16  ;;  %v1654_v49 = vand.u32 2147483647, %v6041_v16 }
 0x46c   :  { %v6056_v60 = vadd.f32 1.0, %v4641_v32  ;;  %2011 = vmatpush.msrb.mxu0 %v5896_v47  ;;  %2071 = vmatpush.msra.mxu3 %v5904_v57  ;;  %vm1650_vm13 = vweird.f32 %v6041_v16  ;;  %v2239_v32 = vld [vmem:[#allocation4 + $0x3b0] sm:$0xff] }
 0x46d   :  { %4644 = vrcp.f32 %v6052_v30  ;;  %2032 = vmatpush.msra.mxu1 %v5908_v61  ;;  %2052 = vmatpush.msrb.mxu2 %v5910_v33  ;;  %v1678_v54 = vand.u32 2147483648, %v6052_v30  ;;  %v1676_v61 = vand.u32 2147483647, %v6052_v30  ;;  %v1657_v33 = vor.u32 1.1754944e-38, %v1656_v25  ;;  %v2232_v25 = vld [vmem:[#allocation4 + $0x378] sm:$0xff] }
 0x46e   :  { %4646 = vrcp.f32 %v6056_v60  ;;  %2012 = vmatpush.msrb.mxu0 %v5831_v23  ;;  %2072 = vmatpush.msra.mxu3 %v5912_v45  ;;  %vm1655_vm8 = vcmp.eq.f32.partialorder %v1654_v49, 8.507059e+37  ;;  %vm1672_vm9 = vweird.f32 %v6052_v30 }
 0x46f   :  { %2033 = vmatpush.msra.mxu1 %v5918_v52  ;;  %2053 = vmatpush.msrb.mxu2 %v5920_v42  ;;  %4648 = vtanh.f32 %v1682_v2  ;;  %vm1677_vm11 = vcmp.eq.f32.partialorder %v1676_v61, 8.507059e+37  ;;  %v2229_v2 = vld [vmem:[#allocation4 + $0x360] sm:$0xff]  ;;  %v2227_v61 = vld [vmem:[#allocation4 + $0x350] sm:$0xff] }
 0x470   :  { %2013 = vmatpush.msrb.mxu0 %v5834_v29  ;;  %2073 = vmatpush.msra.mxu3 %v5922_v24  ;;  %v1679_v24 = vor.u32 1.1754944e-38, %v1678_v54  ;;  %v2225_v54 = vld [vmem:[#allocation4 + $0x340] sm:$0xff] }
 0x471   :  { %v4643_v3 = vpop.eup %4642  ;;  %2034 = vmatpush.msra.mxu1 %v5928_v1  ;;  %2054 = vmatpush.msrb.mxu2 %v5930_v58 }
 0x472   :  { %v1646_v46 = vmul.f32 %v4643_v3, %v6041_v16  ;;  %vm1651_vm12 = vweird.f32 %v4643_v3  ;;  %2014 = vmatpush.msrb.mxu0 %v5837_v6  ;;  %2074 = vmatpush.msra.mxu3 %v5932_v9  ;;  %v2243_v16 = vld [vmem:[#allocation4 + $0x3d0] sm:$0xff] }
 0x473   :  { %v4645_v50 = vpop.eup %4644  ;;  %vm1652_vm15 = vmor %vm1650_vm13, %vm1651_vm12  ;;  %2035 = vmatpush.msra.mxu1 %v5936_v18  ;;  %2055 = vmatpush.msrb.mxu2 %v5938_v13  ;;  %vm1696_vm13 = vweird.f32 %v6056_v60 }
 0x474   :  { %v6078_v40 = vpop.eup %4646  ;;  %v1647_v48 = vsub.f32 1.0, %v1646_v46  ;;  %v1668_v63 = vmul.f32 %v4645_v50, %v6052_v30  ;;  %vm1673_vm14 = vweird.f32 %v4645_v50  ;;  %2015 = vmatpush.msrb.mxu0 %v5839_v35  ;;  %2075 = vmatpush.msra.mxu3 %v5940_v0  ;;  %v7622_v0 = vld [vmem:[#allocation23_spill] sm:$0xff] }
 0x475   :  { %v1692_v4 = vmul.f32 %v6078_v40, %v6056_v60  ;;  %vm1674_vm10 = vmor %vm1672_vm9, %vm1673_vm14  ;;  %2036 = vmatpush.msra.mxu1 %v5944_v26  ;;  %2056 = vmatpush.msrb.mxu2 %v5948_v38  ;;  %v4649_v1 = vpop.eup %4648  ;;  %vm1697_vm12 = vweird.f32 %v6078_v40  ;;  %v7623_v38 = vld [vmem:[#allocation34_spill] sm:$0xff]  ;;  %v2238_v30 = vld [vmem:[#allocation4 + $0x3a8] sm:$0xff] }
 0x476   :  { %v1669_v23 = vsub.f32 1.0, %v1668_v63  ;;  %v1648_v47 = vmul.f32 %v4643_v3, %v1647_v48  ;;  %2016 = vmatpush.msrb.mxu0 %v5842_v37  ;;  %2076 = vmatpush.msra.mxu3 %v5950_v12  ;;  %vm1698_vm14 = vmor %vm1696_vm13, %vm1697_vm12  ;;  %v7624_v12 = vld [vmem:[#allocation35_spill] sm:$0xff]  ;;  %v2231_v63 = vld [vmem:[#allocation4 + $0x370] sm:$0xff] }
 0x477   :  { %v1693_v45 = vsub.f32 1.0, %v1692_v4  ;;  %2037 = vmatpush.msra.mxu1 %v5954_v11  ;;  %2057 = vmatpush.msrb.mxu2 %v5958_v19  ;;  %v7626_v11 = vld [vmem:[#allocation37_spill] sm:$0xff] }
 0x478   :  { %v1649_v29 = vadd.f32 %v4643_v3, %v1648_v47  ;;  %v1670_v57 = vmul.f32 %v4645_v50, %v1669_v23  ;;  %2017 = vmatpush.msrb.mxu0 %v5845_v44  ;;  %2077 = vmatpush.msra.mxu3 %v5960_v7  ;;  %v7629_v23 = vld [vmem:[#allocation21_spill] sm:$0xff] }
 0x479   :  { %v1694_v9 = vmul.f32 %v6078_v40, %v1693_v45  ;;  %2038 = vmatpush.msra.mxu1 %v5967_v8  ;;  %2058 = vmatpush.msrb.mxu2 %v5972_v31  ;;  %v7627_v8 = vld [vmem:[#allocation38_spill] sm:$0xff]  ;;  %v7628_v31 = vld [vmem:[#allocation39_spill] sm:$0xff]  ;;  %v312_v47 = vrot.slane %v7629_v23, 4 }
 0x47a   :  { %v1653_v6 = vsel %vm1652_vm15, %v4643_v3, %v1649_v29  ;;  %v1671_v52 = vadd.f32 %v4645_v50, %v1670_v57  ;;  %2018 = vmatpush.msrb.mxu0 %v5850_v53  ;;  %2078 = vmatpush.msra.mxu3 %v5974_v59  ;;  %v1700_v53 = vand.u32 2147483647, %v6056_v60  ;;  %v2236_v3 = vld [vmem:[#allocation4 + $0x398] sm:$0xff]  ;;  %v2226_v29 = vld [vmem:[#allocation4 + $0x348] sm:$0xff] }
 0x47b   :  { %v1658_v42 = vsel %vm1655_vm8, %v1657_v33, %v1653_v6  ;;  %v1695_v44 = vadd.f32 %v6078_v40, %v1694_v9  ;;  %2039 = vmatpush.msra.mxu1 %v5980_v36  ;;  %2059 = vmatpush.msrb.mxu2 %v5984_v43  ;;  %v2246_v36 = vld [vmem:[#allocation4 + $0x3e8] sm:$0xff]  ;;  %v2247_v43 = vld [vmem:[#allocation4 + $0x3f0] sm:$0xff]  ;;  %v2228_v33 = vld [vmem:[#allocation4 + $0x358] sm:$0xff] }
 0x47c   :  { %v1675_v35 = vsel %vm1674_vm10, %v4645_v50, %v1671_v52  ;;  %v1707_v13 = vmul.f32 %v4649_v1, %v1658_v42  ;;  %2019 = vmatpush.msrb.mxu0 %v5855_v56  ;;  %2079 = vmatpush.msra.mxu3 %v5986_v10  ;;  %vm1701_vm15 = vcmp.eq.f32.partialorder %v1700_v53, 8.507059e+37  ;;  %v2221_v6 = vld [vmem:[#allocation4 + $0x320] sm:$0xff]  ;;  %v2222_v52 = vld [vmem:[#allocation4 + $0x328] sm:$0xff]  ;;  %v2223_v42 = vld [vmem:[#allocation4 + $0x330] sm:$0xff] }
 0x47d   :  { %v1680_v58 = vsel %vm1677_vm11, %v1679_v24, %v1675_v35  ;;  %2040 = vmatpush.msra.mxu1 %v5993_v28  ;;  %2060 = vmatpush.msrb.mxu2 %v5997_v62  ;;  %v1699_v56 = vsel %vm1698_vm14, %v6078_v40, %v1695_v44  ;;  %v2248_v28 = vld [vmem:[#allocation4 + $0x3f8] sm:$0xff]  ;;  %v2241_v62 = vld [vmem:[#allocation4 + $0x3c0] sm:$0xff]  ;;  %v2230_v40 = vld [vmem:[#allocation4 + $0x368] sm:$0xff] }
 0x47e   :  { %v1706_v18 = vmul.f32 %v1680_v58, %v5869_v20  ;;  %v1702_v20 = vand.u32 2147483648, %v6056_v60  ;;  %2020 = vmatpush.msrb.mxu0 %v5858_v5  ;;  %2080 = vmatpush.msra.mxu3 %v5999_v17  ;;  %v7625_v5 = vld [vmem:[#allocation36_spill] sm:$0xff]  ;;  %v2242_v17 = vld [vmem:[#allocation4 + $0x3c8] sm:$0xff]  ;;  %v2224_v24 = vld [vmem:[#allocation4 + $0x338] sm:$0xff] }
 0x47f   :  { %2041 = vmatpush.msra.mxu1 %v7622_v0  ;;  %2061 = vmatpush.msrb.mxu2 %v7623_v38  ;;  %v2235_v60 = vld [vmem:[#allocation4 + $0x390] sm:$0xff]  ;;  %v2217_v9 = vld [vmem:[#allocation4 + $0x300] sm:$0xff]  ;;  %v2220_v44 = vld [vmem:[#allocation4 + $0x318] sm:$0xff] }
 0x480   :  { %v6117_v37 = vadd.f32 %v1707_v13, %v1706_v18  ;;  %2021 = vmatpush.msrb.mxu0 %v5861_v51  ;;  %v1703_v26 = vor.u32 1.1754944e-38, %v1702_v20  ;;  %2081 = vmatpush.msra.mxu3 %v7624_v12  ;;  %v2218_v18 = vld [vmem:[#allocation4 + $0x308] sm:$0xff]  ;;  %v2219_v13 = vld [vmem:[#allocation4 + $0x310] sm:$0xff]  ;;  %v2216_v38 = vld [vmem:[#allocation4 + $0x2f8] sm:$0xff] }
 0x481   :  { %2042 = vmatpush.msra.mxu1 %v7626_v11  ;;  %2062 = vmatpush.msrb.mxu2 %v7627_v8  ;;  %v2214_v0 = vld [vmem:[#allocation4 + $0x2e8] sm:$0xff]  ;;  %v2209_v12 = vld [vmem:[#allocation4 + $0x2c0] sm:$0xff]  ;;  %v2211_v11 = vld [vmem:[#allocation4 + $0x2d0] sm:$0xff] }
 0x482   :  { %4650 = vtanh.f32 %v6117_v37  ;;  %2022 = vmatpush.msrb.mxu0 %v7625_v5  ;;  %v1704_v7 = vsel %vm1701_vm15, %v1703_v26, %v1699_v56  ;;  %2082 = vmatpush.msra.mxu3 %v7628_v31  ;;  %v2213_v56 = vld [vmem:[#allocation4 + $0x2e0] sm:$0xff]  ;;  %v2215_v26 = vld [vmem:[#allocation4 + $0x2f0] sm:$0xff]  ;;  %v2210_v5 = vld [vmem:[#allocation4 + $0x2c8] sm:$0xff] }
 0x483   :  { %2043 = vmatpush.msra.mxu1 %v6027_v41  ;;  %2063 = vmatpush.msrb.mxu2 %v6031_v39  ;;  %v2233_v41 = vld [vmem:[#allocation4 + $0x380] sm:$0xff]  ;;  %v2206_v8 = vld [vmem:[#allocation4 + $0x2a8] sm:$0xff]  ;;  %v2207_v31 = vld [vmem:[#allocation4 + $0x2b0] sm:$0xff] }
 0x484   :  { %2023 = vmatpush.msrb.mxu0 %v6025_v15  ;;  %2083 = vmatpush.msra.mxu3 %v6033_v14  ;;  %v2240_v15 = vld [vmem:[#allocation4 + $0x3b8] sm:$0xff] }
 0x485   :  { %2044 = vmatpush.msra.mxu1 %v6039_v27  ;;  %2064 = vmatpush.msrb.mxu2 %v6045_v22  ;;  %v2244_v27 = vld [vmem:[#allocation4 + $0x3d8] sm:$0xff]  ;;  %v2237_v22 = vld [vmem:[#allocation4 + $0x3a0] sm:$0xff] }
 0x486   :  { %2024 = vmatpush.msrb.mxu0 %v6037_v55  ;;  %2084 = vmatpush.msra.mxu3 %v6047_v21  ;;  %v2234_v55 = vld [vmem:[#allocation4 + $0x388] sm:$0xff] }
 0x488   :  { %v4651_v19 = vpop.eup %4650 }
 0x489   :  { %v1710_v59 = vmul.f32 %v4651_v19, %v1704_v7  ;;  %v2212_v19 = vld [vmem:[#allocation4 + $0x2d8] sm:$0xff]  ;;  %v2205_v7 = vld [vmem:[#allocation4 + $0x2a0] sm:$0xff] }
 0x48b   :  { %1712 = vst [vmem:[#allocation2 + $0xa] sm:$0x3] %v1710_v59  ;;  %1795 = vmatmul.f32.vlgmr.msra.gmra.mxu0 %v1710_v59  ;;  %1815 = vmatmul.f32.vlgmr.msrb.gmra.mxu1 %v1710_v59 }
 0x48c   :  { %1835 = vmatmul.f32.vlgmr.msra.gmra.mxu2 %v1710_v59  ;;  %1855 = vmatmul.f32.vlgmr.msrb.gmra.mxu3 %v1710_v59  ;;  %v2208_v59 = vld [vmem:[#allocation4 + $0x2b8] sm:$0xff] }
 0x48d   :  { %2287 = vmatpush.msra.mxu0 %v2245_v34  ;;  %2310 = vmatpush.msrb.mxu1 %v2246_v36  ;;  %v2201_v34 = vld [vmem:[#allocation4 + $0x280] sm:$0xff]  ;;  %v2202_v36 = vld [vmem:[#allocation4 + $0x288] sm:$0xff] }
 0x48e   :  { %2333 = vmatpush.msra.mxu2 %v2247_v43  ;;  %2356 = vmatpush.msrb.mxu3 %v2248_v28  ;;  %v2204_v28 = vld [vmem:[#allocation4 + $0x298] sm:$0xff] }
 0x48f   :  { %2288 = vmatpush.msra.mxu0 %v2241_v62  ;;  %2311 = vmatpush.msrb.mxu1 %v2242_v17 }
 0x490   :  { %2334 = vmatpush.msra.mxu2 %v2243_v16  ;;  %2357 = vmatpush.msrb.mxu3 %v2244_v27 }
 0x491   :  { %2289 = vmatpush.msra.mxu0 %v2237_v22  ;;  %2312 = vmatpush.msrb.mxu1 %v2238_v30  ;;  %v2197_v22 = vld [vmem:[#allocation4 + $0x260] sm:$0xff]  ;;  %v2198_v30 = vld [vmem:[#allocation4 + $0x268] sm:$0xff] }
 0x492   :  { %v2181_v51 = vld [vmem:[#allocation2 + $0xa] sm:$0x3]  ;;  %2335 = vmatpush.msra.mxu2 %v2239_v32  ;;  %2358 = vmatpush.msrb.mxu3 %v2240_v15  ;;  %v2193_v15 = vld [vmem:[#allocation4 + $0x240] sm:$0xff] }
 0x493   :  { %2278 = vst [vmem:[#allocation1 + $0x21] ss:$4 sm:$0xff] %v2181_v51  ;;  %2290 = vmatpush.msra.mxu0 %v2233_v41  ;;  %2313 = vmatpush.msrb.mxu1 %v2234_v55  ;;  %v2200_v32 = vld [vmem:[#allocation4 + $0x278] sm:$0xff]  ;;  %v2194_v41 = vld [vmem:[#allocation4 + $0x248] sm:$0xff] }
 0x494   :  { %2336 = vmatpush.msra.mxu2 %v2235_v60  ;;  %2359 = vmatpush.msrb.mxu3 %v2236_v3  ;;  %v2189_v60 = vld [vmem:[#allocation4 + $0x220] sm:$0xff]  ;;  %v2190_v3 = vld [vmem:[#allocation4 + $0x228] sm:$0xff] }
 0x495   :  { %2291 = vmatpush.msra.mxu0 %v2229_v2  ;;  %2314 = vmatpush.msrb.mxu1 %v2230_v40  ;;  %v2192_v2 = vld [vmem:[#allocation4 + $0x238] sm:$0xff] }
 0x496   :  { %2337 = vmatpush.msra.mxu2 %v2231_v63  ;;  %2360 = vmatpush.msrb.mxu3 %v2232_v25  ;;  %v2185_v63 = vld [vmem:[#allocation4 + $0x200] sm:$0xff]  ;;  %v2186_v25 = vld [vmem:[#allocation4 + $0x208] sm:$0xff] }
 0x497   :  { %2292 = vmatpush.msra.mxu0 %v2225_v54  ;;  %2315 = vmatpush.msrb.mxu1 %v2226_v29  ;;  %v2188_v54 = vld [vmem:[#allocation4 + $0x218] sm:$0xff] }
 0x498   :  { %2338 = vmatpush.msra.mxu2 %v2227_v61  ;;  %2361 = vmatpush.msrb.mxu3 %v2228_v33 }
 0x499   :  { %2293 = vmatpush.msra.mxu0 %v2221_v6  ;;  %2316 = vmatpush.msrb.mxu1 %v2222_v52 }
 0x49a   :  { %2339 = vmatpush.msra.mxu2 %v2223_v42  ;;  %2362 = vmatpush.msrb.mxu3 %v2224_v24 }
 0x49b   :  { %2294 = vmatpush.msra.mxu0 %v2217_v9  ;;  %2317 = vmatpush.msrb.mxu1 %v2218_v18 }
 0x49c   :  { %2340 = vmatpush.msra.mxu2 %v2219_v13  ;;  %2363 = vmatpush.msrb.mxu3 %v2220_v44 }
 0x49d   :  { %2295 = vmatpush.msra.mxu0 %v2213_v56  ;;  %2318 = vmatpush.msrb.mxu1 %v2214_v0 }
 0x49e   :  { %2341 = vmatpush.msra.mxu2 %v2215_v26  ;;  %2364 = vmatpush.msrb.mxu3 %v2216_v38 }
 0x49f   :  { %2296 = vmatpush.msra.mxu0 %v2209_v12  ;;  %2319 = vmatpush.msrb.mxu1 %v2210_v5 }
 0x4a0   :  { %2342 = vmatpush.msra.mxu2 %v2211_v11  ;;  %2365 = vmatpush.msrb.mxu3 %v2212_v19 }
 0x4a1   :  { %2297 = vmatpush.msra.mxu0 %v2205_v7  ;;  %2320 = vmatpush.msrb.mxu1 %v2206_v8 }
 0x4a2   :  { %2343 = vmatpush.msra.mxu2 %v2207_v31  ;;  %2366 = vmatpush.msrb.mxu3 %v2208_v59 }
 0x4a3   :  { %2298 = vmatpush.msra.mxu0 %v2201_v34  ;;  %2321 = vmatpush.msrb.mxu1 %v2202_v36 }
 0x4a4   :  { %2367 = vmatpush.msrb.mxu3 %v2204_v28 }
 0x4a5   :  { %2299 = vmatpush.msra.mxu0 %v2197_v22  ;;  %2322 = vmatpush.msrb.mxu1 %v2198_v30 }
 0x4a6   :  { %2368 = vmatpush.msrb.mxu3 %v2200_v32 }
 0x4a7   :  { %2300 = vmatpush.msra.mxu0 %v2193_v15  ;;  %2323 = vmatpush.msrb.mxu1 %v2194_v41  ;;  %v7631_v41 = vld [vmem:[#allocation22_spill] sm:$0xff] }
 0x4a9   :  { %2301 = vmatpush.msra.mxu0 %v2189_v60  ;;  %2324 = vmatpush.msrb.mxu1 %v2190_v3 }
 0x4ab   :  { %2302 = vmatpush.msra.mxu0 %v2185_v63  ;;  %2325 = vmatpush.msrb.mxu1 %v2186_v25 }
 0x508   :  { %v1816_v10 = vpop.f32.mrf.mxu1  ;;  %v1796_v48 = vpop.f32.mrf.mxu0 }
 0x509   :  { %v1863_v21 = vrot.slane %v1816_v10, 6  ;;  %v2203_v10 = vld [vmem:[#allocation4 + $0x290] sm:$0xff] }
 0x50a   :  { %2344 = vmatpush.msra.mxu2 %v2203_v10 }
 0x50b   :  { %v1866_v4 = vsel %vm281_vm5, %v1796_v48, %v1863_v21  ;;  %v2199_v21 = vld [vmem:[#allocation4 + $0x270] sm:$0xff] }
 0x50c   :  { %2345 = vmatpush.msra.mxu2 %v2199_v21 }
 0x50f   :  { %v1836_v39 = vpop.f32.mrf.mxu2  ;;  %v1856_v14 = vpop.f32.mrf.mxu3 }
 0x510   :  { %v1864_v46 = vrot.slane %v1836_v39, 4  ;;  %v1865_v50 = vrot.slane %v1856_v14, 2  ;;  %v2195_v39 = vld [vmem:[#allocation4 + $0x250] sm:$0xff]  ;;  %v2196_v14 = vld [vmem:[#allocation4 + $0x258] sm:$0xff] }
 0x511   :  { %2346 = vmatpush.msra.mxu2 %v2195_v39  ;;  %2369 = vmatpush.msrb.mxu3 %v2196_v14  ;;  %v316_v39 = vrot.slane %v7631_v41, 6 }
 0x512   :  { %v1867_v49 = vsel %vm283_vm2, %v1864_v46, %v1865_v50  ;;  %v2191_v46 = vld [vmem:[#allocation4 + $0x230] sm:$0xff] }
 0x513   :  { %v1868_v57 = vsel %vm285_vm6, %v1866_v4, %v1867_v49  ;;  %2347 = vmatpush.msra.mxu2 %v2191_v46  ;;  %2370 = vmatpush.msrb.mxu3 %v2192_v2  ;;  %v2187_v49 = vld [vmem:[#allocation4 + $0x210] sm:$0xff] }
 0x514   :  { %v6156_v45 = vadd.f32 %v1868_v57, %v312_v47 }
 0x515   :  { %2348 = vmatpush.msra.mxu2 %v2187_v49  ;;  %2371 = vmatpush.msrb.mxu3 %v2188_v54 }
 0x516   :  { %v4506_v35 = vmul.f32 -1.442695, %v6156_v45  ;;  %v1891_v1 = vrot.slane %v6156_v45, 2  ;;  %v1915_v58 = vrot.slane %v6156_v45, 6  ;;  %v1912_v48 = vrot.slane %v6156_v45, 4 }
 0x518   :  { %4652 = vpow2.f32 %v4506_v35  ;;  %v4507_v20 = vmul.f32 -1.442695, %v1891_v1  ;;  %v4508_v53 = vmul.f32 -1.442695, %v1915_v58 }
 0x51a   :  { %4654 = vpow2.f32 %v4507_v20 }
 0x51b   :  { %4656 = vpow2.f32 %v4508_v53 }
 0x51e   :  { %v4653_v51 = vpop.eup %4652 }
 0x51f   :  { %v6161_v43 = vadd.f32 1.0, %v4653_v51  ;;  %v2283_v51 = vld.sshfl [vmem:[#allocation1] sm:$0xff pattern:$0x73625140] }
 0x520   :  { %v4655_v62 = vpop.eup %4654 }
 0x521   :  { %v4657_v17 = vpop.eup %4656  ;;  %4658 = vrcp.f32 %v6161_v43  ;;  %v6164_v16 = vadd.f32 1.0, %v4655_v62  ;;  %v1886_v29 = vand.u32 2147483648, %v6161_v43  ;;  %v1884_v45 = vand.u32 2147483647, %v6161_v43 }
 0x522   :  { %v6166_v27 = vadd.f32 1.0, %v4657_v17  ;;  %vm1880_vm9 = vweird.f32 %v6161_v43 }
 0x523   :  { %4660 = vrcp.f32 %v6164_v16  ;;  %v1908_v6 = vand.u32 2147483648, %v6164_v16  ;;  %v1906_v24 = vand.u32 2147483647, %v6164_v16  ;;  %v1887_v35 = vor.u32 1.1754944e-38, %v1886_v29 }
 0x524   :  { %4662 = vrcp.f32 %v6166_v27  ;;  %vm1885_vm12 = vcmp.eq.f32.partialorder %v1884_v45, 8.507059e+37  ;;  %vm1902_vm13 = vweird.f32 %v6164_v16  ;;  %v1932_v5 = vand.u32 2147483648, %v6166_v27 }
 0x525   :  { %4664 = vtanh.f32 %v1912_v48  ;;  %v1909_v13 = vor.u32 1.1754944e-38, %v1908_v6  ;;  %vm1907_vm15 = vcmp.eq.f32.partialorder %v1906_v24, 8.507059e+37  ;;  %v1930_v11 = vand.u32 2147483647, %v6166_v27  ;;  %v6230_v6 = vld [vmem:[#allocation7 + $0x3f0] sm:$0xff] }
 0x526   :  { %v1933_v7 = vor.u32 1.1754944e-38, %v1932_v5  ;;  %v6271_v5 = vld [vmem:[#allocation7 + $0x390] sm:$0xff] }
 0x527   :  { %v4659_v55 = vpop.eup %4658 }
 0x528   :  { %v1876_v50 = vmul.f32 %v4659_v55, %v6161_v43  ;;  %vm1881_vm8 = vweird.f32 %v4659_v55  ;;  %v6190_v43 = vld [vmem:[%s7477_s5 + $0x4] sm:$0xf]  ;;  %s4951_s5 = smov 8  }
 0x529   :  { %v4661_v40 = vpop.eup %4660  ;;  %vm1882_vm11 = vmor %vm1880_vm9, %vm1881_vm8  ;;  %vm1926_vm9 = vweird.f32 %v6166_v27  ;;  %7630 = vst [vmem:[#allocation24_spill] sm:$0xff] %v6190_v43  ;;  %v7520_v10 = vperm.slane %v6190_v43, 1  ;;  %v7517_v63 = vperm.slane %v6190_v43, 3 }
 0x52a   :  { %v4663_v4 = vpop.eup %4662  ;;  %v1877_v23 = vsub.f32 1.0, %v1876_v50  ;;  %v1898_v47 = vmul.f32 %v4661_v40, %v6164_v16  ;;  %vm1903_vm10 = vweird.f32 %v4661_v40  ;;  %v7519_v16 = vperm.slane %v6190_v43, 0 }
 0x52b   :  { %v1922_v57 = vmul.f32 %v4663_v4, %v6166_v27  ;;  %vm1904_vm14 = vmor %vm1902_vm13, %vm1903_vm10  ;;  %v4665_v20 = vpop.eup %4664  ;;  %vm1927_vm8 = vweird.f32 %v4663_v4  ;;  %v7518_v50 = vperm.slane %v6190_v43, 2  ;;  %v6461_v43 = vld [vmem:[#allocation7 + $0x218] sm:$0xff] }
 0x52c   :  { %v1899_v61 = vsub.f32 1.0, %v1898_v47  ;;  %v1878_v33 = vmul.f32 %v4659_v55, %v1877_v23  ;;  %vm1928_vm10 = vmor %vm1926_vm9, %vm1927_vm8  ;;  %7646 = vst [vmem:[#allocation23_spill] sm:$0xff] %v6461_v43 }
 0x52d   :  { %v1923_v1 = vsub.f32 1.0, %v1922_v57 }
 0x52e   :  { %v1879_v52 = vadd.f32 %v4659_v55, %v1878_v33  ;;  %v1900_v42 = vmul.f32 %v4661_v40, %v1899_v61 }
 0x52f   :  { %v1924_v56 = vmul.f32 %v4663_v4, %v1923_v1  ;;  %v6245_v1 = vld [vmem:[#allocation7 + $0x3d0] sm:$0xff] }
 0x530   :  { %v1883_v58 = vsel %vm1882_vm11, %v4659_v55, %v1879_v52  ;;  %v1901_v9 = vadd.f32 %v4661_v40, %v1900_v42  ;;  %vm1931_vm11 = vcmp.eq.f32.partialorder %v1930_v11, 8.507059e+37  ;;  %v6232_v52 = vld [vmem:[#allocation7 + $0x3f8] sm:$0xff] }
 0x531   :  { %v1888_v18 = vsel %vm1885_vm12, %v1887_v35, %v1883_v58  ;;  %v1925_v12 = vadd.f32 %v4663_v4, %v1924_v56  ;;  %v6247_v58 = vld [vmem:[#allocation7 + $0x3d8] sm:$0xff] }
 0x532   :  { %v1905_v44 = vsel %vm1904_vm14, %v4661_v40, %v1901_v9  ;;  %v1937_v26 = vmul.f32 %v4665_v20, %v1888_v18  ;;  %v6259_v20 = vld [vmem:[#allocation7 + $0x3b0] sm:$0xff]  ;;  %v6273_v11 = vld [vmem:[#allocation7 + $0x398] sm:$0xff] }
 0x533   :  { %v1910_v53 = vsel %vm1907_vm15, %v1909_v13, %v1905_v44  ;;  %v1929_v19 = vsel %vm1928_vm10, %v4663_v4, %v1925_v12  ;;  %v6269_v12 = vld [vmem:[#allocation7 + $0x3e8] sm:$0xff] }
 0x534   :  { %v1936_v0 = vmul.f32 %v1910_v53, %v6117_v37  ;;  %v1934_v31 = vsel %vm1931_vm11, %v1933_v7, %v1929_v19  ;;  %v6261_v53 = vld [vmem:[#allocation7 + $0x3b8] sm:$0xff] }
 0x536   :  { %v6181_v38 = vadd.f32 %v1937_v26, %v1936_v0 }
 0x538   :  { %4666 = vtanh.f32 %v6181_v38 }
 0x53e   :  { %v4667_v8 = vpop.eup %4666 }
 0x53f   :  { %v1940_v37 = vmul.f32 %v4667_v8, %v1934_v31  ;;  %v6282_v8 = vld [vmem:[#allocation7 + $0x3e0] sm:$0xff]  ;;  %v6284_v31 = vld [vmem:[#allocation7 + $0x3c8] sm:$0xff] }
 0x541   :  { %1942 = vst [vmem:[#allocation2 + $0xc] sm:$0x3] %v1940_v37  ;;  %2025 = vmatmul.f32.vlgmr.msrb.gmra.mxu0 %v1940_v37  ;;  %2045 = vmatmul.f32.vlgmr.msra.gmra.mxu1 %v1940_v37 }
 0x542   :  { %2065 = vmatmul.f32.vlgmr.msrb.gmra.mxu2 %v1940_v37  ;;  %2085 = vmatmul.f32.vlgmr.msra.gmra.mxu3 %v1940_v37  ;;  %v6286_v37 = vld [vmem:[#allocation7 + $0x370] sm:$0xff] }
 0x543   :  { %2549 = vmatpush.msrb.mxu2 %v6230_v6  ;;  %2569 = vmatpush.msra.mxu3 %v6232_v52 }
 0x544   :  { %2529 = vmatpush.msra.mxu1 %v6269_v12  ;;  %2509 = vmatpush.msrb.mxu0 %v6282_v8 }
 0x545   :  { %2550 = vmatpush.msrb.mxu2 %v6245_v1  ;;  %2570 = vmatpush.msra.mxu3 %v6247_v58 }
 0x546   :  { %2530 = vmatpush.msra.mxu1 %v6284_v31 }
 0x547   :  { %2551 = vmatpush.msrb.mxu2 %v6259_v20  ;;  %2571 = vmatpush.msra.mxu3 %v6261_v53 }
 0x548   :  { %v2182_v59 = vld [vmem:[#allocation2 + $0xc] sm:$0x3] }
 0x549   :  { %2280 = vst [vmem:[#allocation1 + $0x22] ss:$4 sm:$0xff] %v2182_v59  ;;  %2303 = vmatmul.f32.vlgmr.msra.gmra.mxu0 %v2283_v51  ;;  %2326 = vmatmul.f32.vlgmr.msrb.gmra.mxu1 %v2283_v51  ;;  %v6291_v59 = vld [vmem:[#allocation7 + $0x378] sm:$0xff] }
 0x54a   :  { %2349 = vmatmul.f32.vlgmr.msra.gmra.mxu2 %v2283_v51  ;;  %2372 = vmatmul.f32.vlgmr.msrb.gmra.mxu3 %v2283_v51  ;;  %v6296_v51 = vld [vmem:[#allocation7 + $0x3c0] sm:$0xff] }
 0x54b   :  { %2552 = vmatpush.msrb.mxu2 %v6271_v5  ;;  %2572 = vmatpush.msra.mxu3 %v6273_v11 }
 0x54c   :  { %2510 = vmatpush.msrb.mxu0 %v6296_v51 }
 0x54d   :  { %2553 = vmatpush.msrb.mxu2 %v6286_v37  ;;  %2573 = vmatpush.msra.mxu3 %v6291_v59 }
 0x5be   :  { %v2026_v34 = vpop.f32.mrf.mxu0  ;;  %v2046_v36 = vpop.f32.mrf.mxu1 }
 0x5bf   :  { %v2093_v28 = vrot.slane %v2046_v36, 6  ;;  %v6300_v36 = vld [vmem:[#allocation7 + $0x350] sm:$0xff] }
 0x5c0   :  { %2554 = vmatpush.msrb.mxu2 %v6300_v36 }
 0x5c1   :  { %v2096_v15 = vsel %vm281_vm5, %v2026_v34, %v2093_v28  ;;  %v6298_v34 = vld [vmem:[#allocation7 + $0x3a8] sm:$0xff]  ;;  %v6304_v28 = vld [vmem:[#allocation7 + $0x358] sm:$0xff] }
 0x5c2   :  { %2531 = vmatpush.msra.mxu1 %v6298_v34  ;;  %2574 = vmatpush.msra.mxu3 %v6304_v28 }
 0x5c5   :  { %v2066_v62 = vpop.f32.mrf.mxu2  ;;  %v2086_v17 = vpop.f32.mrf.mxu3 }
 0x5c6   :  { %v2094_v27 = vrot.slane %v2066_v62, 4  ;;  %v2095_v22 = vrot.slane %v2086_v17, 2  ;;  %v2304_v30 = vpop.f32.mrf.mxu0  ;;  %v2327_v21 = vpop.f32.mrf.mxu1  ;;  %v6310_v17 = vld [vmem:[#allocation7 + $0x3a0] sm:$0xff] }
 0x5c7   :  { %v2328_v32 = vadd.f32 %v2327_v21, %v7520_v10  ;;  %v6202_v60 = vadd.f32 %v2304_v30, %v7519_v16  ;;  %2511 = vmatpush.msrb.mxu0 %v6310_v17  ;;  %v6320_v21 = vld [vmem:[#allocation7 + $0x338] sm:$0xff] }
 0x5c8   :  { %v2097_v14 = vsel %vm283_vm2, %v2094_v27, %v2095_v22  ;;  %v6312_v27 = vld [vmem:[#allocation7 + $0x388] sm:$0xff]  ;;  %v6314_v22 = vld [vmem:[#allocation7 + $0x330] sm:$0xff]  ;;  %2575 = vmatpush.msra.mxu3 %v6320_v21 }
 0x5c9   :  { %v2098_v55 = vsel %vm285_vm6, %v2096_v15, %v2097_v14  ;;  %7632 = vst [vmem:[#allocation25_spill] sm:$0xff] %v6202_v60  ;;  %v6204_v3 = vrot.slane %v2328_v32, 6  ;;  %2532 = vmatpush.msra.mxu1 %v6312_v27  ;;  %2555 = vmatpush.msrb.mxu2 %v6314_v22  ;;  %v6324_v32 = vld [vmem:[#allocation7 + $0x380] sm:$0xff]  ;;  %v6326_v15 = vld [vmem:[#allocation7 + $0x368] sm:$0xff] }
 0x5ca   :  { %v6206_v46 = vadd.f32 %v2098_v55, %v316_v39  ;;  %2512 = vmatpush.msrb.mxu0 %v6324_v32  ;;  %v6334_v55 = vld [vmem:[#allocation7 + $0x310] sm:$0xff] }
 0x5cb   :  { %7633 = vst [vmem:[#allocation26_spill] sm:$0xff] %v6204_v3  ;;  %v2396_v2 = vsel %vm287_vm3, %v6202_v60, %v6204_v3  ;;  %v2400_v40 = vsel %vm283_vm2, %v6202_v60, %v6204_v3  ;;  %v2404_v48 = vsel %vm289_vm4, %v6204_v3, %v6202_v60  ;;  %2533 = vmatpush.msra.mxu1 %v6326_v15  ;;  %v6443_v60 = vld [vmem:[#allocation7 + $0x288] sm:$0xff]  ;;  %v6445_v3 = vld [vmem:[#allocation7 + $0x230] sm:$0xff] }
 0x5cc   :  { %v4509_v25 = vmul.f32 -1.442695, %v6206_v46  ;;  %v2121_v4 = vrot.slane %v6206_v46, 2  ;;  %v2145_v23 = vrot.slane %v6206_v46, 6  ;;  %v2142_v14 = vrot.slane %v6206_v46, 4  ;;  %2556 = vmatpush.msrb.mxu2 %v6334_v55  ;;  %v6346_v46 = vld [vmem:[#allocation7 + $0x348] sm:$0xff] }
 0x5cd   :  { %v2350_v47 = vpop.f32.mrf.mxu2  ;;  %v2373_v49 = vpop.f32.mrf.mxu3  ;;  %2534 = vmatpush.msra.mxu1 %v6346_v46  ;;  %7643 = vst [vmem:[#allocation18_spill] sm:$0xff] %v6445_v3 }
 0x5ce   :  { %4668 = vpow2.f32 %v4509_v25  ;;  %v4510_v54 = vmul.f32 -1.442695, %v2121_v4  ;;  %v4511_v29 = vmul.f32 -1.442695, %v2145_v23  ;;  %v2351_v57 = vadd.f32 %v2350_v47, %v7518_v50  ;;  %v6348_v4 = vld [vmem:[#allocation7 + $0x2f0] sm:$0xff]  ;;  %v6350_v23 = vld [vmem:[#allocation7 + $0x2f8] sm:$0xff] }
 0x5cf   :  { %v2374_v61 = vadd.f32 %v2373_v49, %v7517_v63  ;;  %2557 = vmatpush.msrb.mxu2 %v6348_v4  ;;  %v6395_v50 = vld [vmem:[#allocation7 + $0x2e8] sm:$0xff] }
 0x5d0   :  { %4670 = vpow2.f32 %v4510_v54  ;;  %v6226_v33 = vrot.slane %v2351_v57, 4  ;;  %v6361_v57 = vld [vmem:[#allocation7 + $0x328] sm:$0xff] }
 0x5d1   :  { %4672 = vpow2.f32 %v4511_v29  ;;  %v6228_v45 = vrot.slane %v2374_v61, 2  ;;  %v6359_v29 = vld [vmem:[#allocation7 + $0x340] sm:$0xff]  ;;  %2535 = vmatpush.msra.mxu1 %v6361_v57  ;;  %v6419_v61 = vld [vmem:[#allocation7 + $0x2c8] sm:$0xff] }
 0x5d2   :  { %7634 = vst [vmem:[#allocation27_spill] sm:$0xff] %v6226_v33 }
 0x5d3   :  { %7635 = vst [vmem:[#allocation28_spill] sm:$0xff] %v6228_v45  ;;  %v2397_v42 = vsel %vm289_vm4, %v6228_v45, %v6226_v33  ;;  %v2401_v24 = vsel %vm281_vm5, %v6226_v33, %v6228_v45  ;;  %v2405_v35 = vsel %vm287_vm3, %v6226_v33, %v6228_v45  ;;  %v6459_v45 = vld [vmem:[#allocation7 + $0x210] sm:$0xff] }
 0x5d4   :  { %v4669_v9 = vpop.eup %4668  ;;  %v6252_v18 = vsel %vm291_vm7, %v2396_v2, %v2397_v42  ;;  %v6255_v13 = vsel %vm285_vm6, %v2401_v24, %v2400_v40  ;;  %v6264_v56 = vsel %vm291_vm7, %v2405_v35, %v2404_v48  ;;  %v6336_v2 = vld [vmem:[#allocation7 + $0x318] sm:$0xff]  ;;  %v6338_v40 = vld [vmem:[#allocation7 + $0x360] sm:$0xff]  ;;  %v6372_v35 = vld [vmem:[#allocation7 + $0x2d0] sm:$0xff]  ;;  %7645 = vst [vmem:[#allocation20_spill] sm:$0xff] %v6459_v45 }
 0x5d5   :  { %7636 = vst [vmem:[#allocation29_spill] sm:$0xff] %v6252_v18  ;;  %v6257_v44 = vadd.f32 1.0, %v4669_v9  ;;  %2576 = vmatpush.msra.mxu3 %v6336_v2  ;;  %2513 = vmatpush.msrb.mxu0 %v6338_v40  ;;  %v6374_v9 = vld [vmem:[#allocation7 + $0x2d8] sm:$0xff] }
 0x5d6   :  { %7637 = vst [vmem:[#allocation30_spill] sm:$0xff] %v6255_v13  ;;  %v4671_v0 = vpop.eup %4670  ;;  %2558 = vmatpush.msrb.mxu2 %v6372_v35  ;;  %v6404_v13 = vld [vmem:[#allocation7 + $0x298] sm:$0xff] }
 0x5d7   :  { %7638 = vst [vmem:[#allocation31_spill] sm:$0xff] %v6264_v56  ;;  %v4673_v26 = vpop.eup %4672  ;;  %4674 = vrcp.f32 %v6257_v44  ;;  %v6275_v19 = vadd.f32 1.0, %v4671_v0  ;;  %vm2110_vm13 = vweird.f32 %v6257_v44  ;;  %v2116_v49 = vand.u32 2147483648, %v6257_v44  ;;  %2577 = vmatpush.msra.mxu3 %v6350_v23  ;;  %2514 = vmatpush.msrb.mxu0 %v6359_v29  ;;  %v6402_v56 = vld [vmem:[#allocation7 + $0x290] sm:$0xff] }
 0x5d8   :  { %v6277_v7 = vadd.f32 1.0, %v4673_v26  ;;  %v2114_v42 = vand.u32 2147483647, %v6257_v44 }
 0x5d9   :  { %4676 = vrcp.f32 %v6275_v19  ;;  %v2138_v26 = vand.u32 2147483648, %v6275_v19  ;;  %v2136_v63 = vand.u32 2147483647, %v6275_v19  ;;  %2578 = vmatpush.msra.mxu3 %v6374_v9  ;;  %v2117_v10 = vor.u32 1.1754944e-38, %v2116_v49 }
 0x5da   :  { %4678 = vrcp.f32 %v6277_v7  ;;  %vm2115_vm8 = vcmp.eq.f32.partialorder %v2114_v42, 8.507059e+37  ;;  %vm2132_vm9 = vweird.f32 %v6275_v19 }
 0x5db   :  { %4680 = vtanh.f32 %v2142_v14  ;;  %v6391_v14 = vld [vmem:[#allocation7 + $0x2b8] sm:$0xff]  ;;  %v2139_v49 = vor.u32 1.1754944e-38, %v2138_v26  ;;  %vm2137_vm11 = vcmp.eq.f32.partialorder %v2136_v63, 8.507059e+37  ;;  %v6428_v63 = vld [vmem:[#allocation7 + $0x2c0] sm:$0xff] }
 0x5dc   :  { %2579 = vmatpush.msra.mxu3 %v6391_v14 }
 0x5dd   :  { %v6306_v62 = vpop.eup %4674 }
 0x5de   :  { %v2106_v30 = vmul.f32 %v6306_v62, %v6257_v44  ;;  %vm2111_vm12 = vweird.f32 %v6306_v62  ;;  %v6382_v44 = vld [vmem:[#allocation7 + $0x308] sm:$0xff]  ;;  %2580 = vmatpush.msra.mxu3 %v6404_v13 }
 0x5df   :  { %v6328_v41 = vpop.eup %4676  ;;  %vm6365_vm14 = vmor %vm2110_vm13, %vm2111_vm12  ;;  %2536 = vmatpush.msra.mxu1 %v6382_v44  ;;  %vm2173_vm12 = vcmask 254976  }
 0x5e0   :  { %v2107_v39 = vsub.f32 1.0, %v2106_v30  ;;  %v6340_v48 = vpop.eup %4678  ;;  %v2128_v25 = vmul.f32 %v6328_v41, %v6275_v19  ;;  %v6380_v30 = vld [vmem:[#allocation7 + $0x320] sm:$0xff]  ;;  %vm2133_vm15 = vweird.f32 %v6328_v41 }
 0x5e1   :  { %v2152_v54 = vmul.f32 %v6340_v48, %v6277_v7  ;;  %2515 = vmatpush.msrb.mxu0 %v6380_v30  ;;  %vm2134_vm10 = vmor %vm2132_vm9, %vm2133_vm15  ;;  %2537 = vmatpush.msra.mxu1 %v6395_v50  ;;  %v6417_v19 = vld [vmem:[#allocation7 + $0x2e0] sm:$0xff]  ;;  %vm2157_vm13 = vweird.f32 %v6340_v48 }
 0x5e2   :  { %v2108_v47 = vmul.f32 %v6306_v62, %v2107_v39  ;;  %v2129_v24 = vsub.f32 1.0, %v2128_v25  ;;  %v6384_v39 = vld [vmem:[#allocation7 + $0x2b0] sm:$0xff] }
 0x5e3   :  { %2559 = vmatpush.msrb.mxu2 %v6384_v39  ;;  %2538 = vmatpush.msra.mxu1 %v6419_v61 }
 0x5e4   :  { %v2109_v0 = vadd.f32 %v6306_v62, %v2108_v47  ;;  %v2130_v25 = vmul.f32 %v6328_v41, %v2129_v24  ;;  %v6393_v47 = vld [vmem:[#allocation7 + $0x300] sm:$0xff]  ;;  %v2153_v24 = vsub.f32 1.0, %v2152_v54 }
 0x5e5   :  { %2516 = vmatpush.msrb.mxu0 %v6393_v47  ;;  %2560 = vmatpush.msrb.mxu2 %v6402_v56 }
 0x5e6   :  { %v2113_v16 = vsel %vm6365_vm14, %v6306_v62, %v2109_v0  ;;  %v2131_v18 = vadd.f32 %v6328_v41, %v2130_v25  ;;  %v2154_v0 = vmul.f32 %v6340_v48, %v2153_v24  ;;  %v6437_v24 = vld [vmem:[#allocation7 + $0x258] sm:$0xff]  ;;  %vm2156_vm14 = vweird.f32 %v6277_v7 }
 0x5e7   :  { %v2118_v62 = vsel %vm2115_vm8, %v2117_v10, %v2113_v16  ;;  %v6421_v10 = vld [vmem:[#allocation7 + $0x270] sm:$0xff]  ;;  %v4681_v16 = vpop.eup %4680  ;;  %2517 = vmatpush.msrb.mxu0 %v6417_v19  ;;  %7642 = vst [vmem:[#allocation33_spill] sm:$0xff] %v6437_v24  ;;  %vm6470_vm15 = vmor %vm2156_vm14, %vm2157_vm13 }
 0x5e8   :  { %v2135_v54 = vsel %vm2134_vm10, %v6328_v41, %v2131_v18  ;;  %v6426_v18 = vld [vmem:[#allocation7 + $0x278] sm:$0xff]  ;;  %v6430_v41 = vld [vmem:[#allocation7 + $0x2a8] sm:$0xff]  ;;  %v2167_v25 = vmul.f32 %v4681_v16, %v2118_v62  ;;  %2561 = vmatpush.msrb.mxu2 %v6421_v10  ;;  %v6452_v16 = vld [vmem:[#allocation7 + $0x280] sm:$0xff]  ;;  %v2155_v33 = vadd.f32 %v6340_v48, %v2154_v0 }
 0x5e9   :  { %v2140_v42 = vsel %vm2137_vm11, %v2139_v49, %v2135_v54  ;;  %2581 = vmatpush.msra.mxu3 %v6426_v18  ;;  %v6435_v49 = vld [vmem:[#allocation7 + $0x250] sm:$0xff]  ;;  %v6439_v54 = vld [vmem:[#allocation7 + $0x2a0] sm:$0xff]  ;;  %2518 = vmatpush.msrb.mxu0 %v6428_v63 }
 0x5ea   :  { %v2166_v26 = vmul.f32 %v2140_v42, %v6181_v38  ;;  %7641 = vst [vmem:[#allocation32_spill] sm:$0xff] %v6435_v49  ;;  %2539 = vmatpush.msra.mxu1 %v6430_v41  ;;  %v6447_v38 = vld [vmem:[#allocation7 + $0x238] sm:$0xff]  ;;  %2562 = vmatpush.msrb.mxu2 %v6435_v49  ;;  %v6454_v42 = vld [vmem:[#allocation7 + $0x268] sm:$0xff]  ;;  %v6500_v0 = vld [vmem:[#allocation7 + $0x200] sm:$0xff] }
 0x5eb   :  { %7644 = vst [vmem:[#allocation19_spill] sm:$0xff] %v6447_v38  ;;  %2582 = vmatpush.msra.mxu3 %v6437_v24  ;;  %2519 = vmatpush.msrb.mxu0 %v6439_v54  ;;  %v2159_v24 = vsel %vm6470_vm15, %v6340_v48, %v2155_v33 }
 0x5ec   :  { %v2168_v62 = vadd.f32 %v2167_v25, %v2166_v26  ;;  %2540 = vmatpush.msra.mxu1 %v6443_v60  ;;  %v2162_v26 = vand.u32 2147483648, %v6277_v7  ;;  %2563 = vmatpush.msrb.mxu2 %v6445_v3  ;;  %v2160_v25 = vand.u32 2147483647, %v6277_v7  ;;  %v6479_v3 = vld [vmem:[#allocation7 + $0x260] sm:$0xff]  ;;  %v6490_v7 = vld [vmem:[#allocation7 + $0x228] sm:$0xff] }
 0x5ed   :  { %2583 = vmatpush.msra.mxu3 %v6447_v38  ;;  %2520 = vmatpush.msrb.mxu0 %v6452_v16  ;;  %v6481_v38 = vld [vmem:[#allocation7 + $0x248] sm:$0xff] }
 0x5ee   :  { %4682 = vtanh.f32 %v2168_v62  ;;  %2175 = vst.msk [vmem:[#allocation12] sm:$0x3] %vm2173_vm12, %v2168_v62  ;;  %2541 = vmatpush.msra.mxu1 %v6454_v42  ;;  %2564 = vmatpush.msrb.mxu2 %v6459_v45  ;;  %v6483_v62 = vld [vmem:[#allocation7 + $0x240] sm:$0xff]  ;;  %v2163_v49 = vor.u32 1.1754944e-38, %v2162_v26  ;;  %vm2161_vm8 = vcmp.eq.f32.partialorder %v2160_v25, 8.507059e+37 }
 0x5ef   :  { %2584 = vmatpush.msra.mxu3 %v6461_v43  ;;  %2521 = vmatpush.msrb.mxu0 %v6479_v3  ;;  %v6492_v45 = vld [vmem:[#allocation7 + $0x220] sm:$0xff]  ;;  %v6494_v43 = vld [vmem:[#allocation7 + $0x208] sm:$0xff] }
 0x5f0   :  { %2542 = vmatpush.msra.mxu1 %v6481_v38  ;;  %2777 = vmatpush.msra.mxu2 %v6230_v6  ;;  %v2164_v48 = vsel %vm2161_vm8, %v2163_v49, %v2159_v24  ;;  %v4513_v25 = vld [vmem:[%s7478_s6 + $0x2] sm:$0x3] }
 0x5f1   :  { %2797 = vmatpush.msrb.mxu3 %v6232_v52  ;;  %2522 = vmatpush.msrb.mxu0 %v6483_v62 }
 0x5f2   :  { %2543 = vmatpush.msra.mxu1 %v6490_v7  ;;  %2778 = vmatpush.msra.mxu2 %v6245_v1 }
 0x5f3   :  { %2798 = vmatpush.msrb.mxu3 %v6247_v58  ;;  %2523 = vmatpush.msrb.mxu0 %v6492_v45 }
 0x5f4   :  { %v4683_v33 = vpop.eup %4682  ;;  %2544 = vmatpush.msra.mxu1 %v6494_v43  ;;  %2779 = vmatpush.msra.mxu2 %v6259_v20 }
 0x5f5   :  { %v2170_v26 = vmul.f32 %v4683_v33, %v2164_v48  ;;  %2524 = vmatpush.msrb.mxu0 %v6500_v0  ;;  %2799 = vmatpush.msrb.mxu3 %v6261_v53  ;;  %v7649_v33 = vld [vmem:[#allocation32_spill] sm:$0xff]  ;;  %v7650_v48 = vld [vmem:[#allocation33_spill] sm:$0xff] }
 0x5f6   :  { %2757 = vmatpush.msrb.mxu1 %v6269_v12  ;;  %2780 = vmatpush.msra.mxu2 %v6271_v5 }
 0x5f7   :  { %2172 = vst [vmem:[#allocation2 + $0xe] sm:$0x3] %v2170_v26  ;;  %2737 = vmatpush.msra.mxu0 %v6282_v8  ;;  %2800 = vmatpush.msrb.mxu3 %v6273_v11 }
 0x5f8   :  { %2758 = vmatpush.msrb.mxu1 %v6284_v31  ;;  %2174 = vst.msk [vmem:[#allocation10] sm:$0x3] %vm2173_vm12, %v2170_v26  ;;  %2781 = vmatpush.msra.mxu2 %v6286_v37  ;;  %v7651_v26 = vld [vmem:[#allocation18_spill] sm:$0xff] }
 0x5f9   :  { %2738 = vmatpush.msra.mxu0 %v6296_v51  ;;  %2801 = vmatpush.msrb.mxu3 %v6291_v59 }
 0x5fa   :  { %2759 = vmatpush.msrb.mxu1 %v6298_v34  ;;  %2782 = vmatpush.msra.mxu2 %v6300_v36 }
 0x5fb   :  { %2739 = vmatpush.msra.mxu0 %v6310_v17  ;;  %2802 = vmatpush.msrb.mxu3 %v6304_v28 }
 0x5fc   :  { %2760 = vmatpush.msrb.mxu1 %v6312_v27  ;;  %2783 = vmatpush.msra.mxu2 %v6314_v22 }
 0x5fd   :  { %2740 = vmatpush.msra.mxu0 %v6324_v32  ;;  %2803 = vmatpush.msrb.mxu3 %v6320_v21 }
 0x5fe   :  { %v2183_v49 = vld [vmem:[#allocation2 + $0xe] sm:$0x3]  ;;  %2761 = vmatpush.msrb.mxu1 %v6326_v15  ;;  %2784 = vmatpush.msra.mxu2 %v6334_v55 }
 0x5ff   :  { %2282 = vst [vmem:[#allocation1 + $0x23] ss:$4 sm:$0xff] %v2183_v49  ;;  %2741 = vmatpush.msra.mxu0 %v6338_v40  ;;  %2804 = vmatpush.msrb.mxu3 %v6336_v2  ;;  %v7652_v49 = vld [vmem:[#allocation19_spill] sm:$0xff] }
 0x600   :  { %2762 = vmatpush.msrb.mxu1 %v6346_v46  ;;  %2785 = vmatpush.msra.mxu2 %v6348_v4 }
 0x601   :  { %2742 = vmatpush.msra.mxu0 %v6359_v29  ;;  %2805 = vmatpush.msrb.mxu3 %v6350_v23 }
 0x602   :  { %2763 = vmatpush.msrb.mxu1 %v6361_v57  ;;  %2786 = vmatpush.msra.mxu2 %v6372_v35 }
 0x603   :  { %2743 = vmatpush.msra.mxu0 %v6380_v30  ;;  %2806 = vmatpush.msrb.mxu3 %v6374_v9 }
 0x604   :  { %2764 = vmatpush.msrb.mxu1 %v6382_v44  ;;  %2787 = vmatpush.msra.mxu2 %v6384_v39 }
 0x605   :  { %2744 = vmatpush.msra.mxu0 %v6393_v47  ;;  %2807 = vmatpush.msrb.mxu3 %v6391_v14 }
 0x606   :  { %v2284_v24 = vld.sshfl [vmem:[#allocation1 + $0x20] sm:$0xff pattern:$0x73625140]  ;;  %2765 = vmatpush.msrb.mxu1 %v6395_v50  ;;  %2788 = vmatpush.msra.mxu2 %v6402_v56 }
 0x607   :  { %2306 = vmatmul.f32.gmra.mxu0 %v2284_v24  ;;  %2329 = vmatmul.f32.gmra.mxu1 %v2284_v24 }
 0x608   :  { %2352 = vmatmul.f32.gmra.mxu2 %v2284_v24  ;;  %2375 = vmatmul.f32.gmra.mxu3 %v2284_v24  ;;  %v7653_v24 = vld [vmem:[#allocation20_spill] sm:$0xff] }
 0x609   :  { %2745 = vmatpush.msra.mxu0 %v6417_v19  ;;  %2766 = vmatpush.msrb.mxu1 %v6419_v61 }
 0x60a   :  { %2808 = vmatpush.msrb.mxu3 %v6404_v13  ;;  %2789 = vmatpush.msra.mxu2 %v6421_v10 }
 0x60b   :  { %2746 = vmatpush.msra.mxu0 %v6428_v63  ;;  %2767 = vmatpush.msrb.mxu1 %v6430_v41 }
 0x60c   :  { %2809 = vmatpush.msrb.mxu3 %v6426_v18  ;;  %2790 = vmatpush.msra.mxu2 %v7649_v33 }
 0x60d   :  { %2747 = vmatpush.msra.mxu0 %v6439_v54  ;;  %2768 = vmatpush.msrb.mxu1 %v6443_v60 }
 0x60e   :  { %2810 = vmatpush.msrb.mxu3 %v7650_v48  ;;  %2791 = vmatpush.msra.mxu2 %v7651_v26 }
 0x60f   :  { %2545 = vmatmul.f32.vlgmr.msra.gmra.mxu1 %v4513_v25  ;;  %2525 = vmatmul.f32.vlgmr.msrb.gmra.mxu0 %v4513_v25 }
 0x610   :  { %2565 = vmatmul.f32.vlgmr.msrb.gmra.mxu2 %v4513_v25  ;;  %2585 = vmatmul.f32.vlgmr.msra.gmra.mxu3 %v4513_v25  ;;  %v7654_v25 = vld [vmem:[#allocation23_spill] sm:$0xff] }
 0x611   :  { %2748 = vmatpush.msra.mxu0 %v6452_v16  ;;  %2769 = vmatpush.msrb.mxu1 %v6454_v42 }
 0x612   :  { %2811 = vmatpush.msrb.mxu3 %v7652_v49  ;;  %2792 = vmatpush.msra.mxu2 %v7653_v24 }
 0x613   :  { %2749 = vmatpush.msra.mxu0 %v6479_v3  ;;  %2770 = vmatpush.msrb.mxu1 %v6481_v38 }
 0x614   :  { %2812 = vmatpush.msrb.mxu3 %v7654_v25  ;;  %3005 = vmatpush.msrb.mxu2 %v6230_v6 }
 0x615   :  { %2750 = vmatpush.msra.mxu0 %v6483_v62  ;;  %2771 = vmatpush.msrb.mxu1 %v6490_v7 }
 0x616   :  { %3025 = vmatpush.msra.mxu3 %v6232_v52  ;;  %3006 = vmatpush.msrb.mxu2 %v6245_v1 }
 0x617   :  { %2751 = vmatpush.msra.mxu0 %v6492_v45  ;;  %2772 = vmatpush.msrb.mxu1 %v6494_v43 }
 0x618   :  { %3026 = vmatpush.msra.mxu3 %v6247_v58  ;;  %3007 = vmatpush.msrb.mxu2 %v6259_v20 }
 0x619   :  { %2985 = vmatpush.msra.mxu1 %v6269_v12  ;;  %2752 = vmatpush.msra.mxu0 %v6500_v0 }
 0x61a   :  { %3027 = vmatpush.msra.mxu3 %v6261_v53  ;;  %3008 = vmatpush.msrb.mxu2 %v6271_v5 }
 0x61b   :  { %2965 = vmatpush.msrb.mxu0 %v6282_v8  ;;  %2986 = vmatpush.msra.mxu1 %v6284_v31 }
 0x61c   :  { %3028 = vmatpush.msra.mxu3 %v6273_v11  ;;  %3009 = vmatpush.msrb.mxu2 %v6286_v37 }
 0x61d   :  { %2966 = vmatpush.msrb.mxu0 %v6296_v51  ;;  %2987 = vmatpush.msra.mxu1 %v6298_v34 }
 0x61e   :  { %3029 = vmatpush.msra.mxu3 %v6291_v59  ;;  %3010 = vmatpush.msrb.mxu2 %v6300_v36 }
 0x61f   :  { %2967 = vmatpush.msrb.mxu0 %v6310_v17  ;;  %2988 = vmatpush.msra.mxu1 %v6312_v27 }
 0x620   :  { %3030 = vmatpush.msra.mxu3 %v6304_v28  ;;  %3011 = vmatpush.msrb.mxu2 %v6314_v22 }
 0x621   :  { %2968 = vmatpush.msrb.mxu0 %v6324_v32  ;;  %2989 = vmatpush.msra.mxu1 %v6326_v15 }
 0x622   :  { %3031 = vmatpush.msra.mxu3 %v6320_v21  ;;  %3012 = vmatpush.msrb.mxu2 %v6334_v55 }
 0x623   :  { %2969 = vmatpush.msrb.mxu0 %v6338_v40  ;;  %2990 = vmatpush.msra.mxu1 %v6346_v46 }
 0x624   :  { %3032 = vmatpush.msra.mxu3 %v6336_v2  ;;  %3013 = vmatpush.msrb.mxu2 %v6348_v4 }
 0x625   :  { %2970 = vmatpush.msrb.mxu0 %v6359_v29  ;;  %2991 = vmatpush.msra.mxu1 %v6361_v57  ;;  %v7665_v29 = vld [vmem:[#allocation27_spill] sm:$0xff] }
 0x626   :  { %3033 = vmatpush.msra.mxu3 %v6350_v23  ;;  %3014 = vmatpush.msrb.mxu2 %v6372_v35  ;;  %v7664_v23 = vld [vmem:[#allocation28_spill] sm:$0xff] }
 0x627   :  { %2971 = vmatpush.msrb.mxu0 %v6380_v30  ;;  %2992 = vmatpush.msra.mxu1 %v6382_v44  ;;  %v2394_v57 = vsel %vm283_vm2, %v7665_v29, %v7664_v23  ;;  %v7666_v30 = vld [vmem:[#allocation26_spill] sm:$0xff]  ;;  %v7667_v44 = vld [vmem:[#allocation25_spill] sm:$0xff] }
 0x628   :  { %3034 = vmatpush.msra.mxu3 %v6374_v9  ;;  %3015 = vmatpush.msrb.mxu2 %v6384_v39  ;;  %v2393_v39 = vsel %vm281_vm5, %v7667_v44, %v7666_v30 }
 0x629   :  { %2972 = vmatpush.msrb.mxu0 %v6393_v47  ;;  %2993 = vmatpush.msra.mxu1 %v6395_v50  ;;  %v7655_v50 = vld [vmem:[#allocation24_spill] sm:$0xff] }
 0x62a   :  { %3035 = vmatpush.msra.mxu3 %v6391_v14  ;;  %3016 = vmatpush.msrb.mxu2 %v6402_v56  ;;  %v7656_v6 = vperm.slane %v7655_v50, 1  ;;  %v7657_v1 = vperm.slane %v7655_v50, 0  ;;  %v7658_v5 = vperm.slane %v7655_v50, 2  ;;  %v7659_v8 = vperm.slane %v7655_v50, 3 }
 0x62b   :  { %2973 = vmatpush.msrb.mxu0 %v6417_v19  ;;  %2994 = vmatpush.msra.mxu1 %v6419_v61  ;;  %v2395_v14 = vsel %vm285_vm6, %v2393_v39, %v2394_v57 }
 0x62c   :  { %3036 = vmatpush.msra.mxu3 %v6404_v13  ;;  %3017 = vmatpush.msrb.mxu2 %v6421_v10 }
 0x62d   :  { %2974 = vmatpush.msrb.mxu0 %v6428_v63  ;;  %2995 = vmatpush.msra.mxu1 %v6430_v41 }
 0x62e   :  { %3037 = vmatpush.msra.mxu3 %v6426_v18  ;;  %3018 = vmatpush.msrb.mxu2 %v7649_v33 }
 0x62f   :  { %2975 = vmatpush.msrb.mxu0 %v6439_v54  ;;  %2996 = vmatpush.msra.mxu1 %v6443_v60 }
 0x630   :  { %3038 = vmatpush.msra.mxu3 %v7650_v48  ;;  %3019 = vmatpush.msrb.mxu2 %v7651_v26 }
 0x631   :  { %2976 = vmatpush.msrb.mxu0 %v6452_v16  ;;  %2997 = vmatpush.msra.mxu1 %v6454_v42 }
 0x632   :  { %3039 = vmatpush.msra.mxu3 %v7652_v49  ;;  %3020 = vmatpush.msrb.mxu2 %v7653_v24 }
 0x633   :  { %2977 = vmatpush.msrb.mxu0 %v6479_v3  ;;  %2998 = vmatpush.msra.mxu1 %v6481_v38 }
 0x634   :  { %3040 = vmatpush.msra.mxu3 %v7654_v25 }
 0x635   :  { %2978 = vmatpush.msrb.mxu0 %v6483_v62  ;;  %2999 = vmatpush.msra.mxu1 %v6490_v7 }
 0x637   :  { %2979 = vmatpush.msrb.mxu0 %v6492_v45  ;;  %3000 = vmatpush.msra.mxu1 %v6494_v43 }
 0x639   :  { %2980 = vmatpush.msrb.mxu0 %v6500_v0 }
 0x684   :  { %v2307_v60 = vpop.f32.mrf.mxu0  ;;  %v2330_v3 = vpop.f32.mrf.mxu1 }
 0x685   :  { %v2331_v52 = vadd.f32 %v2330_v3, %v7656_v6  ;;  %v2308_v58 = vadd.f32 %v2307_v60, %v7657_v1 }
 0x687   :  { %v2390_v13 = vrot.slane %v2331_v52, 6 }
 0x689   :  { %v2408_v20 = vsel %vm281_vm5, %v2308_v58, %v2390_v13  ;;  %v2411_v45 = vsel %vm287_vm3, %v2308_v58, %v2390_v13  ;;  %v2415_v43 = vsel %vm283_vm2, %v2308_v58, %v2390_v13  ;;  %v2419_v53 = vsel %vm289_vm4, %v2390_v13, %v2308_v58 }
 0x68b   :  { %v2353_v56 = vpop.f32.mrf.mxu2  ;;  %v2376_v12 = vpop.f32.mrf.mxu3 }
 0x68c   :  { %v2354_v11 = vadd.f32 %v2353_v56, %v7658_v5  ;;  %v2377_v31 = vadd.f32 %v2376_v12, %v7659_v8  ;;  %v2546_v37 = vpop.f32.mrf.mxu1  ;;  %v2526_v22 = vpop.f32.mrf.mxu0  ;;  %v4514_v5 = vld [vmem:[%s7479_s7 + $0x2] sm:$0x3] }
 0x68d   :  { %v2593_v34 = vrot.slane %v2546_v37, 6 }
 0x68e   :  { %v2391_v59 = vrot.slane %v2354_v11, 4  ;;  %v2392_v51 = vrot.slane %v2377_v31, 2 }
 0x68f   :  { %v2596_v35 = vsel %vm281_vm5, %v2526_v22, %v2593_v34 }
 0x690   :  { %v2409_v36 = vsel %vm283_vm2, %v2391_v59, %v2392_v51  ;;  %v2412_v28 = vsel %vm289_vm4, %v2392_v51, %v2391_v59  ;;  %v2416_v17 = vsel %vm281_vm5, %v2391_v59, %v2392_v51  ;;  %v2420_v27 = vsel %vm287_vm3, %v2391_v59, %v2392_v51 }
 0x691   :  { %v6652_v21 = vsel %vm285_vm6, %v2408_v20, %v2409_v36  ;;  %v6655_v32 = vsel %vm291_vm7, %v2411_v45, %v2412_v28  ;;  %v6658_v15 = vsel %vm285_vm6, %v2416_v17, %v2415_v43  ;;  %v6661_v55 = vsel %vm291_vm7, %v2420_v27, %v2419_v53 }
 0x692   :  { %7660 = vst [vmem:[#allocation34_spill] sm:$0xff] %v6652_v21  ;;  %v6872_v21 = vld [vmem:[#allocation7 + $0x200] sm:$0xff] }
 0x693   :  { %7661 = vst [vmem:[#allocation35_spill] sm:$0xff] %v6655_v32  ;;  %v2566_v2 = vpop.f32.mrf.mxu2  ;;  %v2586_v40 = vpop.f32.mrf.mxu3 }
 0x694   :  { %7662 = vst [vmem:[#allocation36_spill] sm:$0xff] %v6658_v15  ;;  %v2594_v46 = vrot.slane %v2566_v2, 4  ;;  %v2595_v4 = vrot.slane %v2586_v40, 2  ;;  %v6868_v15 = vld [vmem:[#allocation7 + $0x238] sm:$0xff] }
 0x695   :  { %7663 = vst [vmem:[#allocation37_spill] sm:$0xff] %v6661_v55  ;;  %v6862_v55 = vld [vmem:[#allocation7 + $0x228] sm:$0xff] }
 0x696   :  { %v2597_v9 = vsel %vm283_vm2, %v2594_v46, %v2595_v4 }
 0x697   :  { %v2598_v47 = vsel %vm285_vm6, %v2596_v35, %v2597_v9 }
 0x698   :  { %v2600_v19 = vadd.f32 %v2598_v47, %v2395_v14  ;;  %v7668_v47 = vld [vmem:[#allocation29_spill] sm:$0xff] }
 0x69a   :  { %v4515_v61 = vmul.f32 -1.442695, %v2600_v19  ;;  %v2621_v10 = vrot.slane %v2600_v19, 2  ;;  %v2645_v18 = vrot.slane %v2600_v19, 6  ;;  %v2642_v49 = vrot.slane %v2600_v19, 4 }
 0x69b   :  { %v2399_v19 = vrot.slane %v7668_v47, 2  ;;  %v6703_v47 = vld [vmem:[#allocation7 + $0x3d0] sm:$0xff] }
 0x69c   :  { %4684 = vpow2.f32 %v4515_v61  ;;  %v4516_v63 = vmul.f32 -1.442695, %v2621_v10  ;;  %v4517_v41 = vmul.f32 -1.442695, %v2645_v18  ;;  %7671 = vst [vmem:[#allocation21_spill] sm:$0xff] %v6703_v47 }
 0x69e   :  { %4686 = vpow2.f32 %v4516_v63 }
 0x69f   :  { %4688 = vpow2.f32 %v4517_v41 }
 0x6a2   :  { %v4685_v54 = vpop.eup %4684 }
 0x6a3   :  { %v2604_v38 = vadd.f32 1.0, %v4685_v54 }
 0x6a4   :  { %v4687_v16 = vpop.eup %4686 }
 0x6a5   :  { %v4689_v42 = vpop.eup %4688  ;;  %4690 = vrcp.f32 %v2604_v38  ;;  %v2626_v62 = vadd.f32 1.0, %v4687_v16  ;;  %v2616_v3 = vand.u32 2147483648, %v2604_v38  ;;  %v2614_v6 = vand.u32 2147483647, %v2604_v38 }
 0x6a6   :  { %v2650_v7 = vadd.f32 1.0, %v4689_v42  ;;  %vm2610_vm4 = vweird.f32 %v2604_v38 }
 0x6a7   :  { %4692 = vrcp.f32 %v2626_v62  ;;  %v2638_v58 = vand.u32 2147483648, %v2626_v62  ;;  %v2636_v20 = vand.u32 2147483647, %v2626_v62  ;;  %v2617_v43 = vor.u32 1.1754944e-38, %v2616_v3 }
 0x6a8   :  { %4694 = vrcp.f32 %v2650_v7  ;;  %vm2615_vm10 = vcmp.eq.f32.partialorder %v2614_v6, 8.507059e+37  ;;  %vm2632_vm11 = vweird.f32 %v2626_v62  ;;  %v2662_v17 = vand.u32 2147483648, %v2650_v7 }
 0x6a9   :  { %4696 = vtanh.f32 %v2642_v49  ;;  %v2639_v11 = vor.u32 1.1754944e-38, %v2638_v58  ;;  %vm2637_vm14 = vcmp.eq.f32.partialorder %v2636_v20, 8.507059e+37  ;;  %vm2656_vm8 = vweird.f32 %v2650_v7 }
 0x6aa   :  { %v2660_v27 = vand.u32 2147483647, %v2650_v7  ;;  %v2663_v2 = vor.u32 1.1754944e-38, %v2662_v17 }
 0x6ab   :  { %v4691_v0 = vpop.eup %4690 }
 0x6ac   :  { %v2606_v33 = vmul.f32 %v4691_v0, %v2604_v38  ;;  %vm2611_vm3 = vweird.f32 %v4691_v0 }
 0x6ad   :  { %v4693_v48 = vpop.eup %4692  ;;  %vm2612_vm7 = vmor %vm2610_vm4, %vm2611_vm3  ;;  %vm2661_vm4 = vcmp.eq.f32.partialorder %v2660_v27, 8.507059e+37 }
 0x6ae   :  { %v2607_v26 = vsub.f32 1.0, %v2606_v33  ;;  %v4695_v24 = vpop.eup %4694  ;;  %v2628_v25 = vmul.f32 %v4693_v48, %v2626_v62  ;;  %vm2633_vm9 = vweird.f32 %v4693_v48 }
 0x6af   :  { %v2652_v50 = vmul.f32 %v4695_v24, %v2650_v7  ;;  %vm2634_vm13 = vmor %vm2632_vm11, %vm2633_vm9  ;;  %v4697_v31 = vpop.eup %4696  ;;  %vm2657_vm15 = vweird.f32 %v4695_v24 }
 0x6b0   :  { %v2608_v60 = vmul.f32 %v4691_v0, %v2607_v26  ;;  %v2629_v52 = vsub.f32 1.0, %v2628_v25  ;;  %vm2658_vm3 = vmor %vm2656_vm8, %vm2657_vm15 }
 0x6b1   :  { %v2653_v53 = vsub.f32 1.0, %v2652_v50 }
 0x6b2   :  { %v2609_v1 = vadd.f32 %v4691_v0, %v2608_v60  ;;  %v2630_v13 = vmul.f32 %v4693_v48, %v2629_v52 }
 0x6b3   :  { %v2654_v59 = vmul.f32 %v4695_v24, %v2653_v53 }
 0x6b4   :  { %v2613_v45 = vsel %vm2612_vm7, %v4691_v0, %v2609_v1  ;;  %v2631_v56 = vadd.f32 %v4693_v48, %v2630_v13 }
 0x6b5   :  { %v2618_v12 = vsel %vm2615_vm10, %v2617_v43, %v2613_v45  ;;  %v2655_v28 = vadd.f32 %v4695_v24, %v2654_v59 }
 0x6b6   :  { %v2635_v8 = vsel %vm2634_vm13, %v4693_v48, %v2631_v56  ;;  %v2667_v51 = vmul.f32 %v4697_v31, %v2618_v12 }
 0x6b7   :  { %v2640_v37 = vsel %vm2637_vm14, %v2639_v11, %v2635_v8  ;;  %v2659_v22 = vsel %vm2658_vm3, %v4695_v24, %v2655_v28 }
 0x6b8   :  { %v2666_v34 = vmul.f32 %v4514_v5, %v2640_v37  ;;  %v2664_v46 = vsel %vm2661_vm4, %v2663_v2, %v2659_v22 }
 0x6ba   :  { %v6676_v36 = vadd.f32 %v2667_v51, %v2666_v34 }
 0x6bc   :  { %4698 = vtanh.f32 %v6676_v36 }
 0x6c2   :  { %v4699_v40 = vpop.eup %4698 }
 0x6c3   :  { %v2670_v4 = vmul.f32 %v4699_v40, %v2664_v46 }
 0x6c5   :  { %2671 = vst [vmem:[#allocation2] sm:$0x3] %v2670_v4  ;;  %2753 = vmatmul.f32.vlgmr.msra.gmra.mxu0 %v2670_v4  ;;  %2773 = vmatmul.f32.vlgmr.msrb.gmra.mxu1 %v2670_v4 }
 0x6c6   :  { %2793 = vmatmul.f32.vlgmr.msra.gmra.mxu2 %v2670_v4  ;;  %2813 = vmatmul.f32.vlgmr.msrb.gmra.mxu3 %v2670_v4 }
 0x6cc   :  { %v4272_v23 = vld [vmem:[#allocation2] sm:$0x3] }
 0x6cd   :  { %4308 = vst [vmem:[#allocation1] ss:$4 sm:$0xff] %v4272_v23 }
 0x742   :  { %v2774_v29 = vpop.f32.mrf.mxu1  ;;  %v2754_v39 = vpop.f32.mrf.mxu0 }
 0x743   :  { %v2821_v57 = vrot.slane %v2774_v29, 6 }
 0x745   :  { %v2824_v14 = vsel %vm281_vm5, %v2754_v39, %v2821_v57  ;;  %v6699_v39 = vld [vmem:[#allocation7 + $0x3c0] sm:$0xff] }
 0x746   :  { %7670 = vst [vmem:[#allocation39_spill] sm:$0xff] %v6699_v39 }
 0x749   :  { %v2794_v35 = vpop.f32.mrf.mxu2  ;;  %v2814_v9 = vpop.f32.mrf.mxu3 }
 0x74a   :  { %v2822_v30 = vrot.slane %v2794_v35, 4  ;;  %v2823_v44 = vrot.slane %v2814_v9, 2  ;;  %v6687_v35 = vld [vmem:[#allocation7 + $0x3e0] sm:$0xff]  ;;  %v6689_v9 = vld [vmem:[#allocation7 + $0x3e8] sm:$0xff] }
 0x74b   :  { %3193 = vmatpush.msra.mxu0 %v6687_v35  ;;  %3213 = vmatpush.msrb.mxu1 %v6689_v9 }
 0x74c   :  { %v2825_v61 = vsel %vm283_vm2, %v2822_v30, %v2823_v44  ;;  %v6691_v30 = vld [vmem:[#allocation7 + $0x3f0] sm:$0xff]  ;;  %v6695_v44 = vld [vmem:[#allocation7 + $0x3f8] sm:$0xff] }
 0x74d   :  { %v2826_v10 = vsel %vm285_vm6, %v2824_v14, %v2825_v61  ;;  %7669 = vst [vmem:[#allocation38_spill] sm:$0xff] %v6695_v44  ;;  %3233 = vmatpush.msra.mxu2 %v6691_v30  ;;  %3253 = vmatpush.msrb.mxu3 %v6695_v44  ;;  %v6701_v14 = vld [vmem:[#allocation7 + $0x3c8] sm:$0xff]  ;;  %v6711_v61 = vld [vmem:[#allocation7 + $0x3a0] sm:$0xff] }
 0x74e   :  { %v2828_v18 = vadd.f32 %v2826_v10, %v2399_v19  ;;  %3194 = vmatpush.msra.mxu0 %v6699_v39  ;;  %3214 = vmatpush.msrb.mxu1 %v6701_v14  ;;  %v6707_v19 = vld [vmem:[#allocation7 + $0x3d8] sm:$0xff]  ;;  %7673 = vst [vmem:[#allocation32_spill] sm:$0xff] %v6711_v61  ;;  %v6713_v10 = vld [vmem:[#allocation7 + $0x3a8] sm:$0xff] }
 0x74f   :  { %7672 = vst [vmem:[#allocation22_spill] sm:$0xff] %v6707_v19  ;;  %3234 = vmatpush.msra.mxu2 %v6703_v47  ;;  %3254 = vmatpush.msrb.mxu3 %v6707_v19 }
 0x750   :  { %v4518_v63 = vmul.f32 -1.442695, %v2828_v18  ;;  %v2849_v41 = vrot.slane %v2828_v18, 2  ;;  %v2873_v54 = vrot.slane %v2828_v18, 6  ;;  %v2870_v25 = vrot.slane %v2828_v18, 4  ;;  %v6715_v18 = vld [vmem:[#allocation7 + $0x3b0] sm:$0xff]  ;;  %3195 = vmatpush.msra.mxu0 %v6711_v61  ;;  %3215 = vmatpush.msrb.mxu1 %v6713_v10 }
 0x751   :  { %7674 = vst [vmem:[#allocation33_spill] sm:$0xff] %v6715_v18  ;;  %3235 = vmatpush.msra.mxu2 %v6715_v18 }
 0x752   :  { %4700 = vpow2.f32 %v4518_v63  ;;  %v4519_v38 = vmul.f32 -1.442695, %v2849_v41  ;;  %v4520_v16 = vmul.f32 -1.442695, %v2873_v54  ;;  %v6719_v63 = vld [vmem:[#allocation7 + $0x3b8] sm:$0xff]  ;;  %v6723_v41 = vld [vmem:[#allocation7 + $0x380] sm:$0xff] }
 0x753   :  { %7675 = vst [vmem:[#allocation18_spill] sm:$0xff] %v6719_v63  ;;  %3255 = vmatpush.msrb.mxu3 %v6719_v63  ;;  %v6725_v54 = vld [vmem:[#allocation7 + $0x388] sm:$0xff]  ;;  %3196 = vmatpush.msra.mxu0 %v6723_v41 }
 0x754   :  { %4702 = vpow2.f32 %v4519_v38  ;;  %7676 = vst [vmem:[#allocation19_spill] sm:$0xff] %v6725_v54  ;;  %v6727_v38 = vld [vmem:[#allocation7 + $0x390] sm:$0xff]  ;;  %3216 = vmatpush.msrb.mxu1 %v6725_v54 }
 0x755   :  { %4704 = vpow2.f32 %v4520_v16  ;;  %v6731_v16 = vld [vmem:[#allocation7 + $0x398] sm:$0xff]  ;;  %3236 = vmatpush.msra.mxu2 %v6727_v38 }
 0x756   :  { %7677 = vst [vmem:[#allocation20_spill] sm:$0xff] %v6731_v16  ;;  %3256 = vmatpush.msrb.mxu3 %v6731_v16 }
 0x758   :  { %v4701_v42 = vpop.eup %4700 }
 0x759   :  { %v2832_v62 = vadd.f32 1.0, %v4701_v42  ;;  %v6735_v42 = vld [vmem:[#allocation7 + $0x360] sm:$0xff] }
 0x75a   :  { %v4703_v7 = vpop.eup %4702  ;;  %7678 = vst [vmem:[#allocation23_spill] sm:$0xff] %v6735_v42  ;;  %3197 = vmatpush.msra.mxu0 %v6735_v42 }
 0x75b   :  { %v4705_v0 = vpop.eup %4704  ;;  %4706 = vrcp.f32 %v2832_v62  ;;  %v2854_v33 = vadd.f32 1.0, %v4703_v7  ;;  %v2844_v6 = vand.u32 2147483648, %v2832_v62  ;;  %v2842_v13 = vand.u32 2147483647, %v2832_v62  ;;  %v6739_v7 = vld [vmem:[#allocation7 + $0x370] sm:$0xff] }
 0x75c   :  { %v2878_v48 = vadd.f32 1.0, %v4705_v0  ;;  %vm2838_vm9 = vweird.f32 %v2832_v62  ;;  %3237 = vmatpush.msra.mxu2 %v6739_v7 }
 0x75d   :  { %4708 = vrcp.f32 %v2854_v33  ;;  %v2866_v20 = vand.u32 2147483648, %v2854_v33  ;;  %v2864_v53 = vand.u32 2147483647, %v2854_v33  ;;  %v2845_v56 = vor.u32 1.1754944e-38, %v2844_v6  ;;  %v6765_v6 = vld [vmem:[#allocation7 + $0x338] sm:$0xff] }
 0x75e   :  { %4710 = vrcp.f32 %v2878_v48  ;;  %vm2843_vm13 = vcmp.eq.f32.partialorder %v2842_v13, 8.507059e+37  ;;  %vm2860_vm14 = vweird.f32 %v2854_v33  ;;  %v2890_v2 = vand.u32 2147483648, %v2878_v48  ;;  %v6771_v13 = vld [vmem:[#allocation7 + $0x308] sm:$0xff] }
 0x75f   :  { %4712 = vtanh.f32 %v2870_v25  ;;  %v2867_v31 = vor.u32 1.1754944e-38, %v2866_v20  ;;  %vm2865_vm8 = vcmp.eq.f32.partialorder %v2864_v53, 8.507059e+37  ;;  %vm2884_vm4 = vweird.f32 %v2878_v48  ;;  %v6757_v25 = vld [vmem:[#allocation7 + $0x320] sm:$0xff]  ;;  %v6773_v20 = vld [vmem:[#allocation7 + $0x310] sm:$0xff] }
 0x760   :  { %v2888_v40 = vand.u32 2147483647, %v2878_v48  ;;  %v2891_v4 = vor.u32 1.1754944e-38, %v2890_v2  ;;  %v6803_v2 = vld [vmem:[#allocation7 + $0x2d8] sm:$0xff] }
 0x761   :  { %v4707_v26 = vpop.eup %4706 }
 0x762   :  { %v2834_v49 = vmul.f32 %v4707_v26, %v2832_v62  ;;  %vm2839_vm7 = vweird.f32 %v4707_v26  ;;  %v6737_v62 = vld [vmem:[#allocation7 + $0x368] sm:$0xff] }
 0x763   :  { %v4709_v24 = vpop.eup %4708  ;;  %vm2840_vm11 = vmor %vm2838_vm9, %vm2839_vm7  ;;  %vm2889_vm9 = vcmp.eq.f32.partialorder %v2888_v40, 8.507059e+37  ;;  %7679 = vst [vmem:[#allocation24_spill] sm:$0xff] %v6737_v62  ;;  %3217 = vmatpush.msrb.mxu1 %v6737_v62 }
 0x764   :  { %v4711_v60 = vpop.eup %4710  ;;  %v2835_v3 = vsub.f32 1.0, %v2834_v49  ;;  %v2856_v50 = vmul.f32 %v4709_v24, %v2854_v33  ;;  %vm2861_vm10 = vweird.f32 %v4709_v24  ;;  %v6743_v33 = vld [vmem:[#allocation7 + $0x378] sm:$0xff]  ;;  %v6751_v49 = vld [vmem:[#allocation7 + $0x350] sm:$0xff] }
 0x765   :  { %v2880_v52 = vmul.f32 %v4711_v60, %v2878_v48  ;;  %vm2862_vm15 = vmor %vm2860_vm14, %vm2861_vm10  ;;  %v4713_v59 = vpop.eup %4712  ;;  %vm2885_vm3 = vweird.f32 %v4711_v60  ;;  %3257 = vmatpush.msrb.mxu3 %v6743_v33  ;;  %v6747_v48 = vld [vmem:[#allocation7 + $0x340] sm:$0xff]  ;;  %3238 = vmatpush.msra.mxu2 %v6751_v49 }
 0x766   :  { %v2857_v1 = vsub.f32 1.0, %v2856_v50  ;;  %v2836_v58 = vmul.f32 %v4707_v26, %v2835_v3  ;;  %vm2886_vm7 = vmor %vm2884_vm4, %vm2885_vm3  ;;  %3198 = vmatpush.msra.mxu0 %v6747_v48  ;;  %v6763_v50 = vld [vmem:[#allocation7 + $0x330] sm:$0xff] }
 0x767   :  { %v2881_v12 = vsub.f32 1.0, %v2880_v52  ;;  %v6767_v52 = vld [vmem:[#allocation7 + $0x300] sm:$0xff]  ;;  %3239 = vmatpush.msra.mxu2 %v6763_v50 }
 0x768   :  { %v2837_v45 = vadd.f32 %v4707_v26, %v2836_v58  ;;  %v2858_v43 = vmul.f32 %v4709_v24, %v2857_v1  ;;  %3199 = vmatpush.msra.mxu0 %v6757_v25 }
 0x769   :  { %v2882_v34 = vmul.f32 %v4711_v60, %v2881_v12  ;;  %v6781_v12 = vld [vmem:[#allocation7 + $0x2e8] sm:$0xff]  ;;  %3240 = vmatpush.msra.mxu2 %v6773_v20 }
 0x76a   :  { %v2841_v5 = vsel %vm2840_vm11, %v4707_v26, %v2837_v45  ;;  %v2859_v11 = vadd.f32 %v4709_v24, %v2858_v43  ;;  %v6749_v26 = vld [vmem:[#allocation7 + $0x348] sm:$0xff]  ;;  %v6775_v45 = vld [vmem:[#allocation7 + $0x318] sm:$0xff]  ;;  %3200 = vmatpush.msra.mxu0 %v6767_v52 }
 0x76b   :  { %v2846_v8 = vsel %vm2843_vm13, %v2845_v56, %v2841_v5  ;;  %v2883_v22 = vadd.f32 %v4711_v60, %v2882_v34  ;;  %7680 = vst [vmem:[#allocation28_spill] sm:$0xff] %v6749_v26  ;;  %3218 = vmatpush.msrb.mxu1 %v6749_v26  ;;  %v6779_v56 = vld [vmem:[#allocation7 + $0x2e0] sm:$0xff] }
 0x76c   :  { %v2863_v37 = vsel %vm2862_vm15, %v4709_v24, %v2859_v11  ;;  %v2895_v17 = vmul.f32 %v4713_v59, %v2846_v8  ;;  %v6755_v24 = vld [vmem:[#allocation7 + $0x358] sm:$0xff]  ;;  %v6785_v11 = vld [vmem:[#allocation7 + $0x2f0] sm:$0xff]  ;;  %v6794_v34 = vld [vmem:[#allocation7 + $0x2c0] sm:$0xff]  ;;  %3201 = vmatpush.msra.mxu0 %v6779_v56 }
 0x76d   :  { %v2868_v51 = vsel %vm2865_vm8, %v2867_v31, %v2863_v37  ;;  %v2887_v46 = vsel %vm2886_vm7, %v4711_v60, %v2883_v22  ;;  %v6759_v60 = vld [vmem:[#allocation7 + $0x328] sm:$0xff]  ;;  %3258 = vmatpush.msrb.mxu3 %v6755_v24  ;;  %v6787_v8 = vld [vmem:[#allocation7 + $0x2f8] sm:$0xff]  ;;  %v7681_v37 = vld [vmem:[#allocation30_spill] sm:$0xff]  ;;  %3241 = vmatpush.msra.mxu2 %v6785_v11 }
 0x76e   :  { %v2894_v28 = vmul.f32 %v2868_v51, %v6676_v36  ;;  %v2892_v29 = vsel %vm2889_vm9, %v2891_v4, %v2887_v46  ;;  %3219 = vmatpush.msrb.mxu1 %v6759_v60  ;;  %v2403_v59 = vrot.slane %v7681_v37, 4  ;;  %v6801_v22 = vld [vmem:[#allocation7 + $0x2d0] sm:$0xff]  ;;  %v6809_v46 = vld [vmem:[#allocation7 + $0x2a0] sm:$0xff]  ;;  %v6811_v4 = vld [vmem:[#allocation7 + $0x2a8] sm:$0xff]  ;;  %3202 = vmatpush.msra.mxu0 %v6794_v34 }
 0x76f   :  { %3259 = vmatpush.msrb.mxu3 %v6765_v6  ;;  %3242 = vmatpush.msra.mxu2 %v6801_v22  ;;  %v6838_v37 = vld [vmem:[#allocation7 + $0x268] sm:$0xff] }
 0x770   :  { %v6684_v27 = vadd.f32 %v2895_v17, %v2894_v28  ;;  %3220 = vmatpush.msrb.mxu1 %v6771_v13  ;;  %v6796_v28 = vld [vmem:[#allocation7 + $0x2c8] sm:$0xff]  ;;  %3203 = vmatpush.msra.mxu0 %v6809_v46  ;;  %7682 = vst [vmem:[#allocation27_spill] sm:$0xff] %v6838_v37 }
 0x771   :  { %3260 = vmatpush.msrb.mxu3 %v6775_v45 }
 0x772   :  { %4714 = vtanh.f32 %v6684_v27  ;;  %3221 = vmatpush.msrb.mxu1 %v6781_v12 }
 0x773   :  { %3261 = vmatpush.msrb.mxu3 %v6787_v8 }
 0x774   :  { %3222 = vmatpush.msrb.mxu1 %v6796_v28 }
 0x775   :  { %3262 = vmatpush.msrb.mxu3 %v6803_v2 }
 0x776   :  { %3223 = vmatpush.msrb.mxu1 %v6811_v4 }
 0x778   :  { %v4715_v23 = vpop.eup %4714 }
 0x779   :  { %v2898_v57 = vmul.f32 %v4715_v23, %v2892_v29  ;;  %v6815_v23 = vld [vmem:[#allocation7 + $0x2b0] sm:$0xff]  ;;  %v6817_v29 = vld [vmem:[#allocation7 + $0x2b8] sm:$0xff] }
 0x77a   :  { %3243 = vmatpush.msra.mxu2 %v6815_v23  ;;  %3263 = vmatpush.msrb.mxu3 %v6817_v29 }
 0x77b   :  { %2899 = vst [vmem:[#allocation2 + $0x2] sm:$0x3] %v2898_v57  ;;  %2981 = vmatmul.f32.vlgmr.msrb.gmra.mxu0 %v2898_v57  ;;  %3001 = vmatmul.f32.vlgmr.msra.gmra.mxu1 %v2898_v57 }
 0x77c   :  { %3021 = vmatmul.f32.vlgmr.msrb.gmra.mxu2 %v2898_v57  ;;  %3041 = vmatmul.f32.vlgmr.msra.gmra.mxu3 %v2898_v57 }
 0x782   :  { %v4273_v36 = vld [vmem:[#allocation2 + $0x2] sm:$0x3] }
 0x783   :  { %4310 = vst [vmem:[#allocation1 + $0x1] ss:$4 sm:$0xff] %v4273_v36 }
 0x7f8   :  { %v3002_v0 = vpop.f32.mrf.mxu1  ;;  %v2982_v5 = vpop.f32.mrf.mxu0 }
 0x7f9   :  { %v3049_v3 = vrot.slane %v3002_v0, 6 }
 0x7fb   :  { %v3052_v31 = vsel %vm281_vm5, %v2982_v5, %v3049_v3  ;;  %v6824_v3 = vld [vmem:[#allocation7 + $0x280] sm:$0xff] }
 0x7fc   :  { %3204 = vmatpush.msra.mxu0 %v6824_v3 }
 0x7ff   :  { %v3022_v1 = vpop.f32.mrf.mxu2  ;;  %v3042_v58 = vpop.f32.mrf.mxu3 }
 0x800   :  { %v3050_v43 = vrot.slane %v3022_v1, 4  ;;  %v3051_v53 = vrot.slane %v3042_v58, 2  ;;  %v6826_v1 = vld [vmem:[#allocation7 + $0x288] sm:$0xff]  ;;  %v6830_v58 = vld [vmem:[#allocation7 + $0x290] sm:$0xff] }
 0x801   :  { %3224 = vmatpush.msrb.mxu1 %v6826_v1  ;;  %3244 = vmatpush.msra.mxu2 %v6830_v58 }
 0x802   :  { %v3053_v51 = vsel %vm283_vm2, %v3050_v43, %v3051_v53  ;;  %v6832_v43 = vld [vmem:[#allocation7 + $0x298] sm:$0xff] }
 0x803   :  { %v3054_v17 = vsel %vm285_vm6, %v3052_v31, %v3053_v51  ;;  %v6836_v31 = vld [vmem:[#allocation7 + $0x260] sm:$0xff]  ;;  %v6844_v51 = vld [vmem:[#allocation7 + $0x278] sm:$0xff]  ;;  %3264 = vmatpush.msrb.mxu3 %v6832_v43  ;;  %3225 = vmatpush.msrb.mxu1 %v6838_v37 }
 0x804   :  { %v6805_v40 = vadd.f32 %v3054_v17, %v2403_v59  ;;  %v6842_v59 = vld [vmem:[#allocation7 + $0x270] sm:$0xff]  ;;  %7684 = vst [vmem:[#allocation25_spill] sm:$0xff] %v6844_v51  ;;  %v6848_v17 = vld [vmem:[#allocation7 + $0x240] sm:$0xff]  ;;  %3205 = vmatpush.msra.mxu0 %v6836_v31 }
 0x805   :  { %7683 = vst [vmem:[#allocation26_spill] sm:$0xff] %v6842_v59  ;;  %3245 = vmatpush.msra.mxu2 %v6842_v59  ;;  %3265 = vmatpush.msrb.mxu3 %v6844_v51  ;;  %v6874_v51 = vld [vmem:[#allocation7 + $0x208] sm:$0xff] }
 0x806   :  { %v4521_v57 = vmul.f32 -1.442695, %v6805_v40  ;;  %v3077_v36 = vrot.slane %v6805_v40, 2  ;;  %v3101_v0 = vrot.slane %v6805_v40, 6  ;;  %7685 = vst [vmem:[#allocation29_spill] sm:$0xff] %v6848_v17  ;;  %3206 = vmatpush.msra.mxu0 %v6848_v17  ;;  %v6882_v17 = vld [vmem:[#allocation7 + $0x218] sm:$0xff] }
 0x808   :  { %4716 = vpow2.f32 %v4521_v57  ;;  %v4522_v53 = vmul.f32 -1.442695, %v3077_v36  ;;  %v4523_v5 = vmul.f32 -1.442695, %v3101_v0  ;;  %v6850_v57 = vld [vmem:[#allocation7 + $0x248] sm:$0xff]  ;;  %v6854_v36 = vld [vmem:[#allocation7 + $0x250] sm:$0xff] }
 0x809   :  { %7686 = vst [vmem:[#allocation30_spill] sm:$0xff] %v6850_v57  ;;  %v6856_v0 = vld [vmem:[#allocation7 + $0x258] sm:$0xff]  ;;  %3226 = vmatpush.msrb.mxu1 %v6850_v57  ;;  %3246 = vmatpush.msra.mxu2 %v6854_v36  ;;  %v6880_v57 = vld [vmem:[#allocation7 + $0x210] sm:$0xff] }
 0x80a   :  { %4718 = vpow2.f32 %v4522_v53  ;;  %7687 = vst [vmem:[#allocation40_spill] sm:$0xff] %v6854_v36  ;;  %v6860_v53 = vld [vmem:[#allocation7 + $0x220] sm:$0xff]  ;;  %3266 = vmatpush.msrb.mxu3 %v6856_v0 }
 0x80b   :  { %4720 = vpow2.f32 %v4523_v5  ;;  %7688 = vst [vmem:[#allocation41_spill] sm:$0xff] %v6856_v0  ;;  %v6866_v5 = vld [vmem:[#allocation7 + $0x230] sm:$0xff]  ;;  %3207 = vmatpush.msra.mxu0 %v6860_v53  ;;  %3227 = vmatpush.msrb.mxu1 %v6862_v55 }
 0x80c   :  { %3247 = vmatpush.msra.mxu2 %v6866_v5  ;;  %3267 = vmatpush.msrb.mxu3 %v6868_v15 }
 0x80d   :  { %3208 = vmatpush.msra.mxu0 %v6872_v21  ;;  %3228 = vmatpush.msrb.mxu1 %v6874_v51 }
 0x80e   :  { %v4717_v32 = vpop.eup %4716  ;;  %3248 = vmatpush.msra.mxu2 %v6880_v57  ;;  %3268 = vmatpush.msrb.mxu3 %v6882_v17 }
 0x80f   :  { %v6876_v59 = vadd.f32 1.0, %v4717_v32  ;;  %3421 = vmatpush.msrb.mxu0 %v6687_v35  ;;  %3441 = vmatpush.msra.mxu1 %v6689_v9 }
 0x810   :  { %v4719_v37 = vpop.eup %4718  ;;  %3461 = vmatpush.msrb.mxu2 %v6691_v30  ;;  %3481 = vmatpush.msra.mxu3 %v6695_v44 }
 0x811   :  { %v4721_v0 = vpop.eup %4720  ;;  %4722 = vrcp.f32 %v6876_v59  ;;  %v6887_v36 = vadd.f32 1.0, %v4719_v37  ;;  %3422 = vmatpush.msrb.mxu0 %v6699_v39  ;;  %3442 = vmatpush.msra.mxu1 %v6701_v14  ;;  %v3098_v39 = vrot.slane %v6805_v40, 4  ;;  %vm3066_vm11 = vweird.f32 %v6876_v59 }
 0x812   :  { %v6891_v32 = vadd.f32 1.0, %v4721_v0  ;;  %3462 = vmatpush.msrb.mxu2 %v6703_v47  ;;  %3482 = vmatpush.msra.mxu3 %v6707_v19 }
 0x813   :  { %4724 = vrcp.f32 %v6887_v36  ;;  %3423 = vmatpush.msrb.mxu0 %v6711_v61  ;;  %3443 = vmatpush.msra.mxu1 %v6713_v10  ;;  %vm3088_vm8 = vweird.f32 %v6887_v36 }
 0x814   :  { %4726 = vrcp.f32 %v6891_v32  ;;  %3463 = vmatpush.msrb.mxu2 %v6715_v18  ;;  %3483 = vmatpush.msra.mxu3 %v6719_v63  ;;  %v3072_v18 = vand.u32 2147483648, %v6876_v59  ;;  %vm3112_vm9 = vweird.f32 %v6891_v32 }
 0x815   :  { %3424 = vmatpush.msrb.mxu0 %v6723_v41  ;;  %3444 = vmatpush.msra.mxu1 %v6725_v54  ;;  %4728 = vtanh.f32 %v3098_v39 }
 0x816   :  { %3464 = vmatpush.msrb.mxu2 %v6727_v38  ;;  %3484 = vmatpush.msra.mxu3 %v6731_v16  ;;  %v3094_v16 = vand.u32 2147483648, %v6887_v36  ;;  %v3073_v39 = vor.u32 1.1754944e-38, %v3072_v18 }
 0x817   :  { %v4723_v37 = vpop.eup %4722  ;;  %3425 = vmatpush.msrb.mxu0 %v6735_v42  ;;  %3445 = vmatpush.msra.mxu1 %v6737_v62 }
 0x818   :  { %v3062_v0 = vmul.f32 %v4723_v37, %v6876_v59  ;;  %vm3067_vm10 = vweird.f32 %v4723_v37  ;;  %3465 = vmatpush.msrb.mxu2 %v6739_v7  ;;  %3485 = vmatpush.msra.mxu3 %v6743_v33 }
 0x819   :  { %v4725_v44 = vpop.eup %4724  ;;  %3426 = vmatpush.msrb.mxu0 %v6747_v48  ;;  %3446 = vmatpush.msra.mxu1 %v6749_v26  ;;  %vm3068_vm14 = vmor %vm3066_vm11, %vm3067_vm10 }
 0x81a   :  { %v6913_v47 = vpop.eup %4726  ;;  %v3063_v19 = vsub.f32 1.0, %v3062_v0  ;;  %v3084_v61 = vmul.f32 %v4725_v44, %v6887_v36  ;;  %v3070_v0 = vand.u32 2147483647, %v6876_v59  ;;  %vm3089_vm13 = vweird.f32 %v4725_v44  ;;  %3466 = vmatpush.msrb.mxu2 %v6751_v49  ;;  %3486 = vmatpush.msra.mxu3 %v6755_v24 }
 0x81b   :  { %v3108_v63 = vmul.f32 %v6913_v47, %v6891_v32  ;;  %3427 = vmatpush.msrb.mxu0 %v6757_v25  ;;  %3447 = vmatpush.msra.mxu1 %v6759_v60  ;;  %vm3090_vm3 = vmor %vm3088_vm8, %vm3089_vm13  ;;  %vm3113_vm7 = vweird.f32 %v6913_v47 }
 0x81c   :  { %v3085_v40 = vsub.f32 1.0, %v3084_v61  ;;  %v3064_v54 = vmul.f32 %v4723_v37, %v3063_v19  ;;  %v3092_v19 = vand.u32 2147483647, %v6887_v36  ;;  %vm3071_vm15 = vcmp.eq.f32.partialorder %v3070_v0, 8.507059e+37  ;;  %3467 = vmatpush.msrb.mxu2 %v6763_v50  ;;  %3487 = vmatpush.msra.mxu3 %v6765_v6  ;;  %vm3114_vm10 = vmor %vm3112_vm9, %vm3113_vm7 }
 0x81d   :  { %v3109_v61 = vsub.f32 1.0, %v3108_v63  ;;  %3428 = vmatpush.msrb.mxu0 %v6767_v52  ;;  %3448 = vmatpush.msra.mxu1 %v6771_v13  ;;  %v4729_v63 = vpop.eup %4728 }
 0x81e   :  { %v3065_v42 = vadd.f32 %v4723_v37, %v3064_v54  ;;  %v3086_v62 = vmul.f32 %v4725_v44, %v3085_v40  ;;  %v3095_v40 = vor.u32 1.1754944e-38, %v3094_v16  ;;  %vm3093_vm4 = vcmp.eq.f32.partialorder %v3092_v19, 8.507059e+37  ;;  %3468 = vmatpush.msrb.mxu2 %v6773_v20  ;;  %3488 = vmatpush.msra.mxu3 %v6775_v45  ;;  %v7689_v19 = vld [vmem:[#allocation27_spill] sm:$0xff] }
 0x81f   :  { %3429 = vmatpush.msrb.mxu0 %v6779_v56  ;;  %3449 = vmatpush.msra.mxu1 %v6781_v12 }
 0x820   :  { %v3069_v59 = vsel %vm3068_vm14, %v4723_v37, %v3065_v42  ;;  %v3087_v26 = vadd.f32 %v4725_v44, %v3086_v62  ;;  %v3110_v62 = vmul.f32 %v6913_v47, %v3109_v61  ;;  %3469 = vmatpush.msrb.mxu2 %v6785_v11  ;;  %3489 = vmatpush.msra.mxu3 %v6787_v8  ;;  %v3116_v37 = vand.u32 2147483647, %v6891_v32  ;;  %v7690_v61 = vld [vmem:[#allocation26_spill] sm:$0xff] }
 0x821   :  { %v3074_v54 = vsel %vm3071_vm15, %v3073_v39, %v3069_v59  ;;  %3430 = vmatpush.msrb.mxu0 %v6794_v34  ;;  %3450 = vmatpush.msra.mxu1 %v6796_v28  ;;  %v7691_v59 = vld [vmem:[#allocation25_spill] sm:$0xff] }
 0x822   :  { %v3091_v18 = vsel %vm3090_vm3, %v4725_v44, %v3087_v26  ;;  %v3123_v36 = vmul.f32 %v4729_v63, %v3074_v54  ;;  %3470 = vmatpush.msrb.mxu2 %v6801_v22  ;;  %3490 = vmatpush.msra.mxu3 %v6803_v2  ;;  %v3111_v26 = vadd.f32 %v6913_v47, %v3110_v62  ;;  %vm3117_vm11 = vcmp.eq.f32.partialorder %v3116_v37, 8.507059e+37  ;;  %v7693_v54 = vld [vmem:[#allocation30_spill] sm:$0xff]  ;;  %v7694_v63 = vld [vmem:[#allocation40_spill] sm:$0xff] }
 0x823   :  { %v3096_v42 = vsel %vm3093_vm4, %v3095_v40, %v3091_v18  ;;  %3431 = vmatpush.msrb.mxu0 %v6809_v46  ;;  %3451 = vmatpush.msra.mxu1 %v6811_v4  ;;  %v7696_v62 = vld [vmem:[#allocation38_spill] sm:$0xff]  ;;  %v7700_v37 = vld [vmem:[#allocation32_spill] sm:$0xff] }
 0x824   :  { %v3122_v16 = vmul.f32 %v3096_v42, %v6684_v27  ;;  %v3118_v27 = vand.u32 2147483648, %v6891_v32  ;;  %3471 = vmatpush.msrb.mxu2 %v6815_v23  ;;  %3491 = vmatpush.msra.mxu3 %v6817_v29  ;;  %v3115_v0 = vsel %vm3114_vm10, %v6913_v47, %v3111_v26  ;;  %v7692_v32 = vld [vmem:[#allocation29_spill] sm:$0xff]  ;;  %v7699_v26 = vld [vmem:[#allocation22_spill] sm:$0xff] }
 0x825   :  { %3432 = vmatpush.msrb.mxu0 %v6824_v3  ;;  %3452 = vmatpush.msra.mxu1 %v6826_v1  ;;  %v7695_v42 = vld [vmem:[#allocation41_spill] sm:$0xff] }
 0x826   :  { %v6952_v44 = vadd.f32 %v3123_v36, %v3122_v16  ;;  %3472 = vmatpush.msrb.mxu2 %v6830_v58  ;;  %3492 = vmatpush.msra.mxu3 %v6832_v43  ;;  %v3119_v39 = vor.u32 1.1754944e-38, %v3118_v27  ;;  %v7697_v16 = vld [vmem:[#allocation39_spill] sm:$0xff]  ;;  %v7698_v36 = vld [vmem:[#allocation21_spill] sm:$0xff] }
 0x827   :  { %3433 = vmatpush.msrb.mxu0 %v6836_v31  ;;  %3453 = vmatpush.msra.mxu1 %v7689_v19 }
 0x828   :  { %4730 = vtanh.f32 %v6952_v44  ;;  %3473 = vmatpush.msrb.mxu2 %v7690_v61  ;;  %3493 = vmatpush.msra.mxu3 %v7691_v59  ;;  %v3120_v18 = vsel %vm3117_vm11, %v3119_v39, %v3115_v0  ;;  %v7705_v0 = vld [vmem:[#allocation23_spill] sm:$0xff]  ;;  %v7706_v39 = vld [vmem:[#allocation24_spill] sm:$0xff] }
 0x829   :  { %3434 = vmatpush.msrb.mxu0 %v7692_v32  ;;  %3454 = vmatpush.msra.mxu1 %v7693_v54 }
 0x82a   :  { %3474 = vmatpush.msrb.mxu2 %v7694_v63  ;;  %3494 = vmatpush.msra.mxu3 %v7695_v42 }
 0x82b   :  { %3435 = vmatpush.msrb.mxu0 %v6860_v53  ;;  %3455 = vmatpush.msra.mxu1 %v6862_v55 }
 0x82c   :  { %3475 = vmatpush.msrb.mxu2 %v6866_v5  ;;  %3495 = vmatpush.msra.mxu3 %v6868_v15 }
 0x82d   :  { %3436 = vmatpush.msrb.mxu0 %v6872_v21  ;;  %3456 = vmatpush.msra.mxu1 %v6874_v51 }
 0x82e   :  { %v4731_v40 = vpop.eup %4730  ;;  %3476 = vmatpush.msrb.mxu2 %v6880_v57  ;;  %3496 = vmatpush.msra.mxu3 %v6882_v17 }
 0x82f   :  { %v3126_v47 = vmul.f32 %v4731_v40, %v3120_v18 }
 0x831   :  { %3127 = vst [vmem:[#allocation2 + $0x4] sm:$0x3] %v3126_v47  ;;  %3209 = vmatmul.f32.vlgmr.msra.gmra.mxu0 %v3126_v47  ;;  %3229 = vmatmul.f32.vlgmr.msrb.gmra.mxu1 %v3126_v47 }
 0x832   :  { %3249 = vmatmul.f32.vlgmr.msra.gmra.mxu2 %v3126_v47  ;;  %3269 = vmatmul.f32.vlgmr.msrb.gmra.mxu3 %v3126_v47 }
 0x833   :  { %3649 = vmatpush.msra.mxu0 %v6687_v35  ;;  %3669 = vmatpush.msrb.mxu1 %v6689_v9  ;;  %v7701_v35 = vld [vmem:[#allocation33_spill] sm:$0xff]  ;;  %v7702_v9 = vld [vmem:[#allocation18_spill] sm:$0xff] }
 0x834   :  { %3689 = vmatpush.msra.mxu2 %v6691_v30  ;;  %3709 = vmatpush.msrb.mxu3 %v7696_v62  ;;  %v7703_v30 = vld [vmem:[#allocation19_spill] sm:$0xff] }
 0x835   :  { %3650 = vmatpush.msra.mxu0 %v7697_v16  ;;  %3670 = vmatpush.msrb.mxu1 %v6701_v14  ;;  %v7704_v14 = vld [vmem:[#allocation20_spill] sm:$0xff] }
 0x836   :  { %3690 = vmatpush.msra.mxu2 %v7698_v36  ;;  %3710 = vmatpush.msrb.mxu3 %v7699_v26 }
 0x837   :  { %3651 = vmatpush.msra.mxu0 %v7700_v37  ;;  %3671 = vmatpush.msrb.mxu1 %v6713_v10  ;;  %v7707_v10 = vld [vmem:[#allocation28_spill] sm:$0xff] }
 0x838   :  { %v4274_v27 = vld [vmem:[#allocation2 + $0x4] sm:$0x3]  ;;  %3691 = vmatpush.msra.mxu2 %v7701_v35  ;;  %3711 = vmatpush.msrb.mxu3 %v7702_v9 }
 0x839   :  { %4312 = vst [vmem:[#allocation1 + $0x2] ss:$4 sm:$0xff] %v4274_v27  ;;  %3652 = vmatpush.msra.mxu0 %v6723_v41  ;;  %3672 = vmatpush.msrb.mxu1 %v7703_v30 }
 0x83a   :  { %3692 = vmatpush.msra.mxu2 %v6727_v38  ;;  %3712 = vmatpush.msrb.mxu3 %v7704_v14 }
 0x83b   :  { %3653 = vmatpush.msra.mxu0 %v7705_v0  ;;  %3673 = vmatpush.msrb.mxu1 %v7706_v39 }
 0x83c   :  { %3693 = vmatpush.msra.mxu2 %v6739_v7  ;;  %3713 = vmatpush.msrb.mxu3 %v6743_v33 }
 0x83d   :  { %3654 = vmatpush.msra.mxu0 %v6747_v48  ;;  %3674 = vmatpush.msrb.mxu1 %v7707_v10 }
 0x83e   :  { %3694 = vmatpush.msra.mxu2 %v6751_v49  ;;  %3714 = vmatpush.msrb.mxu3 %v6755_v24 }
 0x83f   :  { %3655 = vmatpush.msra.mxu0 %v6757_v25  ;;  %3675 = vmatpush.msrb.mxu1 %v6759_v60  ;;  %v7708_v25 = vld [vmem:[#allocation31_spill] sm:$0xff] }
 0x840   :  { %3695 = vmatpush.msra.mxu2 %v6763_v50  ;;  %3715 = vmatpush.msrb.mxu3 %v6765_v6  ;;  %v2407_v60 = vrot.slane %v7708_v25, 6  ;;  %v7709_v25 = vld [vmem:[#allocation34_spill] sm:$0xff] }
 0x841   :  { %3656 = vmatpush.msra.mxu0 %v6767_v52  ;;  %3676 = vmatpush.msrb.mxu1 %v6771_v13 }
 0x842   :  { %3696 = vmatpush.msra.mxu2 %v6773_v20  ;;  %3716 = vmatpush.msrb.mxu3 %v6775_v45 }
 0x843   :  { %3657 = vmatpush.msra.mxu0 %v6779_v56  ;;  %3677 = vmatpush.msrb.mxu1 %v6781_v12 }
 0x844   :  { %3697 = vmatpush.msra.mxu2 %v6785_v11  ;;  %3717 = vmatpush.msrb.mxu3 %v6787_v8 }
 0x845   :  { %3658 = vmatpush.msra.mxu0 %v6794_v34  ;;  %3678 = vmatpush.msrb.mxu1 %v6796_v28 }
 0x846   :  { %3698 = vmatpush.msra.mxu2 %v6801_v22  ;;  %3718 = vmatpush.msrb.mxu3 %v6803_v2 }
 0x847   :  { %3659 = vmatpush.msra.mxu0 %v6809_v46  ;;  %3679 = vmatpush.msrb.mxu1 %v6811_v4 }
 0x848   :  { %3699 = vmatpush.msra.mxu2 %v6815_v23  ;;  %3719 = vmatpush.msrb.mxu3 %v6817_v29 }
 0x849   :  { %3660 = vmatpush.msra.mxu0 %v6824_v3  ;;  %3680 = vmatpush.msrb.mxu1 %v6826_v1 }
 0x84a   :  { %3700 = vmatpush.msra.mxu2 %v6830_v58  ;;  %3720 = vmatpush.msrb.mxu3 %v6832_v43 }
 0x84b   :  { %3661 = vmatpush.msra.mxu0 %v6836_v31  ;;  %3681 = vmatpush.msrb.mxu1 %v7689_v19 }
 0x84c   :  { %3701 = vmatpush.msra.mxu2 %v7690_v61  ;;  %3721 = vmatpush.msrb.mxu3 %v7691_v59 }
 0x84d   :  { %3662 = vmatpush.msra.mxu0 %v7692_v32  ;;  %3682 = vmatpush.msrb.mxu1 %v7693_v54 }
 0x84e   :  { %3702 = vmatpush.msra.mxu2 %v7694_v63  ;;  %3722 = vmatpush.msrb.mxu3 %v7695_v42 }
 0x84f   :  { %3663 = vmatpush.msra.mxu0 %v6860_v53  ;;  %3683 = vmatpush.msrb.mxu1 %v6862_v55 }
 0x850   :  { %3703 = vmatpush.msra.mxu2 %v6866_v5  ;;  %3723 = vmatpush.msrb.mxu3 %v6868_v15 }
 0x851   :  { %3664 = vmatpush.msra.mxu0 %v6872_v21  ;;  %3684 = vmatpush.msrb.mxu1 %v6874_v51 }
 0x852   :  { %3704 = vmatpush.msra.mxu2 %v6880_v57  ;;  %3724 = vmatpush.msrb.mxu3 %v6882_v17 }
 0x8ae   :  { %v3230_v41 = vpop.f32.mrf.mxu1  ;;  %v3210_v24 = vpop.f32.mrf.mxu0 }
 0x8af   :  { %v3277_v38 = vrot.slane %v3230_v41, 6 }
 0x8b1   :  { %v3280_v55 = vsel %vm281_vm5, %v3210_v24, %v3277_v38 }
 0x8b5   :  { %v3250_v7 = vpop.f32.mrf.mxu2  ;;  %v3270_v33 = vpop.f32.mrf.mxu3 }
 0x8b6   :  { %v3278_v48 = vrot.slane %v3250_v7, 4  ;;  %v3279_v49 = vrot.slane %v3270_v33, 2 }
 0x8b8   :  { %v3281_v15 = vsel %vm283_vm2, %v3278_v48, %v3279_v49 }
 0x8b9   :  { %v3282_v21 = vsel %vm285_vm6, %v3280_v55, %v3281_v15 }
 0x8ba   :  { %v3284_v50 = vadd.f32 %v3282_v21, %v2407_v60 }
 0x8bc   :  { %v4524_v6 = vmul.f32 -1.442695, %v3284_v50  ;;  %v3305_v52 = vrot.slane %v3284_v50, 2  ;;  %v3329_v13 = vrot.slane %v3284_v50, 6  ;;  %v3326_v4 = vrot.slane %v3284_v50, 4 }
 0x8be   :  { %4732 = vpow2.f32 %v4524_v6  ;;  %v4525_v20 = vmul.f32 -1.442695, %v3305_v52  ;;  %v4526_v45 = vmul.f32 -1.442695, %v3329_v13 }
 0x8c0   :  { %4734 = vpow2.f32 %v4525_v20 }
 0x8c1   :  { %4736 = vpow2.f32 %v4526_v45 }
 0x8c4   :  { %v4733_v56 = vpop.eup %4732 }
 0x8c5   :  { %v3288_v12 = vadd.f32 1.0, %v4733_v56 }
 0x8c6   :  { %v4735_v11 = vpop.eup %4734 }
 0x8c7   :  { %v4737_v8 = vpop.eup %4736  ;;  %4738 = vrcp.f32 %v3288_v12  ;;  %v3310_v34 = vadd.f32 1.0, %v4735_v11  ;;  %v3300_v1 = vand.u32 2147483648, %v3288_v12  ;;  %v3298_v51 = vand.u32 2147483647, %v3288_v12 }
 0x8c8   :  { %v3334_v28 = vadd.f32 1.0, %v4737_v8  ;;  %vm3294_vm14 = vweird.f32 %v3288_v12 }
 0x8c9   :  { %4740 = vrcp.f32 %v3310_v34  ;;  %v3322_v17 = vand.u32 2147483648, %v3310_v34  ;;  %v3320_v5 = vand.u32 2147483647, %v3310_v34  ;;  %v3301_v19 = vor.u32 1.1754944e-38, %v3300_v1 }
 0x8ca   :  { %4742 = vrcp.f32 %v3334_v28  ;;  %vm3299_vm3 = vcmp.eq.f32.partialorder %v3298_v51, 8.507059e+37  ;;  %vm3316_vm4 = vweird.f32 %v3310_v34  ;;  %v3346_v27 = vand.u32 2147483648, %v3334_v28 }
 0x8cb   :  { %4744 = vtanh.f32 %v3326_v4  ;;  %v3323_v40 = vor.u32 1.1754944e-38, %v3322_v17  ;;  %vm3321_vm9 = vcmp.eq.f32.partialorder %v3320_v5, 8.507059e+37  ;;  %vm3340_vm11 = vweird.f32 %v3334_v28 }
 0x8cc   :  { %v3344_v37 = vand.u32 2147483647, %v3334_v28  ;;  %v3347_v9 = vor.u32 1.1754944e-38, %v3346_v27 }
 0x8cd   :  { %v4739_v22 = vpop.eup %4738 }
 0x8ce   :  { %v3290_v2 = vmul.f32 %v4739_v22, %v3288_v12  ;;  %vm3295_vm13 = vweird.f32 %v4739_v22 }
 0x8cf   :  { %v4741_v46 = vpop.eup %4740  ;;  %vm3296_vm8 = vmor %vm3294_vm14, %vm3295_vm13  ;;  %vm3345_vm14 = vcmp.eq.f32.partialorder %v3344_v37, 8.507059e+37 }
 0x8d0   :  { %v4743_v23 = vpop.eup %4742  ;;  %v3291_v29 = vsub.f32 1.0, %v3290_v2  ;;  %v3312_v3 = vmul.f32 %v4741_v46, %v3310_v34  ;;  %vm3317_vm15 = vweird.f32 %v4741_v46 }
 0x8d1   :  { %v3336_v58 = vmul.f32 %v4743_v23, %v3334_v28  ;;  %vm3318_vm7 = vmor %vm3316_vm4, %vm3317_vm15  ;;  %v4745_v63 = vpop.eup %4744  ;;  %vm3341_vm10 = vweird.f32 %v4743_v23 }
 0x8d2   :  { %v3313_v43 = vsub.f32 1.0, %v3312_v3  ;;  %v3292_v31 = vmul.f32 %v4739_v22, %v3291_v29  ;;  %vm3342_vm13 = vmor %vm3340_vm11, %vm3341_vm10 }
 0x8d3   :  { %v3337_v61 = vsub.f32 1.0, %v3336_v58 }
 0x8d4   :  { %v3293_v57 = vadd.f32 %v4739_v22, %v3292_v31  ;;  %v3314_v53 = vmul.f32 %v4741_v46, %v3313_v43 }
 0x8d5   :  { %v3338_v47 = vmul.f32 %v4743_v23, %v3337_v61 }
 0x8d6   :  { %v3297_v59 = vsel %vm3296_vm8, %v4739_v22, %v3293_v57  ;;  %v3315_v32 = vadd.f32 %v4741_v46, %v3314_v53 }
 0x8d7   :  { %v3302_v54 = vsel %vm3299_vm3, %v3301_v19, %v3297_v59  ;;  %v3339_v26 = vadd.f32 %v4743_v23, %v3338_v47 }
 0x8d8   :  { %v3319_v18 = vsel %vm3318_vm7, %v4741_v46, %v3315_v32  ;;  %v3351_v16 = vmul.f32 %v4745_v63, %v3302_v54 }
 0x8d9   :  { %v3324_v42 = vsel %vm3321_vm9, %v3323_v40, %v3319_v18  ;;  %v3343_v35 = vsel %vm3342_vm13, %v4743_v23, %v3339_v26 }
 0x8da   :  { %v3350_v62 = vmul.f32 %v3324_v42, %v6952_v44  ;;  %v3348_v14 = vsel %vm3345_vm14, %v3347_v9, %v3343_v35 }
 0x8dc   :  { %v7056_v36 = vadd.f32 %v3351_v16, %v3350_v62 }
 0x8de   :  { %4746 = vtanh.f32 %v7056_v36 }
 0x8e4   :  { %v4747_v30 = vpop.eup %4746 }
 0x8e5   :  { %v3354_v0 = vmul.f32 %v4747_v30, %v3348_v14  ;;  %v7067_v14 = vld [vmem:[#allocation7 + $0x3e0] sm:$0xff] }
 0x8e7   :  { %3355 = vst [vmem:[#allocation2 + $0x6] sm:$0x3] %v3354_v0  ;;  %3437 = vmatmul.f32.vlgmr.msrb.gmra.mxu0 %v3354_v0  ;;  %3457 = vmatmul.f32.vlgmr.msra.gmra.mxu1 %v3354_v0 }
 0x8e8   :  { %3477 = vmatmul.f32.vlgmr.msrb.gmra.mxu2 %v3354_v0  ;;  %3497 = vmatmul.f32.vlgmr.msra.gmra.mxu3 %v3354_v0  ;;  %v7069_v0 = vld [vmem:[#allocation7 + $0x3e8] sm:$0xff] }
 0x8e9   :  { %3877 = vmatpush.msrb.mxu0 %v7067_v14  ;;  %3897 = vmatpush.msra.mxu1 %v7069_v0 }
 0x8ee   :  { %v4275_v44 = vld [vmem:[#allocation2 + $0x6] sm:$0x3] }
 0x8ef   :  { %4314 = vst [vmem:[#allocation1 + $0x3] ss:$4 sm:$0xff] %v4275_v44  ;;  %v7071_v44 = vld [vmem:[#allocation7 + $0x3f0] sm:$0xff] }
 0x8f0   :  { %3917 = vmatpush.msrb.mxu2 %v7071_v44 }
 0x964   :  { %v3458_v39 = vpop.f32.mrf.mxu1  ;;  %v3438_v48 = vpop.f32.mrf.mxu0 }
 0x965   :  { %v3505_v10 = vrot.slane %v3458_v39, 6  ;;  %v7075_v39 = vld [vmem:[#allocation7 + $0x3f8] sm:$0xff] }
 0x966   :  { %3937 = vmatpush.msra.mxu3 %v7075_v39 }
 0x967   :  { %v3508_v49 = vsel %vm281_vm5, %v3438_v48, %v3505_v10  ;;  %v7079_v10 = vld [vmem:[#allocation7 + $0x3c0] sm:$0xff]  ;;  %v7093_v48 = vld [vmem:[#allocation7 + $0x3a8] sm:$0xff] }
 0x968   :  { %3878 = vmatpush.msrb.mxu0 %v7079_v10 }
 0x96b   :  { %v3478_v41 = vpop.f32.mrf.mxu2  ;;  %v3498_v38 = vpop.f32.mrf.mxu3 }
 0x96c   :  { %v3506_v7 = vrot.slane %v3478_v41, 4  ;;  %v3507_v33 = vrot.slane %v3498_v38, 2  ;;  %v7081_v41 = vld [vmem:[#allocation7 + $0x3c8] sm:$0xff]  ;;  %v7083_v38 = vld [vmem:[#allocation7 + $0x3d0] sm:$0xff] }
 0x96d   :  { %3898 = vmatpush.msra.mxu1 %v7081_v41  ;;  %3918 = vmatpush.msrb.mxu2 %v7083_v38 }
 0x96e   :  { %v3509_v24 = vsel %vm283_vm2, %v3506_v7, %v3507_v33  ;;  %v7087_v7 = vld [vmem:[#allocation7 + $0x3d8] sm:$0xff]  ;;  %v7091_v33 = vld [vmem:[#allocation7 + $0x3a0] sm:$0xff] }
 0x96f   :  { %v3510_v55 = vsel %vm285_vm6, %v3508_v49, %v3509_v24  ;;  %3938 = vmatpush.msra.mxu3 %v7087_v7  ;;  %v7095_v49 = vld [vmem:[#allocation7 + $0x3b0] sm:$0xff]  ;;  %3879 = vmatpush.msrb.mxu0 %v7091_v33  ;;  %v7099_v24 = vld [vmem:[#allocation7 + $0x3b8] sm:$0xff] }
 0x970   :  { %v3512_v60 = vadd.f32 %v3510_v55, %v7709_v25  ;;  %3899 = vmatpush.msra.mxu1 %v7093_v48  ;;  %3919 = vmatpush.msrb.mxu2 %v7095_v49  ;;  %v7103_v55 = vld [vmem:[#allocation7 + $0x380] sm:$0xff]  ;;  %v7105_v25 = vld [vmem:[#allocation7 + $0x388] sm:$0xff] }
 0x971   :  { %3939 = vmatpush.msra.mxu3 %v7099_v24  ;;  %3880 = vmatpush.msrb.mxu0 %v7103_v55 }
 0x972   :  { %v4527_v15 = vmul.f32 -1.442695, %v3512_v60  ;;  %v3533_v21 = vrot.slane %v3512_v60, 2  ;;  %v3557_v50 = vrot.slane %v3512_v60, 6  ;;  %v3554_v22 = vrot.slane %v3512_v60, 4  ;;  %v7107_v60 = vld [vmem:[#allocation7 + $0x390] sm:$0xff]  ;;  %3900 = vmatpush.msra.mxu1 %v7105_v25 }
 0x973   :  { %3920 = vmatpush.msrb.mxu2 %v7107_v60 }
 0x974   :  { %4748 = vpow2.f32 %v4527_v15  ;;  %v4528_v6 = vmul.f32 -1.442695, %v3533_v21  ;;  %v4529_v52 = vmul.f32 -1.442695, %v3557_v50  ;;  %v7111_v15 = vld [vmem:[#allocation7 + $0x398] sm:$0xff]  ;;  %v7115_v21 = vld [vmem:[#allocation7 + $0x360] sm:$0xff] }
 0x975   :  { %3940 = vmatpush.msra.mxu3 %v7111_v15  ;;  %v7117_v50 = vld [vmem:[#allocation7 + $0x368] sm:$0xff]  ;;  %3881 = vmatpush.msrb.mxu0 %v7115_v21 }
 0x976   :  { %4750 = vpow2.f32 %v4528_v6  ;;  %v7119_v6 = vld [vmem:[#allocation7 + $0x370] sm:$0xff]  ;;  %3901 = vmatpush.msra.mxu1 %v7117_v50 }
 0x977   :  { %4752 = vpow2.f32 %v4529_v52  ;;  %3921 = vmatpush.msrb.mxu2 %v7119_v6 }
 0x97a   :  { %v4749_v13 = vpop.eup %4748 }
 0x97b   :  { %v3516_v20 = vadd.f32 1.0, %v4749_v13  ;;  %v7123_v13 = vld [vmem:[#allocation7 + $0x378] sm:$0xff] }
 0x97c   :  { %v4751_v45 = vpop.eup %4750  ;;  %3941 = vmatpush.msra.mxu3 %v7123_v13 }
 0x97d   :  { %v4753_v56 = vpop.eup %4752  ;;  %4754 = vrcp.f32 %v3516_v20  ;;  %v3538_v12 = vadd.f32 1.0, %v4751_v45  ;;  %v3528_v23 = vand.u32 2147483648, %v3516_v20  ;;  %v3526_v58 = vand.u32 2147483647, %v3516_v20  ;;  %v7129_v45 = vld [vmem:[#allocation7 + $0x348] sm:$0xff] }
 0x97e   :  { %v3562_v11 = vadd.f32 1.0, %v4753_v56  ;;  %vm3522_vm8 = vweird.f32 %v3516_v20  ;;  %v7131_v56 = vld [vmem:[#allocation7 + $0x350] sm:$0xff]  ;;  %3902 = vmatpush.msra.mxu1 %v7129_v45 }
 0x97f   :  { %4756 = vrcp.f32 %v3538_v12  ;;  %v3550_v43 = vand.u32 2147483648, %v3538_v12  ;;  %v3548_v17 = vand.u32 2147483647, %v3538_v12  ;;  %v3529_v57 = vor.u32 1.1754944e-38, %v3528_v23  ;;  %3922 = vmatpush.msrb.mxu2 %v7131_v56  ;;  %v7151_v23 = vld [vmem:[#allocation7 + $0x308] sm:$0xff] }
 0x980   :  { %4758 = vrcp.f32 %v3562_v11  ;;  %vm3527_vm7 = vcmp.eq.f32.partialorder %v3526_v58, 8.507059e+37  ;;  %vm3544_vm9 = vweird.f32 %v3538_v12  ;;  %v3574_v16 = vand.u32 2147483648, %v3562_v11 }
 0x981   :  { %4760 = vtanh.f32 %v3554_v22  ;;  %v3551_v59 = vor.u32 1.1754944e-38, %v3550_v43  ;;  %vm3549_vm11 = vcmp.eq.f32.partialorder %v3548_v17, 8.507059e+37  ;;  %vm3568_vm14 = vweird.f32 %v3562_v11  ;;  %v7145_v22 = vld [vmem:[#allocation7 + $0x338] sm:$0xff]  ;;  %v7159_v43 = vld [vmem:[#allocation7 + $0x2e0] sm:$0xff]  ;;  %v7165_v17 = vld [vmem:[#allocation7 + $0x2f0] sm:$0xff] }
 0x982   :  { %v3572_v26 = vand.u32 2147483647, %v3562_v11  ;;  %v3575_v37 = vor.u32 1.1754944e-38, %v3574_v16  ;;  %v7195_v16 = vld [vmem:[#allocation7 + $0x2b0] sm:$0xff] }
 0x983   :  { %v4755_v8 = vpop.eup %4754 }
 0x984   :  { %v3518_v34 = vmul.f32 %v4755_v8, %v3516_v20  ;;  %vm3523_vm15 = vweird.f32 %v4755_v8  ;;  %v7127_v20 = vld [vmem:[#allocation7 + $0x340] sm:$0xff] }
 0x985   :  { %v4757_v28 = vpop.eup %4756  ;;  %vm3524_vm4 = vmor %vm3522_vm8, %vm3523_vm15  ;;  %vm3573_vm8 = vcmp.eq.f32.partialorder %v3572_v26, 8.507059e+37  ;;  %3882 = vmatpush.msrb.mxu0 %v7127_v20  ;;  %v7197_v26 = vld [vmem:[#allocation7 + $0x2b8] sm:$0xff] }
 0x986   :  { %v4759_v2 = vpop.eup %4758  ;;  %v3519_v46 = vsub.f32 1.0, %v3518_v34  ;;  %v3540_v4 = vmul.f32 %v4757_v28, %v3538_v12  ;;  %vm3545_vm3 = vweird.f32 %v4757_v28  ;;  %v7135_v12 = vld [vmem:[#allocation7 + $0x358] sm:$0xff] }
 0x987   :  { %v3564_v29 = vmul.f32 %v4759_v2, %v3562_v11  ;;  %vm3546_vm10 = vmor %vm3544_vm9, %vm3545_vm3  ;;  %v4761_v54 = vpop.eup %4760  ;;  %vm3569_vm13 = vweird.f32 %v4759_v2  ;;  %v7137_v11 = vld [vmem:[#allocation7 + $0x320] sm:$0xff]  ;;  %3942 = vmatpush.msra.mxu3 %v7135_v12 }
 0x988   :  { %v3541_v3 = vsub.f32 1.0, %v3540_v4  ;;  %v3520_v1 = vmul.f32 %v4755_v8, %v3519_v46  ;;  %vm3570_vm15 = vmor %vm3568_vm14, %vm3569_vm13  ;;  %3883 = vmatpush.msrb.mxu0 %v7137_v11 }
 0x989   :  { %v3565_v53 = vsub.f32 1.0, %v3564_v29  ;;  %v7153_v29 = vld [vmem:[#allocation7 + $0x310] sm:$0xff]  ;;  %3943 = vmatpush.msra.mxu3 %v7145_v22 }
 0x98a   :  { %v3521_v31 = vadd.f32 %v4755_v8, %v3520_v1  ;;  %v3542_v51 = vmul.f32 %v4757_v28, %v3541_v3  ;;  %v7155_v3 = vld [vmem:[#allocation7 + $0x318] sm:$0xff] }
 0x98b   :  { %v3566_v18 = vmul.f32 %v4759_v2, %v3565_v53  ;;  %3944 = vmatpush.msra.mxu3 %v7155_v3 }
 0x98c   :  { %v3525_v5 = vsel %vm3524_vm4, %v4755_v8, %v3521_v31  ;;  %v3543_v19 = vadd.f32 %v4757_v28, %v3542_v51  ;;  %v7139_v8 = vld [vmem:[#allocation7 + $0x328] sm:$0xff] }
 0x98d   :  { %v3530_v61 = vsel %vm3527_vm7, %v3529_v57, %v3525_v5  ;;  %v3567_v62 = vadd.f32 %v4759_v2, %v3566_v18  ;;  %3903 = vmatpush.msra.mxu1 %v7139_v8  ;;  %v7161_v31 = vld [vmem:[#allocation7 + $0x2e8] sm:$0xff]  ;;  %v7167_v57 = vld [vmem:[#allocation7 + $0x2f8] sm:$0xff] }
 0x98e   :  { %v3547_v32 = vsel %vm3546_vm10, %v4757_v28, %v3543_v19  ;;  %v3579_v42 = vmul.f32 %v4761_v54, %v3530_v61  ;;  %v7143_v28 = vld [vmem:[#allocation7 + $0x330] sm:$0xff]  ;;  %v7710_v5 = vld [vmem:[#allocation35_spill] sm:$0xff]  ;;  %v7183_v18 = vld [vmem:[#allocation7 + $0x2d8] sm:$0xff]  ;;  %3945 = vmatpush.msra.mxu3 %v7167_v57 }
 0x98f   :  { %v3552_v40 = vsel %vm3549_vm11, %v3551_v59, %v3547_v32  ;;  %v3571_v27 = vsel %vm3570_vm15, %v4759_v2, %v3567_v62  ;;  %v7147_v2 = vld [vmem:[#allocation7 + $0x300] sm:$0xff]  ;;  %3923 = vmatpush.msrb.mxu2 %v7143_v28  ;;  %3904 = vmatpush.msra.mxu1 %v7151_v23  ;;  %v2414_v19 = vrot.slane %v7710_v5, 2  ;;  %v7176_v32 = vld [vmem:[#allocation7 + $0x2c8] sm:$0xff] }
 0x990   :  { %v3578_v63 = vmul.f32 %v3552_v40, %v7056_v36  ;;  %v3576_v9 = vsel %vm3573_vm8, %v3575_v37, %v3571_v27  ;;  %3884 = vmatpush.msrb.mxu0 %v7147_v2  ;;  %v7174_v59 = vld [vmem:[#allocation7 + $0x2c0] sm:$0xff]  ;;  %v7181_v40 = vld [vmem:[#allocation7 + $0x2d0] sm:$0xff]  ;;  %v7191_v62 = vld [vmem:[#allocation7 + $0x2a8] sm:$0xff]  ;;  %3946 = vmatpush.msra.mxu3 %v7183_v18 }
 0x991   :  { %3924 = vmatpush.msrb.mxu2 %v7153_v29  ;;  %3905 = vmatpush.msra.mxu1 %v7161_v31  ;;  %v7230_v5 = vld [vmem:[#allocation7 + $0x248] sm:$0xff] }
 0x992   :  { %v7064_v47 = vadd.f32 %v3579_v42, %v3578_v63  ;;  %3885 = vmatpush.msrb.mxu0 %v7159_v43  ;;  %v7189_v42 = vld [vmem:[#allocation7 + $0x2a0] sm:$0xff]  ;;  %3947 = vmatpush.msra.mxu3 %v7197_v26  ;;  %7715 = vst [vmem:[#allocation30_spill] sm:$0xff] %v7230_v5 }
 0x993   :  { %3925 = vmatpush.msrb.mxu2 %v7165_v17  ;;  %3906 = vmatpush.msra.mxu1 %v7176_v32 }
 0x994   :  { %4762 = vtanh.f32 %v7064_v47  ;;  %3886 = vmatpush.msrb.mxu0 %v7174_v59 }
 0x995   :  { %3926 = vmatpush.msrb.mxu2 %v7181_v40  ;;  %3907 = vmatpush.msra.mxu1 %v7191_v62 }
 0x996   :  { %3887 = vmatpush.msrb.mxu0 %v7189_v42 }
 0x997   :  { %3927 = vmatpush.msrb.mxu2 %v7195_v16 }
 0x99a   :  { %v4763_v35 = vpop.eup %4762 }
 0x99b   :  { %v3582_v30 = vmul.f32 %v4763_v35, %v3576_v9  ;;  %v7204_v9 = vld [vmem:[#allocation7 + $0x280] sm:$0xff] }
 0x99c   :  { %3888 = vmatpush.msrb.mxu0 %v7204_v9 }
 0x99d   :  { %3583 = vst [vmem:[#allocation2 + $0x8] sm:$0x3] %v3582_v30  ;;  %3665 = vmatmul.f32.vlgmr.msra.gmra.mxu0 %v3582_v30  ;;  %3685 = vmatmul.f32.vlgmr.msrb.gmra.mxu1 %v3582_v30 }
 0x99e   :  { %3705 = vmatmul.f32.vlgmr.msra.gmra.mxu2 %v3582_v30  ;;  %3725 = vmatmul.f32.vlgmr.msrb.gmra.mxu3 %v3582_v30  ;;  %v7206_v30 = vld [vmem:[#allocation7 + $0x288] sm:$0xff] }
 0x99f   :  { %3908 = vmatpush.msra.mxu1 %v7206_v30 }
 0x9a4   :  { %v4276_v36 = vld [vmem:[#allocation2 + $0x8] sm:$0x3] }
 0x9a5   :  { %4316 = vst [vmem:[#allocation1 + $0x20] ss:$4 sm:$0xff] %v4276_v36  ;;  %v7210_v36 = vld [vmem:[#allocation7 + $0x290] sm:$0xff] }
 0x9a6   :  { %3928 = vmatpush.msrb.mxu2 %v7210_v36 }
 0xa1a   :  { %v3686_v52 = vpop.f32.mrf.mxu1  ;;  %v3666_v51 = vpop.f32.mrf.mxu0 }
 0xa1b   :  { %v3733_v34 = vrot.slane %v3686_v52, 6  ;;  %v7212_v52 = vld [vmem:[#allocation7 + $0x298] sm:$0xff] }
 0xa1c   :  { %3948 = vmatpush.msra.mxu3 %v7212_v52 }
 0xa1d   :  { %v3736_v53 = vsel %vm281_vm5, %v3666_v51, %v3733_v34  ;;  %v7224_v51 = vld [vmem:[#allocation7 + $0x278] sm:$0xff] }
 0xa1e   :  { %7713 = vst [vmem:[#allocation25_spill] sm:$0xff] %v7224_v51  ;;  %3949 = vmatpush.msra.mxu3 %v7224_v51  ;;  %v7254_v51 = vld [vmem:[#allocation7 + $0x208] sm:$0xff] }
 0xa21   :  { %v3706_v46 = vpop.f32.mrf.mxu2  ;;  %v3726_v4 = vpop.f32.mrf.mxu3 }
 0xa22   :  { %v3734_v1 = vrot.slane %v3706_v46, 4  ;;  %v3735_v58 = vrot.slane %v3726_v4, 2  ;;  %v7216_v4 = vld [vmem:[#allocation7 + $0x260] sm:$0xff] }
 0xa23   :  { %3889 = vmatpush.msrb.mxu0 %v7216_v4 }
 0xa24   :  { %v3737_v61 = vsel %vm283_vm2, %v3734_v1, %v3735_v58  ;;  %v7218_v1 = vld [vmem:[#allocation7 + $0x268] sm:$0xff]  ;;  %v7222_v58 = vld [vmem:[#allocation7 + $0x270] sm:$0xff] }
 0xa25   :  { %v3738_v54 = vsel %vm285_vm6, %v3736_v53, %v3737_v61  ;;  %7711 = vst [vmem:[#allocation27_spill] sm:$0xff] %v7218_v1  ;;  %v7228_v53 = vld [vmem:[#allocation7 + $0x240] sm:$0xff]  ;;  %3909 = vmatpush.msra.mxu1 %v7218_v1  ;;  %v7236_v61 = vld [vmem:[#allocation7 + $0x258] sm:$0xff]  ;;  %3929 = vmatpush.msrb.mxu2 %v7222_v58 }
 0xa26   :  { %v7185_v63 = vadd.f32 %v3738_v54, %v2414_v19  ;;  %7712 = vst [vmem:[#allocation26_spill] sm:$0xff] %v7222_v58  ;;  %v7234_v19 = vld [vmem:[#allocation7 + $0x250] sm:$0xff]  ;;  %v7240_v54 = vld [vmem:[#allocation7 + $0x220] sm:$0xff]  ;;  %3890 = vmatpush.msrb.mxu0 %v7228_v53  ;;  %3950 = vmatpush.msra.mxu3 %v7236_v61 }
 0xa27   :  { %7714 = vst [vmem:[#allocation29_spill] sm:$0xff] %v7228_v53  ;;  %3910 = vmatpush.msra.mxu1 %v7230_v5  ;;  %3930 = vmatpush.msrb.mxu2 %v7234_v19  ;;  %v7260_v5 = vld [vmem:[#allocation7 + $0x210] sm:$0xff]  ;;  %v7262_v53 = vld [vmem:[#allocation7 + $0x218] sm:$0xff] }
 0xa28   :  { %v4530_v27 = vmul.f32 -1.442695, %v7185_v63  ;;  %v3761_v37 = vrot.slane %v7185_v63, 2  ;;  %v3785_v35 = vrot.slane %v7185_v63, 6  ;;  %7716 = vst [vmem:[#allocation40_spill] sm:$0xff] %v7234_v19  ;;  %3891 = vmatpush.msrb.mxu0 %v7240_v54 }
 0xa29   :  { %7717 = vst [vmem:[#allocation41_spill] sm:$0xff] %v7236_v61 }
 0xa2a   :  { %4764 = vpow2.f32 %v4530_v27  ;;  %v4531_v34 = vmul.f32 -1.442695, %v3761_v37  ;;  %v4532_v46 = vmul.f32 -1.442695, %v3785_v35  ;;  %v7242_v27 = vld [vmem:[#allocation7 + $0x228] sm:$0xff]  ;;  %v7246_v37 = vld [vmem:[#allocation7 + $0x230] sm:$0xff] }
 0xa2b   :  { %v7248_v35 = vld [vmem:[#allocation7 + $0x238] sm:$0xff]  ;;  %3911 = vmatpush.msra.mxu1 %v7242_v27  ;;  %3931 = vmatpush.msrb.mxu2 %v7246_v37 }
 0xa2c   :  { %4766 = vpow2.f32 %v4531_v34  ;;  %3951 = vmatpush.msra.mxu3 %v7248_v35 }
 0xa2d   :  { %4768 = vpow2.f32 %v4532_v46  ;;  %v7252_v46 = vld [vmem:[#allocation7 + $0x200] sm:$0xff]  ;;  %3912 = vmatpush.msra.mxu1 %v7254_v51  ;;  %3932 = vmatpush.msrb.mxu2 %v7260_v5 }
 0xa2e   :  { %3892 = vmatpush.msrb.mxu0 %v7252_v46  ;;  %3952 = vmatpush.msra.mxu3 %v7262_v53 }
 0xa2f   :  { %4125 = vmatpush.msrb.mxu1 %v7069_v0  ;;  %4145 = vmatpush.msra.mxu2 %v7071_v44  ;;  %v3782_v44 = vrot.slane %v7185_v63, 4 }
 0xa30   :  { %v4765_v34 = vpop.eup %4764  ;;  %4105 = vmatpush.msra.mxu0 %v7067_v14  ;;  %4165 = vmatpush.msrb.mxu3 %v7075_v39  ;;  %v7724_v63 = vld [vmem:[#allocation41_spill] sm:$0xff] }
 0xa31   :  { %v7256_v58 = vadd.f32 1.0, %v4765_v34  ;;  %4126 = vmatpush.msrb.mxu1 %v7081_v41  ;;  %4146 = vmatpush.msra.mxu2 %v7083_v38 }
 0xa32   :  { %v4767_v1 = vpop.eup %4766  ;;  %4106 = vmatpush.msra.mxu0 %v7079_v10  ;;  %4166 = vmatpush.msrb.mxu3 %v7087_v7 }
 0xa33   :  { %v4769_v61 = vpop.eup %4768  ;;  %4770 = vrcp.f32 %v7256_v58  ;;  %v7267_v19 = vadd.f32 1.0, %v4767_v1  ;;  %4127 = vmatpush.msrb.mxu1 %v7093_v48  ;;  %4147 = vmatpush.msra.mxu2 %v7095_v49  ;;  %v3756_v38 = vand.u32 2147483648, %v7256_v58  ;;  %v3754_v49 = vand.u32 2147483647, %v7256_v58 }
 0xa34   :  { %v7271_v34 = vadd.f32 1.0, %v4769_v61  ;;  %4107 = vmatpush.msra.mxu0 %v7091_v33  ;;  %4167 = vmatpush.msrb.mxu3 %v7099_v24  ;;  %vm3750_vm4 = vweird.f32 %v7256_v58 }
 0xa35   :  { %4772 = vrcp.f32 %v7267_v19  ;;  %4128 = vmatpush.msrb.mxu1 %v7105_v25  ;;  %4148 = vmatpush.msra.mxu2 %v7107_v60  ;;  %v3778_v24 = vand.u32 2147483648, %v7267_v19  ;;  %v3776_v60 = vand.u32 2147483647, %v7267_v19  ;;  %vm3755_vm10 = vcmp.eq.f32.partialorder %v3754_v49, 8.507059e+37  ;;  %v4284_v49 = vld [vmem:[%s7480_s8 + $0x20] sm:$0xff] }
 0xa36   :  { %4774 = vrcp.f32 %v7271_v34  ;;  %4108 = vmatpush.msra.mxu0 %v7103_v55  ;;  %4168 = vmatpush.msrb.mxu3 %v7111_v15  ;;  %v3757_v15 = vor.u32 1.1754944e-38, %v3756_v38  ;;  %vm3772_vm11 = vweird.f32 %v7267_v19  ;;  %vm3796_vm8 = vweird.f32 %v7271_v34  ;;  %v4287_v38 = vld [vmem:[%s7480_s8 + $0x38] sm:$0xff] }
 0xa37   :  { %4129 = vmatpush.msrb.mxu1 %v7117_v50  ;;  %4149 = vmatpush.msra.mxu2 %v7119_v6  ;;  %4776 = vtanh.f32 %v3782_v44  ;;  %vm3777_vm14 = vcmp.eq.f32.partialorder %v3776_v60, 8.507059e+37 }
 0xa38   :  { %4109 = vmatpush.msra.mxu0 %v7115_v21  ;;  %4169 = vmatpush.msrb.mxu3 %v7123_v13 }
 0xa39   :  { %v4771_v1 = vpop.eup %4770  ;;  %4130 = vmatpush.msrb.mxu1 %v7129_v45  ;;  %4150 = vmatpush.msra.mxu2 %v7131_v56 }
 0xa3a   :  { %v3746_v14 = vmul.f32 %v4771_v1, %v7256_v58  ;;  %vm3751_vm3 = vweird.f32 %v4771_v1  ;;  %4110 = vmatpush.msra.mxu0 %v7127_v20  ;;  %4170 = vmatpush.msrb.mxu3 %v7135_v12  ;;  %v3779_v20 = vor.u32 1.1754944e-38, %v3778_v24 }
 0xa3b   :  { %v4773_v0 = vpop.eup %4772  ;;  %vm3752_vm9 = vmor %vm3750_vm4, %vm3751_vm3  ;;  %4131 = vmatpush.msrb.mxu1 %v7139_v8  ;;  %4151 = vmatpush.msra.mxu2 %v7143_v28 }
 0xa3c   :  { %v7293_v39 = vpop.eup %4774  ;;  %v3747_v10 = vsub.f32 1.0, %v3746_v14  ;;  %v3768_v41 = vmul.f32 %v4773_v0, %v7267_v19  ;;  %vm3773_vm7 = vweird.f32 %v4773_v0  ;;  %4111 = vmatpush.msra.mxu0 %v7137_v11  ;;  %4171 = vmatpush.msrb.mxu3 %v7145_v22 }
 0xa3d   :  { %v3792_v7 = vmul.f32 %v7293_v39, %v7271_v34  ;;  %vm3774_vm13 = vmor %vm3772_vm11, %vm3773_vm7  ;;  %4132 = vmatpush.msrb.mxu1 %v7151_v23  ;;  %4152 = vmatpush.msra.mxu2 %v7153_v29  ;;  %v4777_v56 = vpop.eup %4776  ;;  %vm3797_vm15 = vweird.f32 %v7293_v39  ;;  %v3800_v23 = vand.u32 2147483647, %v7271_v34 }
 0xa3e   :  { %v3769_v33 = vsub.f32 1.0, %v3768_v41  ;;  %v3748_v48 = vmul.f32 %v4771_v1, %v3747_v10  ;;  %4112 = vmatpush.msra.mxu0 %v7147_v2  ;;  %4172 = vmatpush.msrb.mxu3 %v7155_v3  ;;  %vm3798_vm3 = vmor %vm3796_vm8, %vm3797_vm15  ;;  %v7718_v3 = vld [vmem:[#allocation27_spill] sm:$0xff] }
 0xa3f   :  { %v3793_v21 = vsub.f32 1.0, %v3792_v7  ;;  %4133 = vmatpush.msrb.mxu1 %v7161_v31  ;;  %4153 = vmatpush.msra.mxu2 %v7165_v17  ;;  %v7719_v31 = vld [vmem:[#allocation26_spill] sm:$0xff]  ;;  %v7720_v17 = vld [vmem:[#allocation25_spill] sm:$0xff]  ;;  %vm3801_vm4 = vcmp.eq.f32.partialorder %v3800_v23, 8.507059e+37 }
 0xa40   :  { %v3749_v55 = vadd.f32 %v4771_v1, %v3748_v48  ;;  %v3770_v25 = vmul.f32 %v4773_v0, %v3769_v33  ;;  %4113 = vmatpush.msra.mxu0 %v7159_v43  ;;  %4173 = vmatpush.msrb.mxu3 %v7167_v57  ;;  %v7721_v57 = vld [vmem:[#allocation29_spill] sm:$0xff]  ;;  %v4285_v33 = vld [vmem:[%s7480_s8 + $0x28] sm:$0xff] }
 0xa41   :  { %v3794_v11 = vmul.f32 %v7293_v39, %v3793_v21  ;;  %4134 = vmatpush.msrb.mxu1 %v7176_v32  ;;  %4154 = vmatpush.msra.mxu2 %v7181_v40  ;;  %v4286_v7 = vld [vmem:[%s7480_s8 + $0x30] sm:$0xff]  ;;  %v4283_v21 = vld [vmem:[%s7480_s8 + $0x18] sm:$0xff] }
 0xa42   :  { %v3753_v50 = vsel %vm3752_vm9, %v4771_v1, %v3749_v55  ;;  %v3771_v6 = vadd.f32 %v4773_v0, %v3770_v25  ;;  %4114 = vmatpush.msra.mxu0 %v7174_v59  ;;  %4174 = vmatpush.msrb.mxu3 %v7183_v18  ;;  %v7722_v59 = vld [vmem:[#allocation30_spill] sm:$0xff]  ;;  %v7723_v18 = vld [vmem:[#allocation40_spill] sm:$0xff] }
 0xa43   :  { %v3758_v13 = vsel %vm3755_vm10, %v3757_v15, %v3753_v50  ;;  %v3795_v2 = vadd.f32 %v7293_v39, %v3794_v11  ;;  %4135 = vmatpush.msrb.mxu1 %v7191_v62  ;;  %4155 = vmatpush.msra.mxu2 %v7195_v16  ;;  %v4295_v16 = vld [vmem:[%s7480_s8 + $0x78] sm:$0xff]  ;;  %v4289_v1 = vld [vmem:[%s7480_s8 + $0x48] sm:$0xff]  ;;  %v4282_v50 = vld [vmem:[%s7480_s8 + $0x10] sm:$0xff] }
 0xa44   :  { %v3775_v45 = vsel %vm3774_vm13, %v4773_v0, %v3771_v6  ;;  %v3807_v28 = vmul.f32 %v4777_v56, %v3758_v13  ;;  %4115 = vmatpush.msra.mxu0 %v7189_v42  ;;  %4175 = vmatpush.msrb.mxu3 %v7197_v26  ;;  %v4281_v6 = vld [vmem:[%s7480_s8 + $0x8] sm:$0xff]  ;;  %v4280_v13 = vld [vmem:[%s7480_s8] sm:$0xff] }
 0xa45   :  { %v3780_v12 = vsel %vm3777_vm14, %v3779_v20, %v3775_v45  ;;  %4136 = vmatpush.msrb.mxu1 %v7206_v30  ;;  %4156 = vmatpush.msra.mxu2 %v7210_v36  ;;  %v3799_v29 = vsel %vm3798_vm3, %v7293_v39, %v3795_v2  ;;  %v4293_v30 = vld [vmem:[%s7480_s8 + $0x68] sm:$0xff]  ;;  %v4288_v39 = vld [vmem:[%s7480_s8 + $0x40] sm:$0xff] }
 0xa46   :  { %v3806_v8 = vmul.f32 %v3780_v12, %v7064_v47  ;;  %v3802_v47 = vand.u32 2147483648, %v7271_v34  ;;  %4116 = vmatpush.msra.mxu0 %v7204_v9  ;;  %4176 = vmatpush.msrb.mxu3 %v7212_v52  ;;  %v4294_v9 = vld [vmem:[%s7480_s8 + $0x70] sm:$0xff]  ;;  %v4292_v52 = vld [vmem:[%s7480_s8 + $0x60] sm:$0xff] }
 0xa47   :  { %4137 = vmatpush.msrb.mxu1 %v7718_v3  ;;  %4157 = vmatpush.msra.mxu2 %v7719_v31 }
 0xa48   :  { %v7332_v22 = vadd.f32 %v3807_v28, %v3806_v8  ;;  %4117 = vmatpush.msra.mxu0 %v7216_v4  ;;  %v3803_v43 = vor.u32 1.1754944e-38, %v3802_v47  ;;  %4177 = vmatpush.msrb.mxu3 %v7720_v17 }
 0xa49   :  { %4138 = vmatpush.msrb.mxu1 %v7722_v59  ;;  %4158 = vmatpush.msra.mxu2 %v7723_v18 }
 0xa4a   :  { %4778 = vtanh.f32 %v7332_v22  ;;  %4118 = vmatpush.msra.mxu0 %v7721_v57  ;;  %v3804_v40 = vsel %vm3801_vm4, %v3803_v43, %v3799_v29  ;;  %4178 = vmatpush.msrb.mxu3 %v7724_v63 }
 0xa4b   :  { %4139 = vmatpush.msrb.mxu1 %v7242_v27  ;;  %4159 = vmatpush.msra.mxu2 %v7246_v37 }
 0xa4c   :  { %4119 = vmatpush.msra.mxu0 %v7240_v54  ;;  %4179 = vmatpush.msrb.mxu3 %v7248_v35  ;;  %v7725_v54 = vld [vmem:[#allocation36_spill] sm:$0xff]  ;;  %v4290_v35 = vld [vmem:[%s7480_s8 + $0x50] sm:$0xff] }
 0xa4d   :  { %4140 = vmatpush.msrb.mxu1 %v7254_v51  ;;  %4160 = vmatpush.msra.mxu2 %v7260_v5  ;;  %v4291_v5 = vld [vmem:[%s7480_s8 + $0x58] sm:$0xff]  ;;  %v2418_v27 = vrot.slane %v7725_v54, 4 }
 0xa4e   :  { %4120 = vmatpush.msra.mxu0 %v7252_v46  ;;  %4180 = vmatpush.msrb.mxu3 %v7262_v53 }
 0xa50   :  { %v4779_v32 = vpop.eup %4778 }
 0xa51   :  { %v3810_v42 = vmul.f32 %v4779_v32, %v3804_v40 }
 0xa53   :  { %3811 = vst [vmem:[#allocation2 + $0xa] sm:$0x3] %v3810_v42  ;;  %3893 = vmatmul.f32.vlgmr.msrb.gmra.mxu0 %v3810_v42  ;;  %3913 = vmatmul.f32.vlgmr.msra.gmra.mxu1 %v3810_v42 }
 0xa54   :  { %3933 = vmatmul.f32.vlgmr.msrb.gmra.mxu2 %v3810_v42  ;;  %3953 = vmatmul.f32.vlgmr.msra.gmra.mxu3 %v3810_v42 }
 0xa55   :  { %4327 = vmatpush.msrb.mxu0 %v4295_v16 }
 0xa57   :  { %4328 = vmatpush.msrb.mxu0 %v4294_v9 }
 0xa59   :  { %4329 = vmatpush.msrb.mxu0 %v4293_v30 }
 0xa5a   :  { %v4277_v62 = vld [vmem:[#allocation2 + $0xa] sm:$0x3] }
 0xa5b   :  { %4318 = vst [vmem:[#allocation1 + $0x21] ss:$4 sm:$0xff] %v4277_v62  ;;  %4330 = vmatpush.msrb.mxu0 %v4292_v52 }
 0xa5d   :  { %4331 = vmatpush.msrb.mxu0 %v4291_v5 }
 0xa5f   :  { %4332 = vmatpush.msrb.mxu0 %v4290_v35 }
 0xa61   :  { %4333 = vmatpush.msrb.mxu0 %v4289_v1 }
 0xa63   :  { %4334 = vmatpush.msrb.mxu0 %v4288_v39 }
 0xa65   :  { %4335 = vmatpush.msrb.mxu0 %v4287_v38  ;;  %v7726_v38 = vld [vmem:[#allocation37_spill] sm:$0xff] }
 0xa67   :  { %4336 = vmatpush.msrb.mxu0 %v4286_v7  ;;  %v2422_v7 = vrot.slane %v7726_v38, 6 }
 0xa69   :  { %4337 = vmatpush.msrb.mxu0 %v4285_v33 }
 0xa6b   :  { %4338 = vmatpush.msrb.mxu0 %v4284_v49 }
 0xa6d   :  { %4339 = vmatpush.msrb.mxu0 %v4283_v21 }
 0xa6f   :  { %4340 = vmatpush.msrb.mxu0 %v4282_v50 }
 0xa71   :  { %4341 = vmatpush.msrb.mxu0 %v4281_v6 }
 0xa73   :  { %4342 = vmatpush.msrb.mxu0 %v4280_v13  ;;  %v7727_v13 = vld [vmem:[#allocation17_spill] sm:$0xff] }
 0xad0   :  { %v3914_v26 = vpop.f32.mrf.mxu1  ;;  %v3894_v19 = vpop.f32.mrf.mxu0 }
 0xad1   :  { %v3961_v36 = vrot.slane %v3914_v26, 6 }
 0xad3   :  { %v3964_v61 = vsel %vm281_vm5, %v3894_v19, %v3961_v36 }
 0xad7   :  { %v3934_v4 = vpop.f32.mrf.mxu2  ;;  %v3954_v58 = vpop.f32.mrf.mxu3 }
 0xad8   :  { %v3962_v51 = vrot.slane %v3934_v4, 4  ;;  %v3963_v53 = vrot.slane %v3954_v58, 2 }
 0xada   :  { %v3965_v37 = vsel %vm283_vm2, %v3962_v51, %v3963_v53 }
 0xadb   :  { %v3966_v46 = vsel %vm285_vm6, %v3964_v61, %v3965_v37 }
 0xadc   :  { %v3968_v34 = vadd.f32 %v3966_v46, %v2418_v27  ;;  %v7426_v46 = vld [vmem:[%s7481_s9] ss:$0 sm:$0xff] }
 0xade   :  { %v4533_v14 = vmul.f32 -1.442695, %v3968_v34  ;;  %v3989_v0 = vrot.slane %v3968_v34, 2  ;;  %v4013_v44 = vrot.slane %v3968_v34, 6  ;;  %v4010_v12 = vrot.slane %v3968_v34, 4 }
 0xae0   :  { %4780 = vpow2.f32 %v4533_v14  ;;  %v4534_v10 = vmul.f32 -1.442695, %v3989_v0  ;;  %v4535_v41 = vmul.f32 -1.442695, %v4013_v44 }
 0xae2   :  { %4782 = vpow2.f32 %v4534_v10 }
 0xae3   :  { %4784 = vpow2.f32 %v4535_v41 }
 0xae6   :  { %v4781_v48 = vpop.eup %4780 }
 0xae7   :  { %v3972_v24 = vadd.f32 1.0, %v4781_v48 }
 0xae8   :  { %v4783_v55 = vpop.eup %4782 }
 0xae9   :  { %v4785_v25 = vpop.eup %4784  ;;  %4786 = vrcp.f32 %v3972_v24  ;;  %v3994_v60 = vadd.f32 1.0, %v4783_v55  ;;  %v3984_v2 = vand.u32 2147483648, %v3972_v24  ;;  %v3982_v3 = vand.u32 2147483647, %v3972_v24 }
 0xaea   :  { %v4018_v15 = vadd.f32 1.0, %v4785_v25  ;;  %vm3978_vm9 = vweird.f32 %v3972_v24 }
 0xaeb   :  { %4788 = vrcp.f32 %v3994_v60  ;;  %v4006_v43 = vand.u32 2147483648, %v3994_v60  ;;  %v4004_v57 = vand.u32 2147483647, %v3994_v60  ;;  %v3985_v59 = vor.u32 1.1754944e-38, %v3984_v2 }
 0xaec   :  { %4790 = vrcp.f32 %v4018_v15  ;;  %vm3983_vm13 = vcmp.eq.f32.partialorder %v3982_v3, 8.507059e+37  ;;  %vm4000_vm14 = vweird.f32 %v3994_v60  ;;  %v4030_v58 = vand.u32 2147483648, %v4018_v15 }
 0xaed   :  { %4792 = vtanh.f32 %v4010_v12  ;;  %v4007_v42 = vor.u32 1.1754944e-38, %v4006_v43  ;;  %vm4005_vm8 = vcmp.eq.f32.partialorder %v4004_v57, 8.507059e+37  ;;  %vm4024_vm4 = vweird.f32 %v4018_v15 }
 0xaee   :  { %v4028_v51 = vand.u32 2147483647, %v4018_v15  ;;  %v4031_v5 = vor.u32 1.1754944e-38, %v4030_v58 }
 0xaef   :  { %v4787_v20 = vpop.eup %4786 }
 0xaf0   :  { %v3974_v45 = vmul.f32 %v4787_v20, %v3972_v24  ;;  %vm3979_vm7 = vweird.f32 %v4787_v20 }
 0xaf1   :  { %v4789_v56 = vpop.eup %4788  ;;  %vm3980_vm11 = vmor %vm3978_vm9, %vm3979_vm7  ;;  %vm4029_vm9 = vcmp.eq.f32.partialorder %v4028_v51, 8.507059e+37 }
 0xaf2   :  { %v4791_v11 = vpop.eup %4790  ;;  %v3975_v8 = vsub.f32 1.0, %v3974_v45  ;;  %v3996_v28 = vmul.f32 %v4789_v56, %v3994_v60  ;;  %vm4001_vm10 = vweird.f32 %v4789_v56 }
 0xaf3   :  { %v4020_v47 = vmul.f32 %v4791_v11, %v4018_v15  ;;  %vm4002_vm15 = vmor %vm4000_vm14, %vm4001_vm10  ;;  %v4793_v16 = vpop.eup %4792  ;;  %vm4025_vm3 = vweird.f32 %v4791_v11 }
 0xaf4   :  { %v3997_v23 = vsub.f32 1.0, %v3996_v28  ;;  %v3976_v29 = vmul.f32 %v4787_v20, %v3975_v8  ;;  %vm4026_vm7 = vmor %vm4024_vm4, %vm4025_vm3 }
 0xaf5   :  { %v4021_v32 = vsub.f32 1.0, %v4020_v47 }
 0xaf6   :  { %v3977_v31 = vadd.f32 %v4787_v20, %v3976_v29  ;;  %v3998_v17 = vmul.f32 %v4789_v56, %v3997_v23 }
 0xaf7   :  { %v4022_v9 = vmul.f32 %v4791_v11, %v4021_v32 }
 0xaf8   :  { %v3981_v40 = vsel %vm3980_vm11, %v4787_v20, %v3977_v31  ;;  %v3999_v18 = vadd.f32 %v4789_v56, %v3998_v17 }
 0xaf9   :  { %v3986_v63 = vsel %vm3983_vm13, %v3985_v59, %v3981_v40  ;;  %v4023_v4 = vadd.f32 %v4791_v11, %v4022_v9 }
 0xafa   :  { %v4003_v62 = vsel %vm4002_vm15, %v4789_v56, %v3999_v18  ;;  %v4035_v36 = vmul.f32 %v4793_v16, %v3986_v63 }
 0xafb   :  { %v4008_v26 = vsel %vm4005_vm8, %v4007_v42, %v4003_v62  ;;  %v4027_v53 = vsel %vm4026_vm7, %v4791_v11, %v4023_v4 }
 0xafc   :  { %v4034_v30 = vmul.f32 %v4008_v26, %v7332_v22  ;;  %v4032_v61 = vsel %vm4029_vm9, %v4031_v5, %v4027_v53  ;;  %v4323_v22 = vld.sshfl [vmem:[#allocation1] sm:$0xff pattern:$0x73625140] }
 0xafe   :  { %v7420_v52 = vadd.f32 %v4035_v36, %v4034_v30 }
 0xb00   :  { %4794 = vtanh.f32 %v7420_v52 }
 0xb06   :  { %v4795_v19 = vpop.eup %4794 }
 0xb07   :  { %v4038_v54 = vmul.f32 %v4795_v19, %v4032_v61 }
 0xb09   :  { %4039 = vst [vmem:[#allocation2 + $0xc] sm:$0x3] %v4038_v54  ;;  %4121 = vmatmul.f32.vlgmr.msra.gmra.mxu0 %v4038_v54  ;;  %4141 = vmatmul.f32.vlgmr.msrb.gmra.mxu1 %v4038_v54 }
 0xb0a   :  { %4161 = vmatmul.f32.vlgmr.msra.gmra.mxu2 %v4038_v54  ;;  %4181 = vmatmul.f32.vlgmr.msrb.gmra.mxu3 %v4038_v54 }
 0xb10   :  { %v4278_v27 = vld [vmem:[#allocation2 + $0xc] sm:$0x3] }
 0xb11   :  { %4343 = vmatmul.f32.vlgmr.msrb.gmra.mxu0 %v4323_v22  ;;  %4320 = vst [vmem:[#allocation1 + $0x22] ss:$4 sm:$0xff] %v4278_v27 }
 0xb86   :  { %v4122_v37 = vpop.f32.mrf.mxu0  ;;  %v4142_v35 = vpop.f32.mrf.mxu1 }
 0xb87   :  { %v4189_v34 = vrot.slane %v4142_v35, 6 }
 0xb89   :  { %v4192_v41 = vsel %vm281_vm5, %v4122_v37, %v4189_v34 }
 0xb8d   :  { %v4162_v1 = vpop.f32.mrf.mxu2  ;;  %v4182_v14 = vpop.f32.mrf.mxu3 }
 0xb8e   :  { %v4190_v0 = vrot.slane %v4162_v1, 4  ;;  %v4191_v44 = vrot.slane %v4182_v14, 2  ;;  %v4344_v39 = vpop.f32.mrf.mxu0 }
 0xb8f   :  { %v4345_v10 = vadd.f32 %v7426_v46, %v4344_v39 }
 0xb90   :  { %v4193_v33 = vsel %vm283_vm2, %v4190_v0, %v4191_v44 }
 0xb91   :  { %v4194_v48 = vsel %vm285_vm6, %v4192_v41, %v4193_v33  ;;  %v4353_v49 = vrot.slane %v4345_v10, 4  ;;  %v4539_v24 = vrot.slane %v4345_v10, 6  ;;  %v4540_v55 = vrot.slane %v4345_v10, 10 }
 0xb92   :  { %v4196_v25 = vadd.f32 %v4194_v48, %v2422_v7 }
 0xb93   :  { %v4365_v60 = vsel %vm75_vm0, %v4539_v24, %v4345_v10  ;;  %v4373_v15 = vsel %vm75_vm0, %v4540_v55, %v4353_v49 }
 0xb94   :  { %v4536_v21 = vmul.f32 -1.442695, %v4196_v25  ;;  %v4217_v50 = vrot.slane %v4196_v25, 2  ;;  %v4241_v6 = vrot.slane %v4196_v25, 6  ;;  %v7436_v20 = vperm.slane %v4365_v60, %v7727_v13 }
 0xb95   :  { %v7439_v45 = vperm.slane %v4373_v15, %v7727_v13  ;;  %v4238_v17 = vrot.slane %v4196_v25, 4 }
 0xb96   :  { %4796 = vpow2.f32 %v4536_v21  ;;  %v4537_v56 = vmul.f32 -1.442695, %v4217_v50  ;;  %v4538_v12 = vmul.f32 -1.442695, %v4241_v6  ;;  %4404 = vst [vmem:[#allocation1] ss:$4 sm:$0xff] %v7436_v20 }
 0xb97   :  { %4406 = vst [vmem:[#allocation1 + $0x1] ss:$4 sm:$0xff] %v7439_v45  ;;  %v4370_v41 = vrot.slane %v7436_v20, 4  ;;  %v4378_v38 = vrot.slane %v7439_v45, 4 }
 0xb98   :  { %4798 = vpow2.f32 %v4537_v56 }
 0xb99   :  { %4800 = vpow2.f32 %v4538_v12  ;;  %v4371_v7 = vsel %vm75_vm0, 0.0, %v4370_v41  ;;  %v4379_v48 = vsel %vm75_vm0, 0.0, %v4378_v38 }
 0xb9c   :  { %v4797_v11 = vpop.eup %4796 }
 0xb9d   :  { %v4200_v8 = vadd.f32 1.0, %v4797_v11 }
 0xb9e   :  { %v4799_v28 = vpop.eup %4798 }
 0xb9f   :  { %v4801_v2 = vpop.eup %4800  ;;  %4802 = vrcp.f32 %v4200_v8  ;;  %v4222_v47 = vadd.f32 1.0, %v4799_v28  ;;  %v4212_v40 = vand.u32 2147483648, %v4200_v8  ;;  %v4210_v63 = vand.u32 2147483647, %v4200_v8 }
 0xba0   :  { %v4246_v23 = vadd.f32 1.0, %v4801_v2  ;;  %vm4206_vm5 = vweird.f32 %v4200_v8 }
 0xba1   :  { %4804 = vrcp.f32 %v4222_v47  ;;  %v4234_v16 = vand.u32 2147483648, %v4222_v47  ;;  %v4232_v9 = vand.u32 2147483647, %v4222_v47  ;;  %v4213_v36 = vor.u32 1.1754944e-38, %v4212_v40 }
 0xba2   :  { %4806 = vrcp.f32 %v4246_v23  ;;  %vm4211_vm11 = vcmp.eq.f32.partialorder %v4210_v63, 8.507059e+37  ;;  %vm4228_vm13 = vweird.f32 %v4222_v47  ;;  %v4258_v34 = vand.u32 2147483648, %v4246_v23 }
 0xba3   :  { %4808 = vtanh.f32 %v4238_v17  ;;  %v4235_v53 = vor.u32 1.1754944e-38, %v4234_v16  ;;  %vm4233_vm15 = vcmp.eq.f32.partialorder %v4232_v9, 8.507059e+37  ;;  %vm4252_vm3 = vweird.f32 %v4246_v23 }
 0xba4   :  { %v4256_v1 = vand.u32 2147483647, %v4246_v23  ;;  %v4259_v0 = vor.u32 1.1754944e-38, %v4258_v34 }
 0xba5   :  { %v4803_v29 = vpop.eup %4802 }
 0xba6   :  { %v4202_v3 = vmul.f32 %v4803_v29, %v4200_v8  ;;  %vm4207_vm2 = vweird.f32 %v4803_v29  ;;  %vm4257_vm7 = vcmp.eq.f32.partialorder %v4256_v1, 8.507059e+37 }
 0xba7   :  { %v4805_v43 = vpop.eup %4804  ;;  %vm4208_vm6 = vmor %vm4206_vm5, %vm4207_vm2 }
 0xba8   :  { %v4203_v31 = vsub.f32 1.0, %v4202_v3  ;;  %v4807_v57 = vpop.eup %4806  ;;  %v4224_v59 = vmul.f32 %v4805_v43, %v4222_v47  ;;  %vm4229_vm10 = vweird.f32 %v4805_v43 }
 0xba9   :  { %v4248_v18 = vmul.f32 %v4807_v57, %v4246_v23  ;;  %vm4230_vm14 = vmor %vm4228_vm13, %vm4229_vm10  ;;  %v4809_v19 = vpop.eup %4808  ;;  %vm4253_vm8 = vweird.f32 %v4807_v57 }
 0xbaa   :  { %v4204_v32 = vmul.f32 %v4803_v29, %v4203_v31  ;;  %v4225_v42 = vsub.f32 1.0, %v4224_v59  ;;  %vm4254_vm4 = vmor %vm4252_vm3, %vm4253_vm8 }
 0xbab   :  { %v4249_v4 = vsub.f32 1.0, %v4248_v18 }
 0xbac   :  { %v4205_v62 = vadd.f32 %v4803_v29, %v4204_v32  ;;  %v4226_v26 = vmul.f32 %v4805_v43, %v4225_v42 }
 0xbad   :  { %v4250_v54 = vmul.f32 %v4807_v57, %v4249_v4 }
 0xbae   :  { %v4209_v30 = vsel %vm4208_vm6, %v4803_v29, %v4205_v62  ;;  %v4227_v58 = vadd.f32 %v4805_v43, %v4226_v26 }
 0xbaf   :  { %v4214_v51 = vsel %vm4211_vm11, %v4213_v36, %v4209_v30  ;;  %v4251_v35 = vadd.f32 %v4807_v57, %v4250_v54 }
 0xbb0   :  { %v4231_v5 = vsel %vm4230_vm14, %v4805_v43, %v4227_v58  ;;  %v4263_v27 = vmul.f32 %v4809_v19, %v4214_v51 }
 0xbb1   :  { %v4236_v61 = vsel %vm4233_vm15, %v4235_v53, %v4231_v5  ;;  %v4255_v14 = vsel %vm4254_vm4, %v4807_v57, %v4251_v35 }
 0xbb2   :  { %v4262_v22 = vmul.f32 %v4236_v61, %v7420_v52  ;;  %v4260_v39 = vsel %vm4257_vm7, %v4259_v0, %v4255_v14 }
 0xbb4   :  { %v4264_v37 = vadd.f32 %v4263_v27, %v4262_v22 }
 0xbb6   :  { %4810 = vtanh.f32 %v4264_v37  ;;  %4271 = vst.msk [vmem:[#allocation12 + $0x2] sm:$0x3] %vm2173_vm12, %v4264_v37 }
 0xbbc   :  { %v4811_v44 = vpop.eup %4810 }
 0xbbd   :  { %v4266_v10 = vmul.f32 %v4811_v44, %v4260_v39 }
 0xbbf   :  { %4267 = vst [vmem:[#allocation2 + $0xe] sm:$0x3] %v4266_v10 }
 0xbc0   :  { %4269 = vst.msk [vmem:[#allocation10 + $0x2] sm:$0x3] %vm2173_vm12, %v4266_v10 }
 0xbc1   :  { %4450 = dma.vmem_to_hbm [thread:$0]  %s4443_s13, 64, %s4445_s28, [#allocation11], %s4942_s30, %s4942_s30, %s4947_s14  }
 0xbc2   :  { %4463 = dma.vmem_to_hbm [thread:$0]  %s4456_s3, 64, %s4458_s2, [#allocation11], %s4942_s30, %s4942_s30, %s4947_s14  }
 0xbc6   :  { %v4279_v52 = vld [vmem:[#allocation2 + $0xe] sm:$0x3] }
 0xbc7   :  { %4322 = vst [vmem:[#allocation1 + $0x23] ss:$4 sm:$0xff] %v4279_v52 }
 0xbce   :  { %v4324_v33 = vld.sshfl [vmem:[#allocation1 + $0x20] sm:$0xff pattern:$0x73625140] }
 0xbcf   :  { %4346 = vmatmul.f32.gmra.mxu0 %v4324_v33  ;;  %4413 = vst [vmem:[#allocation1 + $0x20] ss:$4 sm:$0xff] %v4371_v7 }
 0xbd0   :  { %4415 = vst [vmem:[#allocation1 + $0x21] ss:$4 sm:$0xff] %v4379_v48 }
 0xc4c   :  { %v4347_v49 = vpop.f32.mrf.mxu0 }
 0xc4d   :  { %v4348_v24 = vadd.f32 %v7426_v46, %v4347_v49 }
 0xc4f   :  { %v4356_v55 = vrot.slane %v4348_v24, 4  ;;  %v4541_v25 = vrot.slane %v4348_v24, 6  ;;  %v4542_v60 = vrot.slane %v4348_v24, 10 }
 0xc51   :  { %v4381_v15 = vsel %vm75_vm0, %v4541_v25, %v4348_v24  ;;  %v4389_v21 = vsel %vm75_vm0, %v4542_v60, %v4356_v55 }
 0xc52   :  { %v4385_v50 = vperm.slane %v4381_v15, %v7727_v13  ;;  %v4393_v6 = vperm.slane %v4389_v21, %v7727_v13 }
 0xc54   :  { %v4386_v20 = vrot.slane %v4385_v50, 4  ;;  %v4394_v45 = vrot.slane %v4393_v6, 4  ;;  %4408 = vst [vmem:[#allocation1 + $0x2] ss:$4 sm:$0xff] %v4385_v50 }
 0xc55   :  { %4410 = vst [vmem:[#allocation1 + $0x3] ss:$4 sm:$0xff] %v4393_v6 }
 0xc56   :  { %v4387_v56 = vsel %vm75_vm0, 0.0, %v4386_v20  ;;  %v4395_v12 = vsel %vm75_vm0, 0.0, %v4394_v45 }
 0xc57   :  { %4417 = vst [vmem:[#allocation1 + $0x22] ss:$4 sm:$0xff] %v4387_v56 }
 0xc58   :  { %4419 = vst [vmem:[#allocation1 + $0x23] ss:$4 sm:$0xff] %v4395_v12 }
 0xc5c   :  { %v4411_v46 = vld.sshfl [vmem:[#allocation1] sm:$0xff pattern:$0x73625140] }
 0xc5d   :  { %4423 = vst.msk [vmem:[#allocation9] sm:$0xff] %vm170_vm1, %v4411_v46 }
 0xc5f   :  { %v4420_v13 = vld.sshfl [vmem:[#allocation1 + $0x20] sm:$0xff pattern:$0x73625140] }
 0xc60   :  { %4424 = vst.msk [vmem:[#allocation9 + $0x8] sm:$0xff] %vm170_vm1, %v4420_v13 }
 0xc61   :  { %4437 = dma.vmem_to_hbm [thread:$0]  %s4430_s12, 256, %s4432_s17, [#allocation6], %s4950_s18, %s4950_s18, %s4951_s5  }
 0xc62   :  { %4936 = dma.done.wait [#allocation6], 256  }
 0xc63   :  { %4937 = vsyncadd [#allocation6], 4294967040 }
 0xc64   :  { %4938 = dma.done.wait [#allocation11], 128  }
 0xc65   :  { %4939 = vsyncadd [#allocation11], 4294967168 }
 0xc66   :  { %4476 = vsyncpa [#allocation5], 1 }
 0xc67   :  { %4477 = vsyncpa [#allocation8], 1 }
 0xc68   :  { %4478 = vsyncpa [#allocation6], 1 }
 0xc69   :  { %4479 = vsyncpa [#allocation11], 1 }

</bundles_post_ra>
